<compile_context>
chip_gen: v6e
topology: v6e:2x2x1
jax: 0.10.0
libtpu: 0.0.40
codegen_flags: <defaults>
</compile_context>

<pallas_src>
import functools
import math

import jax
import jax.numpy as jnp
from jax import lax
from jax.experimental import pallas as pl
from jax.experimental.pallas import tpu as pltpu


NEG_SLOPE = 0.01  # nn.LeakyReLU default negative_slope


# ------------------------------ Pallas kernel -------------------------------

def _conv3x3_leaky_kernel(x_ref, w_ref, b_ref, o_ref, *, B, H, W):
    """One conv (grid step k) over the whole batch: 3x3 / stride-1 / pad-1 + LeakyReLU.

    x_ref: (1, B, H, W, Cin)   unpadded NHWC tile, bf16
    w_ref: (4, 9*Cin, Cout)    all four weights, grid-invariant, bf16
    b_ref: (4, Cout, 1)        all four biases, grid-invariant, f32
    o_ref: (1, B, Cout, H*W)   channel-major (lane-dense) output, f32
    """
    k = pl.program_id(0)
    cin = x_ref.shape[-1]
    HW = H * W

    x = x_ref[0]                                            # (B, H, W, Cin) bf16

    # In-kernel zero padding (no padded HBM intermediate).
    zw = jnp.zeros((B, H, 1, cin), x.dtype)
    xp = jnp.concatenate([zw, x, zw], axis=2)               # (B, H, W+2, Cin)
    zh = jnp.zeros((B, 1, W + 2, cin), x.dtype)
    xp = jnp.concatenate([zh, xp, zh], axis=1)              # (B, H+2, W+2, Cin)

    # In-kernel im2col: 9 statically shifted taps, concatenated along channels.
    taps = [xp[:, kh:kh + H, kw:kw + W, :] for kh in range(3) for kw in range(3)]
    cols = jnp.concatenate(taps, axis=-1)                   # (B, H, W, 9*Cin)
    cols = cols.reshape(B * HW, 9 * cin)                    # (B*HW, 9*Cin)

    w = w_ref[k]                                            # (9*Cin, Cout) bf16
    b = b_ref[k]                                            # (Cout, 1)     f32

    # Single MXU matmul, M = B*HW, K = 9*Cin, f32 accumulation.
    acc = jnp.dot(cols, w, preferred_element_type=jnp.float32)   # (B*HW, Cout)

    # Per-batch-slab epilogue: channel-major transpose, bias, LeakyReLU,
    # lane-dense store (HW = 256 on the 128-lane axis).
    for bi in range(B):                                     # static unroll, B small
        y = acc[bi * HW:(bi + 1) * HW, :].T + b             # (Cout, HW)
        y = jnp.where(y >= 0.0, y, NEG_SLOPE * y)           # fused LeakyReLU
        o_ref[0, bi] = y


# ------------------------------ host wrapper --------------------------------

def create_kernels_forward(params, x1, x2, x3, x4):
    """Pallas equivalent of Create_Kernels.forward. Inputs/outputs are NCHW f32."""
    xs = jnp.stack([x1, x2, x3, x4], axis=0)                # (4, B, Cin, H, W)
    K, B, Cin, H, W = xs.shape
    Cout = params["w"].shape[-1]
    HW = H * W

    # Only layout glue on the host: NCHW -> NHWC fused with the bf16 cast
    # (single XLA fusion).  No pad, no reshape.
    xs = jnp.transpose(xs, (0, 1, 3, 4, 2)).astype(jnp.bfloat16)   # (4,B,H,W,Cin)

    w = params["w"]                                         # (4, 9*Cin, Cout) bf16
    b = params["b"]                                         # (4, Cout, 1)     f32

    kernel = functools.partial(_conv3x3_leaky_kernel, B=B, H=H, W=W)
    out = pl.pallas_call(
        kernel,
        out_shape=jax.ShapeDtypeStruct((K, B, Cout, HW), jnp.float32),
        grid=(K,),
        in_specs=[
            pl.BlockSpec((1, B, H, W, Cin), lambda k: (k, 0, 0, 0, 0)),
            # Grid-invariant operands: fetched once, kept resident in VMEM.
            pl.BlockSpec((K, 9 * Cin, Cout), lambda k: (0, 0, 0)),
            pl.BlockSpec((K, Cout, 1), lambda k: (0, 0, 0)),
        ],
        out_specs=pl.BlockSpec((1, B, Cout, HW), lambda k: (k, 0, 0, 0)),
        compiler_params=pltpu.CompilerParams(
            dimension_semantics=("parallel",)),
    )(xs, w, b)

    out = out.reshape(K, B, Cout, H, W)                     # already NCHW; reshape only
    return out[0], out[1], out[2], out[3]


# -------------------------------- parameters --------------------------------

def init_params(nFeat, key):
    """Four Conv2d(2*nFeat, nFeat, 3) weight/bias sets (Conv2d-style uniform init)."""
    Cin, Cout = 2 * nFeat, nFeat
    bound = 1.0 / math.sqrt(9 * Cin)
    keys = jax.random.split(key, 8)
    ws, bs = [], []
    for i in range(4):
        # HWIO layout; flattening (kh, kw, cin) gives tap-major order (kh*3+kw)*Cin+cin,
        # matching the in-kernel im2col concatenation order.
        ws.append(jax.random.uniform(keys[2 * i], (3, 3, Cin, Cout),
                                     jnp.float32, -bound, bound))
        bs.append(jax.random.uniform(keys[2 * i + 1], (Cout,),
                                     jnp.float32, -bound, bound))
    w_hwio = jnp.stack(ws)                                  # (4, 3, 3, Cin, Cout) f32
    return {
        "w_hwio": w_hwio,                                   # used only by the reference
        "w": w_hwio.reshape(4, 9 * Cin, Cout).astype(jnp.bfloat16),
        "b": jnp.stack(bs).reshape(4, Cout, 1),
    }


# ------------------------- pure-JAX reference (check) ------------------------

def reference_forward(params, x1, x2, x3, x4):
    xs = jnp.stack([x1, x2, x3, x4], axis=0)
    x_nhwc = jnp.transpose(xs, (0, 1, 3, 4, 2)).astype(jnp.bfloat16)
    w = params["w_hwio"].astype(jnp.bfloat16)
    outs = []
    for i in range(4):
        y = lax.conv_general_dilated(
            x_nhwc[i], w[i], window_strides=(1, 1), padding=((1, 1), (1, 1)),
            dimension_numbers=("NHWC", "HWIO", "NHWC"),
            preferred_element_type=jnp.float32)
        y = y + params["b"][i].reshape(1, 1, 1, -1)
        y = jnp.where(y >= 0.0, y, NEG_SLOPE * y)
        outs.append(jnp.transpose(y, (0, 3, 1, 2)))         # back to NCHW
    return outs


# ----------------------------------- main ------------------------------------

if __name__ == "__main__":
    nFeat = 16                    # module channel width
    B, H, W = 2, 16, 16           # small test shapes; H*W = 256 (lane-dense)
    Cin = 2 * nFeat

    key = jax.random.PRNGKey(0)
    kp, k1, k2, k3, k4 = jax.random.split(key, 5)
    params = init_params(nFeat, kp)
    x1 = jax.random.normal(k1, (B, Cin, H, W), jnp.float32)
    x2 = jax.random.normal(k2, (B, Cin, H, W), jnp.float32)
    x3 = jax.random.normal(k3, (B, Cin, H, W), jnp.float32)
    x4 = jax.random.normal(k4, (B, Cin, H, W), jnp.float32)

    fwd = jax.jit(create_kernels_forward)
    outs = fwd(params, x1, x2, x3, x4)
    outs = jax.block_until_ready(outs)

    refs = reference_forward(params, x1, x2, x3, x4)
    for o, r in zip(outs, refs):
        assert o.shape == (B, nFeat, H, W), o.shape
        assert bool(jnp.all(jnp.isfinite(o)))
        err = float(jnp.max(jnp.abs(o - r)))
        assert err < 5e-2, err

    print("KERNEL_OK")
</pallas_src>

<mosaic_0001>
module attributes {stable_mosaic.version = 11 : i64} {
  func.func @_conv3x3_leaky_kernel(%arg0: i32, %arg1: memref<1x2x16x16x32xbf16, #tpu.memory_space<vmem>>, %arg2: memref<4x288x16xbf16, #tpu.memory_space<vmem>>, %arg3: memref<4x16x1xf32, #tpu.memory_space<vmem>>, %arg4: memref<1x2x16x256xf32, #tpu.memory_space<vmem>>) attributes {dimension_semantics = [#tpu.dimension_semantics<parallel>], iteration_bounds = array<i64: 4>, scalar_prefetch = 0 : i64, scratch_operands = 0 : i64, tpu.core_type = #tpu.core_type<tc>, window_params = [{transform_indices = @transform_0, window_bounds = array<i64: 1, 2, 16, 16, 32>}, {pipeline_mode = #tpu.pipeline_mode<synchronous>, transform_indices = @transform_1, window_bounds = array<i64: 4, 288, 16>}, {pipeline_mode = #tpu.pipeline_mode<synchronous>, transform_indices = @transform_2, window_bounds = array<i64: 4, 16, 1>}, {transform_indices = @transform_3, window_bounds = array<i64: 1, 2, 16, 256>}]} {
    %c0 = arith.constant 0 : index
    %c0_0 = arith.constant 0 : index
    %c0_1 = arith.constant 0 : index
    %c0_2 = arith.constant 0 : index
    %c0_3 = arith.constant 0 : index
    %0 = vector.load %arg1[%c0, %c0_0, %c0_1, %c0_2, %c0_3] : memref<1x2x16x16x32xbf16, #tpu.memory_space<vmem>>, vector<1x2x16x16x32xbf16>
    %1 = vector.shape_cast %0 : vector<1x2x16x16x32xbf16> to vector<2x16x16x32xbf16>
    %cst = arith.constant 0.000000e+00 : bf16
    %2 = vector.broadcast %cst : bf16 to vector<2x16x1x32xbf16>
    %3 = tpu.concatenate %2, %1, %2 in 2 : vector<2x16x1x32xbf16>, vector<2x16x16x32xbf16>, vector<2x16x1x32xbf16> -> vector<2x16x18x32xbf16>
    %cst_4 = arith.constant 0.000000e+00 : bf16
    %4 = vector.broadcast %cst_4 : bf16 to vector<2x1x18x32xbf16>
    %5 = tpu.concatenate %4, %3, %4 in 1 : vector<2x1x18x32xbf16>, vector<2x16x18x32xbf16>, vector<2x1x18x32xbf16> -> vector<2x18x18x32xbf16>
    %6 = vector.extract_strided_slice %5 {offsets = [0, 0, 0, 0], sizes = [2, 16, 16, 32], strides = [1, 1, 1, 1]} : vector<2x18x18x32xbf16> to vector<2x16x16x32xbf16>
    %7 = vector.extract_strided_slice %5 {offsets = [0, 0, 1, 0], sizes = [2, 16, 16, 32], strides = [1, 1, 1, 1]} : vector<2x18x18x32xbf16> to vector<2x16x16x32xbf16>
    %8 = vector.extract_strided_slice %5 {offsets = [0, 0, 2, 0], sizes = [2, 16, 16, 32], strides = [1, 1, 1, 1]} : vector<2x18x18x32xbf16> to vector<2x16x16x32xbf16>
    %9 = vector.extract_strided_slice %5 {offsets = [0, 1, 0, 0], sizes = [2, 16, 16, 32], strides = [1, 1, 1, 1]} : vector<2x18x18x32xbf16> to vector<2x16x16x32xbf16>
    %10 = vector.extract_strided_slice %5 {offsets = [0, 1, 1, 0], sizes = [2, 16, 16, 32], strides = [1, 1, 1, 1]} : vector<2x18x18x32xbf16> to vector<2x16x16x32xbf16>
    %11 = vector.extract_strided_slice %5 {offsets = [0, 1, 2, 0], sizes = [2, 16, 16, 32], strides = [1, 1, 1, 1]} : vector<2x18x18x32xbf16> to vector<2x16x16x32xbf16>
    %12 = vector.extract_strided_slice %5 {offsets = [0, 2, 0, 0], sizes = [2, 16, 16, 32], strides = [1, 1, 1, 1]} : vector<2x18x18x32xbf16> to vector<2x16x16x32xbf16>
    %13 = vector.extract_strided_slice %5 {offsets = [0, 2, 1, 0], sizes = [2, 16, 16, 32], strides = [1, 1, 1, 1]} : vector<2x18x18x32xbf16> to vector<2x16x16x32xbf16>
    %14 = vector.extract_strided_slice %5 {offsets = [0, 2, 2, 0], sizes = [2, 16, 16, 32], strides = [1, 1, 1, 1]} : vector<2x18x18x32xbf16> to vector<2x16x16x32xbf16>
    %15 = tpu.concatenate %6, %7, %8, %9, %10, %11, %12, %13, %14 in 3 : vector<2x16x16x32xbf16>, vector<2x16x16x32xbf16>, vector<2x16x16x32xbf16>, vector<2x16x16x32xbf16>, vector<2x16x16x32xbf16>, vector<2x16x16x32xbf16>, vector<2x16x16x32xbf16>, vector<2x16x16x32xbf16>, vector<2x16x16x32xbf16> -> vector<2x16x16x288xbf16>
    %16 = vector.shape_cast %15 : vector<2x16x16x288xbf16> to vector<512x288xbf16>
    %17 = arith.index_cast %arg0 : i32 to index
    %c0_5 = arith.constant 0 : index
    %c0_6 = arith.constant 0 : index
    %18 = vector.load %arg2[%17, %c0_5, %c0_6] : memref<4x288x16xbf16, #tpu.memory_space<vmem>>, vector<1x288x16xbf16>
    %19 = vector.shape_cast %18 : vector<1x288x16xbf16> to vector<288x16xbf16>
    %20 = arith.index_cast %arg0 : i32 to index
    %c0_7 = arith.constant 0 : index
    %c0_8 = arith.constant 0 : index
    %21 = vector.load %arg3[%20, %c0_7, %c0_8] : memref<4x16x1xf32, #tpu.memory_space<vmem>>, vector<1x16x1xf32>
    %22 = vector.shape_cast %21 : vector<1x16x1xf32> to vector<16x1xf32>
    %cst_9 = arith.constant dense<0.000000e+00> : vector<512x16xf32>
    %23 = tpu.matmul %16, %19, %cst_9 {dimension_numbers = #tpu.dot_dimension_numbers<[1], [0], [0], [1], [0, 0, 1, 1], [], []>} : vector<512x288xbf16>, vector<288x16xbf16>, vector<512x16xf32> -> vector<512x16xf32>
    %24 = vector.extract_strided_slice %23 {offsets = [0, 0], sizes = [256, 16], strides = [1, 1]} : vector<512x16xf32> to vector<256x16xf32>
    %25 = tpu.transpose %24, [1, 0] : vector<256x16xf32> -> vector<16x256xf32>
    %26 = vector.broadcast %22 : vector<16x1xf32> to vector<16x256xf32>
    %27 = arith.addf %25, %26 : vector<16x256xf32>
    %cst_10 = arith.constant 0.000000e+00 : f32
    %28 = vector.broadcast %cst_10 : f32 to vector<16x256xf32>
    %29 = arith.cmpf oge, %27, %28 : vector<16x256xf32>
    %cst_11 = arith.constant 0.00999999977 : f32
    %30 = vector.broadcast %cst_11 : f32 to vector<16x256xf32>
    %31 = arith.mulf %30, %27 : vector<16x256xf32>
    %32 = arith.select %29, %27, %31 : vector<16x256xi1>, vector<16x256xf32>
    %c0_12 = arith.constant 0 : index
    %c0_13 = arith.constant 0 : index
    %c0_14 = arith.constant 0 : index
    %c0_15 = arith.constant 0 : index
    %33 = vector.load %arg4[%c0_12, %c0_13, %c0_14, %c0_15] : memref<1x2x16x256xf32, #tpu.memory_space<vmem>>, vector<1x1x16x256xf32>
    %34 = vector.shape_cast %33 : vector<1x1x16x256xf32> to vector<16x256xf32>
    %35 = vector.shape_cast %32 : vector<16x256xf32> to vector<1x1x16x256xf32>
    tpu.vector_store %arg4[%c0_12, %c0_13, %c0_14, %c0_15], %35 {strides = array<i32>} : memref<1x2x16x256xf32, #tpu.memory_space<vmem>>, vector<1x1x16x256xf32>,
    %36 = vector.extract_strided_slice %23 {offsets = [256, 0], sizes = [256, 16], strides = [1, 1]} : vector<512x16xf32> to vector<256x16xf32>
    %37 = tpu.transpose %36, [1, 0] : vector<256x16xf32> -> vector<16x256xf32>
    %38 = vector.broadcast %22 : vector<16x1xf32> to vector<16x256xf32>
    %39 = arith.addf %37, %38 : vector<16x256xf32>
    %cst_16 = arith.constant 0.000000e+00 : f32
    %40 = vector.broadcast %cst_16 : f32 to vector<16x256xf32>
    %41 = arith.cmpf oge, %39, %40 : vector<16x256xf32>
    %cst_17 = arith.constant 0.00999999977 : f32
    %42 = vector.broadcast %cst_17 : f32 to vector<16x256xf32>
    %43 = arith.mulf %42, %39 : vector<16x256xf32>
    %44 = arith.select %41, %39, %43 : vector<16x256xi1>, vector<16x256xf32>
    %c0_18 = arith.constant 0 : index
    %c1 = arith.constant 1 : index
    %c0_19 = arith.constant 0 : index
    %c0_20 = arith.constant 0 : index
    %45 = vector.load %arg4[%c0_18, %c1, %c0_19, %c0_20] : memref<1x2x16x256xf32, #tpu.memory_space<vmem>>, vector<1x1x16x256xf32>
    %46 = vector.shape_cast %45 : vector<1x1x16x256xf32> to vector<16x256xf32>
    %47 = vector.shape_cast %44 : vector<16x256xf32> to vector<1x1x16x256xf32>
    tpu.vector_store %arg4[%c0_18, %c1, %c0_19, %c0_20], %47 {strides = array<i32>} : memref<1x2x16x256xf32, #tpu.memory_space<vmem>>, vector<1x1x16x256xf32>,
    return
  }
  func.func @transform_0(%arg0: i32) -> (i32, i32, i32, i32, i32) {
    %c0_i32 = arith.constant 0 : i32
    %c0_i32_0 = arith.constant 0 : i32
    %c0_i32_1 = arith.constant 0 : i32
    %c0_i32_2 = arith.constant 0 : i32
    %c0_i32_3 = arith.constant 0 : i32
    return %arg0, %c0_i32, %c0_i32_0, %c0_i32_1, %c0_i32_2 : i32, i32, i32, i32, i32
  }
  func.func @transform_1(%arg0: i32) -> (i32, i32, i32) {
    %c0_i32 = arith.constant 0 : i32
    %c0_i32_0 = arith.constant 0 : i32
    %c0_i32_1 = arith.constant 0 : i32
    %c0_i32_2 = arith.constant 0 : i32
    return %c0_i32, %c0_i32_0, %c0_i32_1 : i32, i32, i32
  }
  func.func @transform_2(%arg0: i32) -> (i32, i32, i32) {
    %c0_i32 = arith.constant 0 : i32
    %c0_i32_0 = arith.constant 0 : i32
    %c0_i32_1 = arith.constant 0 : i32
    %c0_i32_2 = arith.constant 0 : i32
    return %c0_i32, %c0_i32_0, %c0_i32_1 : i32, i32, i32
  }
  func.func @transform_3(%arg0: i32) -> (i32, i32, i32, i32) {
    %c0_i32 = arith.constant 0 : i32
    %c0_i32_0 = arith.constant 0 : i32
    %c0_i32_1 = arith.constant 0 : i32
    %c0_i32_2 = arith.constant 0 : i32
    return %arg0, %c0_i32, %c0_i32_0, %c0_i32_1 : i32, i32, i32, i32
  }
}

</mosaic_0001>

<bundles_post_ra>
// kernel: squeeze.4
= control target key start
LH: loop header
LB: loop body
LE: loop exit
PB: predicated region body
PF: predicated region fallthrough
CT: control target
= control target key end

     0   :  { %s679_s8 = smov 112   ;;  %s963_s0 = inlined_call_operand.vmem [shape: f32[1,2,16,256], index: 0, kind: input, shape index: {}]   ;;  %s964_s1 = inlined_call_operand.hbm [shape: f32[2,16,16,16], index: 1, kind: output, shape index: {}]  }
   0x1   :  { %v700_v0 = vld.sshfl [vmem:[%s963_s0 + $0x10] sm:$0xff pattern:$0xb3a29180]   ;;  %v706_v1 = vld.sshfl [vmem:[%s963_s0] sm:$0xff pattern:$0xb3a29180]  }
   0x2   :  { %105 = vrot.lane.b32.xlu1 %v700_v0, %s679_s8  ;;  %87 = vrot.lane.b32.xlu0 %v706_v1, %s679_s8  ;;  %v712_v2 = vld.sshfl [vmem:[%s963_s0 + $0x14] sm:$0xff pattern:$0xb3a29180]   ;;  %v600_v3 = vld.sshfl [vmem:[%s963_s0 + $0x4] sm:$0xff pattern:$0xb3a29180]  }
   0x6   :  { %114 = vrot.lane.b32.xlu1 %v712_v2, %s679_s8 }
   0x7   :  { %2 = vsyncpa [#allocation1], 0  ;;  %96 = vrot.lane.b32.xlu0 %v600_v3, %s679_s8  ;;  %v721_v4 = vld.sshfl [vmem:[%s963_s0 + $0x24] sm:$0xff pattern:$0xb3a29180]   ;;  %s680_s23 = smov 96  }
   0x8   :  { %v726_v5 = vld.sshfl [vmem:[%s963_s0 + $0x20] sm:$0xff pattern:$0xb3a29180]   ;;  %v733_v6 = vld.sshfl [vmem:[%s963_s0 + $0x34] sm:$0xff pattern:$0xb3a29180]  }
   0x9   :  { %v738_v7 = vld.sshfl [vmem:[%s963_s0 + $0x30] sm:$0xff pattern:$0xb3a29180]   ;;  %s681_s24 = smov 80   ;;  %s682_s25 = smov 64   ;;  %vm4_vm0 = vcmask 130048  }
   0xa   :  { %132 = vrot.lane.b32.xlu1 %v721_v4, %s679_s8  ;;  %s683_s26 = smov 48   ;;  %s684_s27 = smov 32   ;;  %v3_v8 = vld [vmem:[%s963_s0] sm:$0xff]   ;;  %v593_v9 = vld [vmem:[%s963_s0 + $0x8] sm:$0xff]   ;;  %v594_v10 = vld [vmem:[%s963_s0 + $0x10] sm:$0xff]  }
   0xb   :  { %123 = vrot.lane.b32.xlu0 %v726_v5, %s679_s8  ;;  %s685_s5 = smov 16   ;;  %5 = vst.msk [vmem:[#allocation0] ss:$16 sm:$0x3] %vm4_vm0, %v3_v8   ;;  %v595_v11 = vld [vmem:[%s963_s0 + $0x18] sm:$0xff]   ;;  %v596_v12 = vld [vmem:[%s963_s0 + $0x20] sm:$0xff]  }
   0xc   :  { %6 = vst.msk [vmem:[#allocation0] ss:$16 sm:$0xc] %vm4_vm0, %v3_v8   ;;  %7 = vst.msk [vmem:[#allocation0] ss:$16 sm:$0x30] %vm4_vm0, %v3_v8  }
   0xd   :  { %8 = vst.msk [vmem:[#allocation0] ss:$16 sm:$0xc0] %vm4_vm0, %v3_v8   ;;  %13 = vst.msk [vmem:[#allocation0 + $0x8] ss:$16 sm:$0x3] %vm4_vm0, %v593_v9  }
   0xe   :  { %150 = vrot.lane.b32.xlu1 %v733_v6, %s679_s8  ;;  %15 = vst.msk [vmem:[#allocation0 + $0x8] ss:$16 sm:$0xc] %vm4_vm0, %v593_v9   ;;  %17 = vst.msk [vmem:[#allocation0 + $0x8] ss:$16 sm:$0x30] %vm4_vm0, %v593_v9  }
   0xf   :  { %141 = vrot.lane.b32.xlu0 %v738_v7, %s679_s8  ;;  %19 = vst.msk [vmem:[#allocation0 + $0x8] ss:$16 sm:$0xc0] %vm4_vm0, %v593_v9   ;;  %24 = vst.msk [vmem:[#allocation0 + $0x80] ss:$16 sm:$0x3] %vm4_vm0, %v594_v10  }
  0x10   :  { %26 = vst.msk [vmem:[#allocation0 + $0x80] ss:$16 sm:$0xc] %vm4_vm0, %v594_v10   ;;  %28 = vst.msk [vmem:[#allocation0 + $0x80] ss:$16 sm:$0x30] %vm4_vm0, %v594_v10  }
  0x11   :  { %30 = vst.msk [vmem:[#allocation0 + $0x80] ss:$16 sm:$0xc0] %vm4_vm0, %v594_v10   ;;  %v597_v13 = vld [vmem:[%s963_s0 + $0x28] sm:$0xff]   ;;  %v598_v14 = vld [vmem:[%s963_s0 + $0x30] sm:$0xff]   ;;  %v599_v15 = vld [vmem:[%s963_s0 + $0x38] sm:$0xff]  }
  0x12   :  { %167 = vrot.lane.b32.xlu1 %v600_v3, %s680_s23  ;;  %35 = vst.msk [vmem:[#allocation0 + $0x88] ss:$16 sm:$0x3] %vm4_vm0, %v595_v11   ;;  %37 = vst.msk [vmem:[#allocation0 + $0x88] ss:$16 sm:$0xc] %vm4_vm0, %v595_v11  }
  0x13   :  { %158 = vrot.lane.b32.xlu0 %v706_v1, %s680_s23  ;;  %39 = vst.msk [vmem:[#allocation0 + $0x88] ss:$16 sm:$0x30] %vm4_vm0, %v595_v11   ;;  %41 = vst.msk [vmem:[#allocation0 + $0x88] ss:$16 sm:$0xc0] %vm4_vm0, %v595_v11  }
  0x14   :  { %46 = vst.msk [vmem:[#allocation0 + $0x100] ss:$16 sm:$0x3] %vm4_vm0, %v596_v12   ;;  %48 = vst.msk [vmem:[#allocation0 + $0x100] ss:$16 sm:$0xc] %vm4_vm0, %v596_v12  }
  0x15   :  { %50 = vst.msk [vmem:[#allocation0 + $0x100] ss:$16 sm:$0x30] %vm4_vm0, %v596_v12   ;;  %52 = vst.msk [vmem:[#allocation0 + $0x100] ss:$16 sm:$0xc0] %vm4_vm0, %v596_v12  }
  0x16   :  { %185 = vrot.lane.b32.xlu1 %v712_v2, %s680_s23  ;;  %57 = vst.msk [vmem:[#allocation0 + $0x108] ss:$16 sm:$0x3] %vm4_vm0, %v597_v13   ;;  %59 = vst.msk [vmem:[#allocation0 + $0x108] ss:$16 sm:$0xc] %vm4_vm0, %v597_v13  }
  0x17   :  { %176 = vrot.lane.b32.xlu0 %v700_v0, %s680_s23  ;;  %61 = vst.msk [vmem:[#allocation0 + $0x108] ss:$16 sm:$0x30] %vm4_vm0, %v597_v13   ;;  %63 = vst.msk [vmem:[#allocation0 + $0x108] ss:$16 sm:$0xc0] %vm4_vm0, %v597_v13  }
  0x18   :  { %68 = vst.msk [vmem:[#allocation0 + $0x180] ss:$16 sm:$0x3] %vm4_vm0, %v598_v14   ;;  %70 = vst.msk [vmem:[#allocation0 + $0x180] ss:$16 sm:$0xc] %vm4_vm0, %v598_v14  }
  0x19   :  { %72 = vst.msk [vmem:[#allocation0 + $0x180] ss:$16 sm:$0x30] %vm4_vm0, %v598_v14   ;;  %74 = vst.msk [vmem:[#allocation0 + $0x180] ss:$16 sm:$0xc0] %vm4_vm0, %v598_v14  }
  0x1a   :  { %203 = vrot.lane.b32.xlu1 %v721_v4, %s680_s23  ;;  %79 = vst.msk [vmem:[#allocation0 + $0x188] ss:$16 sm:$0x3] %vm4_vm0, %v599_v15   ;;  %81 = vst.msk [vmem:[#allocation0 + $0x188] ss:$16 sm:$0xc] %vm4_vm0, %v599_v15  }
  0x1b   :  { %194 = vrot.lane.b32.xlu0 %v726_v5, %s680_s23  ;;  %83 = vst.msk [vmem:[#allocation0 + $0x188] ss:$16 sm:$0x30] %vm4_vm0, %v599_v15   ;;  %85 = vst.msk [vmem:[#allocation0 + $0x188] ss:$16 sm:$0xc0] %vm4_vm0, %v599_v15  }
  0x1c   :  { %s686_s0 = smov [#allocation0]  }
  0x1d   :  { %s587_s16 = sshll.u32 %s686_s0, 4  ;;  %s588_s16 = int_to_ptr.vmem [resolvable:$true] %s587_s16 }
  0x1e   :  { %221 = vrot.lane.b32.xlu1 %v733_v6, %s680_s23  ;;  %s657_s17 = scalar_lea.vmem %s588_s16, 8192  ;;  %p662_p1 = scmp.lt.s32.totalorder %s588_s16, %s588_s16 }
  0x1f   :  { %212 = vrot.lane.b32.xlu0 %v738_v7, %s680_s23  ;;  %p658_p0 = scmp.ne.s32.totalorder %s588_s16, %s657_s17  ;;  %p663_p2 = scmp.lt.s32.totalorder %s657_s17, %s657_s17 }
  0x21   :  { %p664_p3 = por %p663_p2, %p662_p1 }
  0x22   :  { %238 = vrot.lane.b32.xlu1 %v600_v3, %s681_s24 }
  0x23   :  { %229 = vrot.lane.b32.xlu0 %v706_v1, %s681_s24  ;;  %p665_p4 = pnand %p664_p3, %p658_p0 }
  0x26   :  { %256 = vrot.lane.b32.xlu1 %v712_v2, %s681_s24 }
  0x27   :  { %247 = vrot.lane.b32.xlu0 %v700_v0, %s681_s24 }
  0x2a   :  { %274 = vrot.lane.b32.xlu1 %v721_v4, %s681_s24 }
  0x2b   :  { %265 = vrot.lane.b32.xlu0 %v726_v5, %s681_s24 }
  0x2e   :  { %292 = vrot.lane.b32.xlu1 %v733_v6, %s681_s24 }
  0x2f   :  { %283 = vrot.lane.b32.xlu0 %v738_v7, %s681_s24 }
  0x32   :  { %309 = vrot.lane.b32.xlu1 %v600_v3, %s682_s25 }
  0x33   :  { %300 = vrot.lane.b32.xlu0 %v706_v1, %s682_s25 }
  0x36   :  { %327 = vrot.lane.b32.xlu1 %v712_v2, %s682_s25 }
  0x37   :  { %318 = vrot.lane.b32.xlu0 %v700_v0, %s682_s25 }
  0x3a   :  { %345 = vrot.lane.b32.xlu1 %v721_v4, %s682_s25 }
  0x3b   :  { %336 = vrot.lane.b32.xlu0 %v726_v5, %s682_s25 }
  0x3e   :  { %363 = vrot.lane.b32.xlu1 %v733_v6, %s682_s25 }
  0x3f   :  { %354 = vrot.lane.b32.xlu0 %v738_v7, %s682_s25 }
  0x42   :  { %380 = vrot.lane.b32.xlu1 %v600_v3, %s683_s26 }
  0x43   :  { %371 = vrot.lane.b32.xlu0 %v706_v1, %s683_s26 }
  0x46   :  { %398 = vrot.lane.b32.xlu1 %v712_v2, %s683_s26 }
  0x47   :  { %389 = vrot.lane.b32.xlu0 %v700_v0, %s683_s26 }
  0x4a   :  { %416 = vrot.lane.b32.xlu1 %v721_v4, %s683_s26 }
  0x4b   :  { %407 = vrot.lane.b32.xlu0 %v726_v5, %s683_s26 }
  0x4e   :  { %434 = vrot.lane.b32.xlu1 %v733_v6, %s683_s26 }
  0x4f   :  { %425 = vrot.lane.b32.xlu0 %v738_v7, %s683_s26 }
  0x52   :  { %451 = vrot.lane.b32.xlu1 %v600_v3, %s684_s27 }
  0x53   :  { %442 = vrot.lane.b32.xlu0 %v706_v1, %s684_s27 }
  0x56   :  { %469 = vrot.lane.b32.xlu1 %v712_v2, %s684_s27 }
  0x57   :  { %460 = vrot.lane.b32.xlu0 %v700_v0, %s684_s27 }
  0x5a   :  { %487 = vrot.lane.b32.xlu1 %v721_v4, %s684_s27 }
  0x5b   :  { %478 = vrot.lane.b32.xlu0 %v726_v5, %s684_s27 }
  0x5e   :  { %505 = vrot.lane.b32.xlu1 %v733_v6, %s684_s27 }
  0x5f   :  { %496 = vrot.lane.b32.xlu0 %v738_v7, %s684_s27 }
  0x62   :  { %522 = vrot.lane.b32.xlu1 %v600_v3, %s685_s5 }
  0x63   :  { %513 = vrot.lane.b32.xlu0 %v706_v1, %s685_s5 }
  0x66   :  { %540 = vrot.lane.b32.xlu1 %v712_v2, %s685_s5 }
  0x67   :  { %531 = vrot.lane.b32.xlu0 %v700_v0, %s685_s5 }
  0x6a   :  { %558 = vrot.lane.b32.xlu1 %v721_v4, %s685_s5 }
  0x6b   :  { %549 = vrot.lane.b32.xlu0 %v726_v5, %s685_s5 }
  0x6e   :  { %576 = vrot.lane.b32.xlu1 %v733_v6, %s685_s5 }
  0x6f   :  { %567 = vrot.lane.b32.xlu0 %v738_v7, %s685_s5 }
  0x74   :  { %v106_v16 = vpop.permute.xlu1 %105   ;;  %v88_v17 = vpop.permute.xlu0 %87  }
  0x75   :  { %109 = vst.msk [vmem:[#allocation0 + $0x81] ss:$8 sm:$0xf] %vm4_vm0, %v106_v16   ;;  %111 = vst.msk [vmem:[#allocation0 + $0x81] ss:$8 sm:$0xf0] %vm4_vm0, %v106_v16  }
  0x76   :  { %91 = vst.msk [vmem:[#allocation0 + $0x1] ss:$8 sm:$0xf] %vm4_vm0, %v88_v17   ;;  %93 = vst.msk [vmem:[#allocation0 + $0x1] ss:$8 sm:$0xf0] %vm4_vm0, %v88_v17  }
  0x78   :  { %v115_v18 = vpop.permute.xlu1 %114  }
  0x79   :  { %118 = vst.msk [vmem:[#allocation0 + $0xc1] ss:$8 sm:$0xf] %vm4_vm0, %v115_v18   ;;  %120 = vst.msk [vmem:[#allocation0 + $0xc1] ss:$8 sm:$0xf0] %vm4_vm0, %v115_v18   ;;  %v97_v19 = vpop.permute.xlu0 %96  }
  0x7a   :  { %100 = vst.msk [vmem:[#allocation0 + $0x41] ss:$8 sm:$0xf] %vm4_vm0, %v97_v19   ;;  %102 = vst.msk [vmem:[#allocation0 + $0x41] ss:$8 sm:$0xf0] %vm4_vm0, %v97_v19  }
  0x7c   :  { %v133_v20 = vpop.permute.xlu1 %132  }
  0x7d   :  { %136 = vst.msk [vmem:[#allocation0 + $0x141] ss:$8 sm:$0xf] %vm4_vm0, %v133_v20   ;;  %138 = vst.msk [vmem:[#allocation0 + $0x141] ss:$8 sm:$0xf0] %vm4_vm0, %v133_v20   ;;  %v124_v21 = vpop.permute.xlu0 %123  }
  0x7e   :  { %127 = vst.msk [vmem:[#allocation0 + $0x101] ss:$8 sm:$0xf] %vm4_vm0, %v124_v21   ;;  %129 = vst.msk [vmem:[#allocation0 + $0x101] ss:$8 sm:$0xf0] %vm4_vm0, %v124_v21  }
  0x80   :  { %v151_v22 = vpop.permute.xlu1 %150  }
  0x81   :  { %154 = vst.msk [vmem:[#allocation0 + $0x1c1] ss:$8 sm:$0xf] %vm4_vm0, %v151_v22   ;;  %156 = vst.msk [vmem:[#allocation0 + $0x1c1] ss:$8 sm:$0xf0] %vm4_vm0, %v151_v22   ;;  %v142_v23 = vpop.permute.xlu0 %141  }
  0x82   :  { %145 = vst.msk [vmem:[#allocation0 + $0x181] ss:$8 sm:$0xf] %vm4_vm0, %v142_v23   ;;  %147 = vst.msk [vmem:[#allocation0 + $0x181] ss:$8 sm:$0xf0] %vm4_vm0, %v142_v23  }
  0x84   :  { %v168_v24 = vpop.permute.xlu1 %167  }
  0x85   :  { %171 = vst.msk [vmem:[#allocation0 + $0x42] ss:$8 sm:$0xf] %vm4_vm0, %v168_v24   ;;  %173 = vst.msk [vmem:[#allocation0 + $0x42] ss:$8 sm:$0xf0] %vm4_vm0, %v168_v24   ;;  %v159_v25 = vpop.permute.xlu0 %158  }
  0x86   :  { %162 = vst.msk [vmem:[#allocation0 + $0x2] ss:$8 sm:$0xf] %vm4_vm0, %v159_v25   ;;  %164 = vst.msk [vmem:[#allocation0 + $0x2] ss:$8 sm:$0xf0] %vm4_vm0, %v159_v25  }
  0x88   :  { %v186_v26 = vpop.permute.xlu1 %185  }
  0x89   :  { %189 = vst.msk [vmem:[#allocation0 + $0xc2] ss:$8 sm:$0xf] %vm4_vm0, %v186_v26   ;;  %191 = vst.msk [vmem:[#allocation0 + $0xc2] ss:$8 sm:$0xf0] %vm4_vm0, %v186_v26   ;;  %v177_v27 = vpop.permute.xlu0 %176  }
  0x8a   :  { %180 = vst.msk [vmem:[#allocation0 + $0x82] ss:$8 sm:$0xf] %vm4_vm0, %v177_v27   ;;  %182 = vst.msk [vmem:[#allocation0 + $0x82] ss:$8 sm:$0xf0] %vm4_vm0, %v177_v27  }
  0x8c   :  { %v204_v28 = vpop.permute.xlu1 %203  }
  0x8d   :  { %207 = vst.msk [vmem:[#allocation0 + $0x142] ss:$8 sm:$0xf] %vm4_vm0, %v204_v28   ;;  %209 = vst.msk [vmem:[#allocation0 + $0x142] ss:$8 sm:$0xf0] %vm4_vm0, %v204_v28   ;;  %v195_v29 = vpop.permute.xlu0 %194  }
  0x8e   :  { %198 = vst.msk [vmem:[#allocation0 + $0x102] ss:$8 sm:$0xf] %vm4_vm0, %v195_v29   ;;  %200 = vst.msk [vmem:[#allocation0 + $0x102] ss:$8 sm:$0xf0] %vm4_vm0, %v195_v29  }
  0x90   :  { %v222_v30 = vpop.permute.xlu1 %221  }
  0x91   :  { %225 = vst.msk [vmem:[#allocation0 + $0x1c2] ss:$8 sm:$0xf] %vm4_vm0, %v222_v30   ;;  %227 = vst.msk [vmem:[#allocation0 + $0x1c2] ss:$8 sm:$0xf0] %vm4_vm0, %v222_v30   ;;  %v213_v31 = vpop.permute.xlu0 %212  }
  0x92   :  { %216 = vst.msk [vmem:[#allocation0 + $0x182] ss:$8 sm:$0xf] %vm4_vm0, %v213_v31   ;;  %218 = vst.msk [vmem:[#allocation0 + $0x182] ss:$8 sm:$0xf0] %vm4_vm0, %v213_v31  }
  0x94   :  { %v239_v32 = vpop.permute.xlu1 %238  }
  0x95   :  { %242 = vst.msk [vmem:[#allocation0 + $0x43] ss:$8 sm:$0xf] %vm4_vm0, %v239_v32   ;;  %244 = vst.msk [vmem:[#allocation0 + $0x43] ss:$8 sm:$0xf0] %vm4_vm0, %v239_v32   ;;  %v230_v33 = vpop.permute.xlu0 %229  }
  0x96   :  { %233 = vst.msk [vmem:[#allocation0 + $0x3] ss:$8 sm:$0xf] %vm4_vm0, %v230_v33   ;;  %235 = vst.msk [vmem:[#allocation0 + $0x3] ss:$8 sm:$0xf0] %vm4_vm0, %v230_v33  }
  0x98   :  { %v257_v34 = vpop.permute.xlu1 %256  }
  0x99   :  { %260 = vst.msk [vmem:[#allocation0 + $0xc3] ss:$8 sm:$0xf] %vm4_vm0, %v257_v34   ;;  %262 = vst.msk [vmem:[#allocation0 + $0xc3] ss:$8 sm:$0xf0] %vm4_vm0, %v257_v34   ;;  %v248_v35 = vpop.permute.xlu0 %247  }
  0x9a   :  { %251 = vst.msk [vmem:[#allocation0 + $0x83] ss:$8 sm:$0xf] %vm4_vm0, %v248_v35   ;;  %253 = vst.msk [vmem:[#allocation0 + $0x83] ss:$8 sm:$0xf0] %vm4_vm0, %v248_v35  }
  0x9c   :  { %v275_v36 = vpop.permute.xlu1 %274  }
  0x9d   :  { %278 = vst.msk [vmem:[#allocation0 + $0x143] ss:$8 sm:$0xf] %vm4_vm0, %v275_v36   ;;  %280 = vst.msk [vmem:[#allocation0 + $0x143] ss:$8 sm:$0xf0] %vm4_vm0, %v275_v36   ;;  %v266_v37 = vpop.permute.xlu0 %265  }
  0x9e   :  { %269 = vst.msk [vmem:[#allocation0 + $0x103] ss:$8 sm:$0xf] %vm4_vm0, %v266_v37   ;;  %271 = vst.msk [vmem:[#allocation0 + $0x103] ss:$8 sm:$0xf0] %vm4_vm0, %v266_v37  }
  0xa0   :  { %v293_v38 = vpop.permute.xlu1 %292  }
  0xa1   :  { %296 = vst.msk [vmem:[#allocation0 + $0x1c3] ss:$8 sm:$0xf] %vm4_vm0, %v293_v38   ;;  %298 = vst.msk [vmem:[#allocation0 + $0x1c3] ss:$8 sm:$0xf0] %vm4_vm0, %v293_v38   ;;  %v284_v39 = vpop.permute.xlu0 %283  }
  0xa2   :  { %287 = vst.msk [vmem:[#allocation0 + $0x183] ss:$8 sm:$0xf] %vm4_vm0, %v284_v39   ;;  %289 = vst.msk [vmem:[#allocation0 + $0x183] ss:$8 sm:$0xf0] %vm4_vm0, %v284_v39  }
  0xa4   :  { %v310_v40 = vpop.permute.xlu1 %309  }
  0xa5   :  { %313 = vst.msk [vmem:[#allocation0 + $0x44] ss:$8 sm:$0xf] %vm4_vm0, %v310_v40   ;;  %315 = vst.msk [vmem:[#allocation0 + $0x44] ss:$8 sm:$0xf0] %vm4_vm0, %v310_v40   ;;  %v301_v41 = vpop.permute.xlu0 %300  }
  0xa6   :  { %304 = vst.msk [vmem:[#allocation0 + $0x4] ss:$8 sm:$0xf] %vm4_vm0, %v301_v41   ;;  %306 = vst.msk [vmem:[#allocation0 + $0x4] ss:$8 sm:$0xf0] %vm4_vm0, %v301_v41  }
  0xa8   :  { %v328_v42 = vpop.permute.xlu1 %327  }
  0xa9   :  { %331 = vst.msk [vmem:[#allocation0 + $0xc4] ss:$8 sm:$0xf] %vm4_vm0, %v328_v42   ;;  %333 = vst.msk [vmem:[#allocation0 + $0xc4] ss:$8 sm:$0xf0] %vm4_vm0, %v328_v42   ;;  %v319_v43 = vpop.permute.xlu0 %318  }
  0xaa   :  { %322 = vst.msk [vmem:[#allocation0 + $0x84] ss:$8 sm:$0xf] %vm4_vm0, %v319_v43   ;;  %324 = vst.msk [vmem:[#allocation0 + $0x84] ss:$8 sm:$0xf0] %vm4_vm0, %v319_v43  }
  0xac   :  { %v346_v44 = vpop.permute.xlu1 %345  }
  0xad   :  { %349 = vst.msk [vmem:[#allocation0 + $0x144] ss:$8 sm:$0xf] %vm4_vm0, %v346_v44   ;;  %351 = vst.msk [vmem:[#allocation0 + $0x144] ss:$8 sm:$0xf0] %vm4_vm0, %v346_v44   ;;  %v337_v45 = vpop.permute.xlu0 %336  }
  0xae   :  { %340 = vst.msk [vmem:[#allocation0 + $0x104] ss:$8 sm:$0xf] %vm4_vm0, %v337_v45   ;;  %342 = vst.msk [vmem:[#allocation0 + $0x104] ss:$8 sm:$0xf0] %vm4_vm0, %v337_v45  }
  0xb0   :  { %v364_v46 = vpop.permute.xlu1 %363  }
  0xb1   :  { %367 = vst.msk [vmem:[#allocation0 + $0x1c4] ss:$8 sm:$0xf] %vm4_vm0, %v364_v46   ;;  %369 = vst.msk [vmem:[#allocation0 + $0x1c4] ss:$8 sm:$0xf0] %vm4_vm0, %v364_v46   ;;  %v355_v47 = vpop.permute.xlu0 %354  }
  0xb2   :  { %358 = vst.msk [vmem:[#allocation0 + $0x184] ss:$8 sm:$0xf] %vm4_vm0, %v355_v47   ;;  %360 = vst.msk [vmem:[#allocation0 + $0x184] ss:$8 sm:$0xf0] %vm4_vm0, %v355_v47  }
  0xb4   :  { %v381_v48 = vpop.permute.xlu1 %380  }
  0xb5   :  { %384 = vst.msk [vmem:[#allocation0 + $0x45] ss:$8 sm:$0xf] %vm4_vm0, %v381_v48   ;;  %386 = vst.msk [vmem:[#allocation0 + $0x45] ss:$8 sm:$0xf0] %vm4_vm0, %v381_v48   ;;  %v372_v49 = vpop.permute.xlu0 %371  }
  0xb6   :  { %375 = vst.msk [vmem:[#allocation0 + $0x5] ss:$8 sm:$0xf] %vm4_vm0, %v372_v49   ;;  %377 = vst.msk [vmem:[#allocation0 + $0x5] ss:$8 sm:$0xf0] %vm4_vm0, %v372_v49  }
  0xb8   :  { %v399_v50 = vpop.permute.xlu1 %398  }
  0xb9   :  { %402 = vst.msk [vmem:[#allocation0 + $0xc5] ss:$8 sm:$0xf] %vm4_vm0, %v399_v50   ;;  %404 = vst.msk [vmem:[#allocation0 + $0xc5] ss:$8 sm:$0xf0] %vm4_vm0, %v399_v50   ;;  %v390_v51 = vpop.permute.xlu0 %389  }
  0xba   :  { %393 = vst.msk [vmem:[#allocation0 + $0x85] ss:$8 sm:$0xf] %vm4_vm0, %v390_v51   ;;  %395 = vst.msk [vmem:[#allocation0 + $0x85] ss:$8 sm:$0xf0] %vm4_vm0, %v390_v51  }
  0xbc   :  { %v417_v52 = vpop.permute.xlu1 %416  }
  0xbd   :  { %420 = vst.msk [vmem:[#allocation0 + $0x145] ss:$8 sm:$0xf] %vm4_vm0, %v417_v52   ;;  %422 = vst.msk [vmem:[#allocation0 + $0x145] ss:$8 sm:$0xf0] %vm4_vm0, %v417_v52   ;;  %v408_v53 = vpop.permute.xlu0 %407  }
  0xbe   :  { %411 = vst.msk [vmem:[#allocation0 + $0x105] ss:$8 sm:$0xf] %vm4_vm0, %v408_v53   ;;  %413 = vst.msk [vmem:[#allocation0 + $0x105] ss:$8 sm:$0xf0] %vm4_vm0, %v408_v53  }
  0xc0   :  { %v435_v54 = vpop.permute.xlu1 %434  }
  0xc1   :  { %438 = vst.msk [vmem:[#allocation0 + $0x1c5] ss:$8 sm:$0xf] %vm4_vm0, %v435_v54   ;;  %440 = vst.msk [vmem:[#allocation0 + $0x1c5] ss:$8 sm:$0xf0] %vm4_vm0, %v435_v54   ;;  %v426_v55 = vpop.permute.xlu0 %425  }
  0xc2   :  { %429 = vst.msk [vmem:[#allocation0 + $0x185] ss:$8 sm:$0xf] %vm4_vm0, %v426_v55   ;;  %431 = vst.msk [vmem:[#allocation0 + $0x185] ss:$8 sm:$0xf0] %vm4_vm0, %v426_v55  }
  0xc4   :  { %v452_v56 = vpop.permute.xlu1 %451  }
  0xc5   :  { %455 = vst.msk [vmem:[#allocation0 + $0x46] ss:$8 sm:$0xf] %vm4_vm0, %v452_v56   ;;  %457 = vst.msk [vmem:[#allocation0 + $0x46] ss:$8 sm:$0xf0] %vm4_vm0, %v452_v56   ;;  %v443_v57 = vpop.permute.xlu0 %442  }
  0xc6   :  { %446 = vst.msk [vmem:[#allocation0 + $0x6] ss:$8 sm:$0xf] %vm4_vm0, %v443_v57   ;;  %448 = vst.msk [vmem:[#allocation0 + $0x6] ss:$8 sm:$0xf0] %vm4_vm0, %v443_v57  }
  0xc8   :  { %v470_v58 = vpop.permute.xlu1 %469  }
  0xc9   :  { %473 = vst.msk [vmem:[#allocation0 + $0xc6] ss:$8 sm:$0xf] %vm4_vm0, %v470_v58   ;;  %475 = vst.msk [vmem:[#allocation0 + $0xc6] ss:$8 sm:$0xf0] %vm4_vm0, %v470_v58   ;;  %v461_v59 = vpop.permute.xlu0 %460  }
  0xca   :  { %464 = vst.msk [vmem:[#allocation0 + $0x86] ss:$8 sm:$0xf] %vm4_vm0, %v461_v59   ;;  %466 = vst.msk [vmem:[#allocation0 + $0x86] ss:$8 sm:$0xf0] %vm4_vm0, %v461_v59  }
  0xcc   :  { %v488_v60 = vpop.permute.xlu1 %487  }
  0xcd   :  { %491 = vst.msk [vmem:[#allocation0 + $0x146] ss:$8 sm:$0xf] %vm4_vm0, %v488_v60   ;;  %493 = vst.msk [vmem:[#allocation0 + $0x146] ss:$8 sm:$0xf0] %vm4_vm0, %v488_v60   ;;  %v479_v61 = vpop.permute.xlu0 %478  }
  0xce   :  { %482 = vst.msk [vmem:[#allocation0 + $0x106] ss:$8 sm:$0xf] %vm4_vm0, %v479_v61   ;;  %484 = vst.msk [vmem:[#allocation0 + $0x106] ss:$8 sm:$0xf0] %vm4_vm0, %v479_v61  }
  0xd0   :  { %v506_v62 = vpop.permute.xlu1 %505  }
  0xd1   :  { %509 = vst.msk [vmem:[#allocation0 + $0x1c6] ss:$8 sm:$0xf] %vm4_vm0, %v506_v62   ;;  %511 = vst.msk [vmem:[#allocation0 + $0x1c6] ss:$8 sm:$0xf0] %vm4_vm0, %v506_v62   ;;  %v497_v63 = vpop.permute.xlu0 %496  }
  0xd2   :  { %500 = vst.msk [vmem:[#allocation0 + $0x186] ss:$8 sm:$0xf] %vm4_vm0, %v497_v63   ;;  %502 = vst.msk [vmem:[#allocation0 + $0x186] ss:$8 sm:$0xf0] %vm4_vm0, %v497_v63  }
  0xd4   :  { %v523_v0 = vpop.permute.xlu1 %522  }
  0xd5   :  { %526 = vst.msk [vmem:[#allocation0 + $0x47] ss:$8 sm:$0xf] %vm4_vm0, %v523_v0   ;;  %528 = vst.msk [vmem:[#allocation0 + $0x47] ss:$8 sm:$0xf0] %vm4_vm0, %v523_v0   ;;  %v514_v1 = vpop.permute.xlu0 %513  }
  0xd6   :  { %517 = vst.msk [vmem:[#allocation0 + $0x7] ss:$8 sm:$0xf] %vm4_vm0, %v514_v1   ;;  %519 = vst.msk [vmem:[#allocation0 + $0x7] ss:$8 sm:$0xf0] %vm4_vm0, %v514_v1  }
  0xd8   :  { %v541_v2 = vpop.permute.xlu1 %540  }
  0xd9   :  { %544 = vst.msk [vmem:[#allocation0 + $0xc7] ss:$8 sm:$0xf] %vm4_vm0, %v541_v2   ;;  %546 = vst.msk [vmem:[#allocation0 + $0xc7] ss:$8 sm:$0xf0] %vm4_vm0, %v541_v2   ;;  %v532_v3 = vpop.permute.xlu0 %531  }
  0xda   :  { %535 = vst.msk [vmem:[#allocation0 + $0x87] ss:$8 sm:$0xf] %vm4_vm0, %v532_v3   ;;  %537 = vst.msk [vmem:[#allocation0 + $0x87] ss:$8 sm:$0xf0] %vm4_vm0, %v532_v3  }
  0xdc   :  { %v559_v4 = vpop.permute.xlu1 %558  }
  0xdd   :  { %562 = vst.msk [vmem:[#allocation0 + $0x147] ss:$8 sm:$0xf] %vm4_vm0, %v559_v4   ;;  %564 = vst.msk [vmem:[#allocation0 + $0x147] ss:$8 sm:$0xf0] %vm4_vm0, %v559_v4   ;;  %v550_v5 = vpop.permute.xlu0 %549  }
  0xde   :  { %553 = vst.msk [vmem:[#allocation0 + $0x107] ss:$8 sm:$0xf] %vm4_vm0, %v550_v5   ;;  %555 = vst.msk [vmem:[#allocation0 + $0x107] ss:$8 sm:$0xf0] %vm4_vm0, %v550_v5  }
  0xe0   :  { %v577_v6 = vpop.permute.xlu1 %576  }
  0xe1   :  { %580 = vst.msk [vmem:[#allocation0 + $0x1c7] ss:$8 sm:$0xf] %vm4_vm0, %v577_v6   ;;  %582 = vst.msk [vmem:[#allocation0 + $0x1c7] ss:$8 sm:$0xf0] %vm4_vm0, %v577_v6   ;;  %v568_v7 = vpop.permute.xlu0 %567  }
  0xe2   :  { %571 = vst.msk [vmem:[#allocation0 + $0x187] ss:$8 sm:$0xf] %vm4_vm0, %v568_v7   ;;  %573 = vst.msk [vmem:[#allocation0 + $0x187] ss:$8 sm:$0xf0] %vm4_vm0, %v568_v7  }
  0xe3   :  { %668 = shalt.err (!%p665_p4)
}
  0xe4   :  { %590 = dma.vmem_to_hbm [thread:$0]  %s588_s16, 8192, %s964_s1, [#allocation1]  }
  0xe5   :  { %677 = dma.done.wait [#allocation1], 8192  }
  0xe6   :  { %678 = vsyncadd [#allocation1], 4294959104 }
  0xe7   :  { %592 = vsyncpa [#allocation1], 1 }

// kernel: create_kernels_forward.1
= control target key start
LH: loop header
LB: loop body
LE: loop exit
PB: predicated region body
PF: predicated region fallthrough
CT: control target
= control target key end

     0   :  { %s3553_s12 = smov 0   ;;  %s5239_s0 = inlined_call_operand.vmem [shape: bf16[4,2,16,16,32], index: 0, kind: input, shape index: {}]   ;;  %s5240_s1 = inlined_call_operand.vmem [shape: bf16[4,288,16], index: 1, kind: input, shape index: {}]   ;;  %s5241_s2 = inlined_call_operand.vmem [shape: f32[4,16,1], index: 2, kind: input, shape index: {}]   ;;  %s5242_s3 = inlined_call_operand.vmem [shape: f32[4,2,16,256], index: 3, kind: output, shape index: {}]  }
   0x1 LB: > { %s3559_s13 = sadd.s32 4294967295, %s3527_s12   ;;  %p3225_p0 = scmp.ge.s32.totalorder %s3527_s12, 1  ;;  %s3527_s12 = sphi %s3553_s12, %s13_s12  }
   0x2   : > { %p137_p1 = scmp.lt.s32.totalorder %s3527_s12, 5 }
   0x4   : > { %p138_p2 = pnand %p3225_p0, %p137_p1 }
   0x6   : > { %141 = sbr.rel (%p138_p2) target bundleno = 825 (0x339), region = 32 }
   0xb   : > { %p161_p3 = scmp.lt.s32.totalorder %s3559_s13, 3  ;;  %v5243_v0 = vmov 0   ;;  %s3530_s15 = smov 32   ;;  %vm685_vm0 = vsmask.f32 256  ;;  %vm684_vm1 = vcmask 1040384  }
   0xc   : > { %v3565_v1 = vrot.slane %v5243_v0, 1  ;;  %3425 = vmatprep.subr.bf16.mxu1 %v5243_v0  ;;  %2405 = vmatprep.subr.bf16.mxu0 %v5243_v0  ;;  %vm751_vm2 = vsmask.f32 7424  ;;  %vm3587_vm3 = vmand %vm684_vm1, %vm685_vm0  ;;  %s3322_s20 = smul.u32 144, %s3559_s13  ;;  %vm1243_vm4 = vcmask 1046528   ;;  %s3531_s24 = smov 64  }
   0xd   : > { %s3570_s14 = scalar_select %p161_p3, %s3559_s13, 3  ;;  %3469 = vset.pattern.permute.xlu0 %v5243_v0  ;;  %3470 = vset.pattern.permute.xlu1 %v5243_v0  ;;  %vm1684_vm5 = vcmask 261120   ;;  %vm1810_vm6 = vcmask 785408   ;;  %vm1747_vm7 = vcmask 523264  }
   0xe   : > { %1120 = vrot.lane.b32.xlu0 %v3565_v1, %s3530_s15  ;;  %s3820_s23 = scalar_lea.vmem %s5240_s1, %s3322_s20  ;;  %s3532_s25 = smov 96  }
   0xf   : > { %s3320_s16 = sshll.u32 %s3570_s14, 8  ;;  %s3263_s26 = sshll.u32 %s3559_s13, 4 }
  0x10   : > { %s3580_s19 = scalar_lea.vmem %s5239_s0, %s3320_s16  ;;  %s4924_s29 = scalar_lea.vmem %s5241_s2, %s3263_s26 }
  0x11   : > { %v3471_v2 = vld [vmem:[%s3580_s19 + $0x8] sm:$0xff]   ;;  %v3472_v3 = vld [vmem:[%s3580_s19] sm:$0xff]   ;;  %v3473_v8 = vld [vmem:[%s3580_s19 + $0x10] sm:$0xff]   ;;  %s3321_s30 = sshll.u32 %s3570_s14, 6 }
  0x12   : > { %v404_v4 = vshrl.u32 %v3471_v2, 16  ;;  %v407_v5 = vshll.u32 %v3471_v2, 16  ;;  %v397_v6 = vshrl.u32 %v3472_v3, 16  ;;  %v400_v7 = vshll.u32 %v3472_v3, 16  ;;  %v3474_v9 = vld [vmem:[%s3580_s19 + $0x18] sm:$0xff]   ;;  %v3475_v11 = vld [vmem:[%s3580_s19 + $0x20] sm:$0xff]   ;;  %s5204_s6 = scalar_lea.vmem %s5242_s3, %s3321_s30 }
  0x13   : > { %v411_v14 = vshrl.u32 %v3473_v8, 16  ;;  %v414_v15 = vshll.u32 %v3473_v8, 16  ;;  %v418_v16 = vshrl.u32 %v3474_v9, 16  ;;  %v421_v19 = vshll.u32 %v3474_v9, 16  ;;  %v3476_v41 = vld [vmem:[%s3580_s19 + $0x28] sm:$0xff]   ;;  %v3477_v54 = vld [vmem:[%s3580_s19 + $0x30] sm:$0xff]  }
  0x14   : > { %v406_v10 = vrot.slane %v404_v4, 7  ;;  %v399_v13 = vrot.slane %v397_v6, 7  ;;  %v425_v20 = vshrl.u32 %v3475_v11, 16  ;;  %v428_v58 = vshll.u32 %v3475_v11, 16  ;;  %v3478_v59 = vld [vmem:[%s3580_s19 + $0x38] sm:$0xff]  }
  0x15   : > { %v413_v24 = vrot.slane %v411_v14, 7  ;;  %v420_v27 = vrot.slane %v418_v16, 7  ;;  %v432_v63 = vshrl.u32 %v3476_v41, 16  ;;  %v439_v8 = vshrl.u32 %v3477_v54, 16 }
  0x16   : > { %v409_v17 = vor.u32 %v407_v5, %v406_v10  ;;  %v3593_v18 = vsel %vm3587_vm3, %v406_v10, 0  ;;  %v402_v22 = vor.u32 %v400_v7, %v399_v13  ;;  %v3598_v23 = vsel %vm3587_vm3, %v399_v13, 0  ;;  %v3479_v10 = vld [vmem:[%s3580_s19 + $0x40] sm:$0xff]  }
  0x17   : > { %v780_v21 = vshll.u32 %v3593_v18, 16  ;;  %v768_v26 = vshll.u32 %v3598_v23, 16  ;;  %v427_v28 = vrot.slane %v425_v20, 7  ;;  %v416_v36 = vor.u32 %v414_v15, %v413_v24 }
  0x18   : > { %v3602_v25 = vsel %vm3587_vm3, 0, %v409_v17  ;;  %v3609_v32 = vsel %vm3587_vm3, 0, %v402_v22  ;;  %v3615_v38 = vsel %vm3587_vm3, %v413_v24, 0  ;;  %v423_v39 = vor.u32 %v421_v19, %v420_v27 }
  0x19   : > { %v773_v29 = vshrl.u32 %v3602_v25, 16  ;;  %v775_v30 = vshll.u32 %v3602_v25, 16  ;;  %v782_v31 = vrot.slane %v780_v21, 1  ;;  %v761_v33 = vshrl.u32 %v3609_v32, 16 }
  0x1a   : > { %v763_v34 = vshll.u32 %v3609_v32, 16  ;;  %v770_v35 = vrot.slane %v768_v26, 1  ;;  %v3619_v40 = vsel %vm3587_vm3, %v420_v27, 0  ;;  %v3624_v43 = vsel %vm3587_vm3, 0, %v416_v36 }
  0x1b   : > { %v777_v37 = vrot.slane %v775_v30, 1  ;;  %v792_v44 = vshll.u32 %v3615_v38, 16  ;;  %v804_v45 = vshll.u32 %v3619_v40, 16  ;;  %v785_v47 = vshrl.u32 %v3624_v43, 16 }
  0x1c   : > { %v765_v42 = vrot.slane %v763_v34, 1  ;;  %v787_v48 = vshll.u32 %v3624_v43, 16  ;;  %v3632_v49 = vsel %vm3587_vm3, 0, %v423_v39  ;;  %v3648_v62 = vsel %vm3587_vm3, %v427_v28, 0 }
  0x1d   : > { %v778_v46 = vor.u32 %v777_v37, %v773_v29  ;;  %v794_v51 = vrot.slane %v792_v44, 1  ;;  %v797_v52 = vshrl.u32 %v3632_v49, 16  ;;  %v799_v53 = vshll.u32 %v3632_v49, 16 }
  0x1e   : > { %v766_v50 = vor.u32 %v765_v42, %v761_v33  ;;  %v789_v56 = vrot.slane %v787_v48, 1  ;;  %v806_v57 = vrot.slane %v804_v45, 1  ;;  %v430_v3 = vor.u32 %v428_v58, %v427_v28  ;;  %v3480_v42 = vld [vmem:[%s3580_s19 + $0x48] sm:$0xff]  }
  0x1f   : > { %v3638_v55 = vsel %vm751_vm2, %v778_v46, %v782_v31  ;;  %v801_v61 = vrot.slane %v799_v53, 1  ;;  %v816_v4 = vshll.u32 %v3648_v62, 16  ;;  %v435_v5 = vshll.u32 %v3476_v41, 16  ;;  %v3481_v53 = vld [vmem:[%s3580_s19 + $0x50] sm:$0xff]  }
  0x20   : > { %1124 = vrot.lane.b32.xlu1 %v3638_v55, %s3530_s15  ;;  %v3644_v60 = vsel %vm751_vm2, %v766_v50, %v770_v35  ;;  %v790_v2 = vor.u32 %v789_v56, %v785_v47  ;;  %v434_v7 = vrot.slane %v432_v63, 7  ;;  %v442_v9 = vshll.u32 %v3477_v54, 16 }
  0x21   : > { %1122 = vrot.lane.b32.xlu0 %v3644_v60, %s3530_s15  ;;  %v802_v6 = vor.u32 %v801_v61, %v797_v52  ;;  %v3659_v13 = vsel %vm3587_vm3, 0, %v430_v3  ;;  %v818_v14 = vrot.slane %v816_v4, 1  ;;  %v446_v15 = vshrl.u32 %v3478_v59, 16 }
  0x22   : > { %v3655_v11 = vsel %vm751_vm2, %v790_v2, %v794_v51  ;;  %v809_v17 = vshrl.u32 %v3659_v13, 16  ;;  %v811_v19 = vshll.u32 %v3659_v13, 16  ;;  %v437_v20 = vor.u32 %v435_v5, %v434_v7 }
  0x23   : > { %v3664_v16 = vsel %vm751_vm2, %v802_v6, %v806_v57  ;;  %v3672_v21 = vsel %vm3587_vm3, %v434_v7, 0  ;;  %v441_v22 = vrot.slane %v439_v8, 7  ;;  %v448_v24 = vrot.slane %v446_v15, 7  ;;  %v3483_v15 = vld [vmem:[%s3580_s19 + $0x60] sm:$0xff]  }
  0x24   : > { %1126 = vrot.lane.b32.xlu1 %v3655_v11, %s3530_s15  ;;  %v449_v26 = vshll.u32 %v3478_v59, 16  ;;  %v813_v27 = vrot.slane %v811_v19, 1  ;;  %v3676_v28 = vsel %vm3587_vm3, 0, %v437_v20  ;;  %v828_v29 = vshll.u32 %v3672_v21, 16  ;;  %v3482_v59 = vld [vmem:[%s3580_s19 + $0x58] sm:$0xff]  }
  0x25   : > { %1128 = vrot.lane.b32.xlu0 %v3664_v16, %s3530_s15  ;;  %5333 = vst [vmem:[#allocation2_spill] sm:$0xff] %v3676_v28  ;;  %v453_v30 = vshrl.u32 %v3479_v10, 16  ;;  %v821_v31 = vshrl.u32 %v3676_v28, 16  ;;  %v823_v33 = vshll.u32 %v3676_v28, 16  ;;  %v444_v34 = vor.u32 %v442_v9, %v441_v22 }
  0x26   : > { %v3683_v35 = vsel %vm3587_vm3, %v441_v22, 0  ;;  %v814_v36 = vor.u32 %v813_v27, %v809_v17  ;;  %v830_v37 = vrot.slane %v828_v29, 1  ;;  %v451_v41 = vor.u32 %v449_v26, %v448_v24 }
  0x27   : > { %v840_v39 = vshll.u32 %v3683_v35, 16  ;;  %v825_v44 = vrot.slane %v823_v33, 1  ;;  %v3689_v45 = vsel %vm3587_vm3, 0, %v444_v34  ;;  %v3693_v46 = vsel %vm3587_vm3, %v448_v24, 0 }
  0x28   : > { %5334 = vst [vmem:[#allocation3_spill] sm:$0xff] %v3693_v46  ;;  %v455_v47 = vrot.slane %v453_v30, 7  ;;  %v3696_v48 = vsel %vm751_vm2, %v814_v36, %v818_v14  ;;  %v833_v50 = vshrl.u32 %v3689_v45, 16  ;;  %v835_v51 = vshll.u32 %v3689_v45, 16  ;;  %v3732_v30 = vld [vmem:[%s3580_s19 + $0x68] sm:$0xff]  }
  0x29   : > { %v842_v52 = vrot.slane %v840_v39, 1  ;;  %1130 = vrot.lane.b32.xlu1 %v3696_v48, %s3530_s15  ;;  %v826_v54 = vor.u32 %v825_v44, %v821_v31  ;;  %v3705_v56 = vsel %vm3587_vm3, 0, %v451_v41  ;;  %v852_v57 = vshll.u32 %v3693_v46, 16 }
  0x2a   : > { %v456_v58 = vshll.u32 %v3479_v10, 16  ;;  %v837_v61 = vrot.slane %v835_v51, 1  ;;  %v845_v63 = vshrl.u32 %v3705_v56, 16  ;;  %v847_v2 = vshll.u32 %v3705_v56, 16 }
  0x2b   : > { %v3713_v3 = vsel %vm3587_vm3, %v455_v47, 0  ;;  %v3716_v4 = vsel %vm751_vm2, %v826_v54, %v830_v37  ;;  %v854_v5 = vrot.slane %v852_v57, 1  ;;  %v460_v10 = vshrl.u32 %v3480_v42, 16 }
  0x2c   : > { %5335 = vst [vmem:[#allocation4_spill] sm:$0xff] %v3713_v3  ;;  %v458_v6 = vor.u32 %v456_v58, %v455_v47  ;;  %v864_v7 = vshll.u32 %v3713_v3, 16  ;;  %1132 = vrot.lane.b32.xlu0 %v3716_v4, %s3530_s15  ;;  %v838_v8 = vor.u32 %v837_v61, %v833_v50  ;;  %v849_v9 = vrot.slane %v847_v2, 1 }
  0x2d   : > { %v463_v14 = vshll.u32 %v3480_v42, 16  ;;  %v467_v20 = vshrl.u32 %v3481_v53, 16  ;;  %v470_v22 = vshll.u32 %v3481_v53, 16  ;;  %v462_v31 = vrot.slane %v460_v10, 7 }
  0x2e   : > { %v3724_v17 = vsel %vm3587_vm3, 0, %v458_v6  ;;  %v866_v19 = vrot.slane %v864_v7, 1  ;;  %v3727_v24 = vsel %vm751_vm2, %v838_v8, %v842_v52  ;;  %v850_v26 = vor.u32 %v849_v9, %v845_v63 }
  0x2f   : > { %5336 = vst [vmem:[#allocation5_spill] sm:$0xff] %v3724_v17  ;;  %v857_v27 = vshrl.u32 %v3724_v17, 16  ;;  %v859_v29 = vshll.u32 %v3724_v17, 16  ;;  %1134 = vrot.lane.b32.xlu1 %v3727_v24, %s3530_s15  ;;  %v469_v33 = vrot.slane %v467_v20, 7  ;;  %v474_v34 = vshrl.u32 %v3482_v59, 16 }
  0x30   : > { %v477_v36 = vshll.u32 %v3482_v59, 16  ;;  %v3737_v37 = vsel %vm751_vm2, %v850_v26, %v854_v5  ;;  %v481_v41 = vshrl.u32 %v3483_v15, 16  ;;  %v484_v42 = vshll.u32 %v3483_v15, 16  ;;  %v3485_v26 = vld [vmem:[%s3580_s19 + $0x70] sm:$0xff]  }
  0x31   : > { %v861_v39 = vrot.slane %v859_v29, 1  ;;  %1136 = vrot.lane.b32.xlu0 %v3737_v37, %s3530_s15  ;;  %v465_v44 = vor.u32 %v463_v14, %v462_v31  ;;  %v3743_v47 = vsel %vm3587_vm3, %v462_v31, 0  ;;  %v472_v50 = vor.u32 %v470_v22, %v469_v33 }
  0x32   : > { %5337 = vst [vmem:[#allocation6_spill] sm:$0xff] %v3743_v47  ;;  %v3747_v51 = vsel %vm3587_vm3, %v469_v33, 0  ;;  %v876_v53 = vshll.u32 %v3743_v47, 16  ;;  %v476_v57 = vrot.slane %v474_v34, 7  ;;  %v483_v61 = vrot.slane %v481_v41, 7 }
  0x33   : > { %5338 = vst [vmem:[#allocation7_spill] sm:$0xff] %v3747_v51  ;;  %v862_v52 = vor.u32 %v861_v39, %v857_v27  ;;  %v888_v54 = vshll.u32 %v3747_v51, 16  ;;  %v3753_v58 = vsel %vm3587_vm3, 0, %v465_v44  ;;  %v3757_v59 = vsel %vm3587_vm3, 0, %v472_v50  ;;  %v4040_v51 = vld [vmem:[%s3580_s19 + $0xe8] sm:$0xff]  }
  0x34   : > { %5339 = vst [vmem:[#allocation8_spill] sm:$0xff] %v3753_v58  ;;  %5340 = vst [vmem:[#allocation9_spill] sm:$0xff] %v3757_v59  ;;  %v488_v63 = vshrl.u32 %v3732_v30, 16  ;;  %v869_v5 = vshrl.u32 %v3753_v58, 16  ;;  %v871_v6 = vshll.u32 %v3753_v58, 16  ;;  %v878_v7 = vrot.slane %v876_v53, 1 }
  0x35   : > { %v3761_v2 = vsel %vm751_vm2, %v862_v52, %v866_v19  ;;  %v881_v8 = vshrl.u32 %v3757_v59, 16  ;;  %v883_v9 = vshll.u32 %v3757_v59, 16  ;;  %v890_v10 = vrot.slane %v888_v54, 1  ;;  %v3510_v59 = vld [vmem:[%s3820_s23 + $0x70] sm:$0xff]  }
  0x36   : > { %5341 = vst [vmem:[#allocation10_spill] sm:$0xff] %v3761_v2  ;;  %1138 = vrot.lane.b32.xlu1 %v3761_v2, %s3530_s15  ;;  %v479_v14 = vor.u32 %v477_v36, %v476_v57  ;;  %v873_v15 = vrot.slane %v871_v6, 1  ;;  %v3771_v19 = vsel %vm3587_vm3, %v476_v57, 0  ;;  %v486_v20 = vor.u32 %v484_v42, %v483_v61  ;;  %v3486_v42 = vld [vmem:[%s3580_s19 + $0x80] sm:$0xff]   ;;  %v3797_v6 = vld [vmem:[%s3580_s19 + $0x88] sm:$0xff]  }
  0x37   : > { %5342 = vst [vmem:[#allocation11_spill] sm:$0xff] %v3771_v19  ;;  %v3775_v22 = vsel %vm3587_vm3, %v483_v61, 0  ;;  %v885_v27 = vrot.slane %v883_v9, 1  ;;  %v900_v31 = vshll.u32 %v3771_v19, 16  ;;  %v603_v47 = vshll.u32 %v4040_v51, 16 }
  0x38   : > { %5343 = vst [vmem:[#allocation12_spill] sm:$0xff] %v3775_v22  ;;  %v3780_v29 = vsel %vm3587_vm3, 0, %v479_v14  ;;  %v912_v33 = vshll.u32 %v3775_v22, 16  ;;  %v874_v34 = vor.u32 %v873_v15, %v869_v5  ;;  %v3788_v41 = vsel %vm3587_vm3, 0, %v486_v20 }
  0x39   : > { %5344 = vst [vmem:[#allocation13_spill] sm:$0xff] %v3780_v29  ;;  %v893_v36 = vshrl.u32 %v3780_v29, 16  ;;  %v895_v39 = vshll.u32 %v3780_v29, 16  ;;  %5345 = vst [vmem:[#allocation14_spill] sm:$0xff] %v3788_v41  ;;  %v886_v44 = vor.u32 %v885_v27, %v881_v8  ;;  %v902_v50 = vrot.slane %v900_v31, 1 }
  0x3a   : > { %v905_v52 = vshrl.u32 %v3788_v41, 16  ;;  %v907_v53 = vshll.u32 %v3788_v41, 16  ;;  %v3794_v54 = vsel %vm751_vm2, %v874_v34, %v878_v7  ;;  %v914_v61 = vrot.slane %v912_v33, 1 }
  0x3b   : > { %5346 = vst [vmem:[#allocation15_spill] sm:$0xff] %v3794_v54  ;;  %v897_v57 = vrot.slane %v895_v39, 1  ;;  %v490_v5 = vrot.slane %v488_v63, 7  ;;  %1140 = vrot.lane.b32.xlu0 %v3794_v54, %s3530_s15  ;;  %v3802_v9 = vsel %vm751_vm2, %v886_v44, %v890_v10  ;;  %v491_v14 = vshll.u32 %v3732_v30, 16 }
  0x3c   : > { %5347 = vst [vmem:[#allocation16_spill] sm:$0xff] %v3802_v9  ;;  %v909_v8 = vrot.slane %v907_v53, 1  ;;  %v495_v15 = vshrl.u32 %v3485_v26, 16  ;;  %1142 = vrot.lane.b32.xlu1 %v3802_v9, %s3530_s15  ;;  %v498_v63 = vshll.u32 %v3485_v26, 16  ;;  %v509_v27 = vshrl.u32 %v3486_v42, 16  ;;  %v3488_v53 = vld [vmem:[%s3580_s19 + $0x90] sm:$0xff]  }
  0x3d   : > { %v898_v7 = vor.u32 %v897_v57, %v893_v36  ;;  %v3809_v20 = vsel %vm3587_vm3, %v490_v5, 0  ;;  %v493_v33 = vor.u32 %v491_v14, %v490_v5  ;;  %v512_v44 = vshll.u32 %v3486_v42, 16  ;;  %v3501_v14 = vld [vmem:[%s3820_s23 + $0x38] sm:$0xff]  }
  0x3e   : > { %5348 = vst [vmem:[#allocation17_spill] sm:$0xff] %v3809_v20  ;;  %v910_v31 = vor.u32 %v909_v8, %v905_v52  ;;  %v924_v10 = vshll.u32 %v3809_v20, 16  ;;  %v497_v34 = vrot.slane %v495_v15, 7  ;;  %v511_v39 = vrot.slane %v509_v27, 7  ;;  %3441 = vmatpush1.bf16.msra.mxu1 %v3501_v14  ;;  %2406 = vmatpush1.bf16.msra.mxu0 %v3501_v14 }
  0x3f   : > { %v3814_v30 = vsel %vm751_vm2, %v898_v7, %v902_v50  ;;  %v516_v36 = vshrl.u32 %v3797_v6, 16  ;;  %v3829_v50 = vsel %vm3587_vm3, 0, %v493_v33 }
  0x40   : > { %5349 = vst [vmem:[#allocation18_spill] sm:$0xff] %v3814_v30  ;;  %1144 = vrot.lane.b32.xlu0 %v3814_v30, %s3530_s15  ;;  %v3825_v26 = vsel %vm751_vm2, %v910_v31, %v914_v61  ;;  %5351 = vst [vmem:[#allocation20_spill] sm:$0xff] %v3829_v50  ;;  %v926_v52 = vrot.slane %v924_v10, 1  ;;  %v500_v42 = vor.u32 %v498_v63, %v497_v34  ;;  %v917_v57 = vshrl.u32 %v3829_v50, 16 }
  0x41   : > { %5350 = vst [vmem:[#allocation19_spill] sm:$0xff] %v3825_v26  ;;  %1146 = vrot.lane.b32.xlu1 %v3825_v26, %s3530_s15  ;;  %v919_v5 = vshll.u32 %v3829_v50, 16  ;;  %v3838_v8 = vsel %vm3587_vm3, %v497_v34, 0  ;;  %v514_v61 = vor.u32 %v512_v44, %v511_v39  ;;  %v3848_v63 = vsel %vm3587_vm3, %v511_v39, 0 }
  0x42   : > { %5352 = vst [vmem:[#allocation21_spill] sm:$0xff] %v3838_v8  ;;  %v3843_v15 = vsel %vm3587_vm3, 0, %v500_v42  ;;  %v936_v7 = vshll.u32 %v3838_v8, 16  ;;  %5354 = vst [vmem:[#allocation23_spill] sm:$0xff] %v3848_v63  ;;  %v518_v27 = vrot.slane %v516_v36, 7  ;;  %v948_v39 = vshll.u32 %v3848_v63, 16 }
  0x43   : > { %5353 = vst [vmem:[#allocation22_spill] sm:$0xff] %v3843_v15  ;;  %v921_v31 = vrot.slane %v919_v5, 1  ;;  %v929_v33 = vshrl.u32 %v3843_v15, 16  ;;  %v931_v10 = vshll.u32 %v3843_v15, 16  ;;  %v3854_v34 = vsel %vm3587_vm3, 0, %v514_v61  ;;  %v3489_v36 = vld [vmem:[%s3580_s19 + $0x98] sm:$0xff]  }
  0x44   : > { %5355 = vst [vmem:[#allocation24_spill] sm:$0xff] %v3854_v34  ;;  %v938_v44 = vrot.slane %v936_v7, 1  ;;  %v941_v42 = vshrl.u32 %v3854_v34, 16  ;;  %v943_v0 = vshll.u32 %v3854_v34, 16  ;;  %v5356_v5 = vmov 0   ;;  %v3502_v8 = vld [vmem:[%s3820_s23 + $0x30] sm:$0xff]  }
  0x45   : > { %3426 = vmatprep.subr.bf16.mxu1 %v5356_v5  ;;  %2407 = vmatprep.subr.bf16.mxu0 %v5356_v5  ;;  %v922_v15 = vor.u32 %v921_v31, %v917_v57  ;;  %v933_v20 = vrot.slane %v931_v10, 1  ;;  %v519_v61 = vshll.u32 %v3797_v6, 16  ;;  %v3866_v14 = vsel %vm3587_vm3, %v518_v27, 0  ;;  %v3490_v7 = vld [vmem:[%s3580_s19 + $0xa0] sm:$0xff]   ;;  %v3503_v31 = vld [vmem:[%s3820_s23 + $0x28] sm:$0xff]  }
  0x46   : > { %5357 = vst [vmem:[#allocation25_spill] sm:$0xff] %v3866_v14  ;;  %v945_v50 = vrot.slane %v943_v0, 1  ;;  %v950_v34 = vrot.slane %v948_v39, 1  ;;  %v960_v63 = vshll.u32 %v3866_v14, 16  ;;  %v523_v26 = vshrl.u32 %v3488_v53, 16  ;;  %3442 = vmatpush1.bf16.msra.mxu1 %v3502_v8  ;;  %2408 = vmatpush1.bf16.msra.mxu0 %v3502_v8  ;;  %v3491_v39 = vld [vmem:[%s3580_s19 + $0xa8] sm:$0xff]  }
  0x47   : > { %v3871_v22 = vsel %vm751_vm2, %v922_v15, %v926_v52  ;;  %v934_v41 = vor.u32 %v933_v20, %v929_v33  ;;  %v521_v30 = vor.u32 %v519_v61, %v518_v27  ;;  %v526_v57 = vshll.u32 %v3488_v53, 16  ;;  %3427 = vmatprep.subr.bf16.mxu1 %v5356_v5  ;;  %2409 = vmatprep.subr.bf16.mxu0 %v5356_v5 }
  0x48   : > { %5358 = vst [vmem:[#allocation26_spill] sm:$0xff] %v3871_v22  ;;  %1148 = vrot.lane.b32.xlu0 %v3871_v22, %s3530_s15  ;;  %v946_v6 = vor.u32 %v945_v50, %v941_v42  ;;  %v962_v10 = vrot.slane %v960_v63, 1  ;;  %v525_v0 = vrot.slane %v523_v26, 7  ;;  %v530_v19 = vshrl.u32 %v3489_v36, 16 }
  0x49   : > { %v3879_v52 = vsel %vm751_vm2, %v934_v41, %v938_v44  ;;  %v3883_v20 = vsel %vm3587_vm3, 0, %v521_v30  ;;  %v533_v53 = vshll.u32 %v3489_v36, 16  ;;  %v537_v8 = vshrl.u32 %v3490_v7, 16  ;;  %v3504_v44 = vld [vmem:[%s3820_s23 + $0x20] sm:$0xff]  }
  0x4a   : > { %5359 = vst [vmem:[#allocation27_spill] sm:$0xff] %v3879_v52  ;;  %5360 = vst [vmem:[#allocation28_spill] sm:$0xff] %v3883_v20  ;;  %1150 = vrot.lane.b32.xlu1 %v3879_v52, %s3530_s15  ;;  %v3889_v26 = vsel %vm751_vm2, %v946_v6, %v950_v34  ;;  %v953_v50 = vshrl.u32 %v3883_v20, 16  ;;  %v955_v15 = vshll.u32 %v3883_v20, 16  ;;  %v528_v41 = vor.u32 %v526_v57, %v525_v0  ;;  %v3495_v20 = vld [vmem:[%s3580_s19 + $0xc8] sm:$0xff]  }
  0x4b   : > { %5361 = vst [vmem:[#allocation29_spill] sm:$0xff] %v3889_v26  ;;  %v3895_v63 = vsel %vm3587_vm3, %v525_v0, 0  ;;  %v532_v30 = vrot.slane %v530_v19, 7  ;;  %v539_v27 = vrot.slane %v537_v8, 7  ;;  %v540_v33 = vshll.u32 %v3490_v7, 16  ;;  %3443 = vmatpush1.bf16.msra.mxu1 %v3503_v31  ;;  %2410 = vmatpush1.bf16.msra.mxu0 %v3503_v31 }
  0x4c   : > { %5362 = vst [vmem:[#allocation30_spill] sm:$0xff] %v3895_v63  ;;  %1152 = vrot.lane.b32.xlu0 %v3889_v26, %s3530_s15  ;;  %v957_v34 = vrot.slane %v955_v15, 1  ;;  %v3902_v42 = vsel %vm3587_vm3, 0, %v528_v41  ;;  %v972_v36 = vshll.u32 %v3895_v63, 16  ;;  %v544_v61 = vshrl.u32 %v3491_v39, 16  ;;  %3428 = vmatprep.subr.bf16.mxu1 %v5356_v5 }
  0x4d   : > { %5363 = vst [vmem:[#allocation31_spill] sm:$0xff] %v3902_v42  ;;  %v965_v19 = vshrl.u32 %v3902_v42, 16  ;;  %v967_v7 = vshll.u32 %v3902_v42, 16  ;;  %v535_v57 = vor.u32 %v533_v53, %v532_v30  ;;  %v3910_v31 = vsel %vm3587_vm3, %v532_v30, 0  ;;  %2411 = vmatprep.subr.bf16.mxu0 %v5356_v5  ;;  %v3505_v30 = vld [vmem:[%s3820_s23 + $0x18] sm:$0xff]  }
  0x4e   : > { %5364 = vst [vmem:[#allocation32_spill] sm:$0xff] %v3910_v31  ;;  %v958_v6 = vor.u32 %v957_v34, %v953_v50  ;;  %v974_v0 = vrot.slane %v972_v36, 1  ;;  %v984_v8 = vshll.u32 %v3910_v31, 16  ;;  %v542_v15 = vor.u32 %v540_v33, %v539_v27 }
  0x4f   : > { %v969_v41 = vrot.slane %v967_v7, 1  ;;  %v3916_v26 = vsel %vm3587_vm3, 0, %v535_v57  ;;  %v3920_v53 = vsel %vm3587_vm3, %v539_v27, 0  ;;  %v546_v63 = vrot.slane %v544_v61, 7  ;;  %3444 = vmatpush1.bf16.msra.mxu1 %v3504_v44  ;;  %2412 = vmatpush1.bf16.msra.mxu0 %v3504_v44  ;;  %v3492_v7 = vld [vmem:[%s3580_s19 + $0xb0] sm:$0xff]   ;;  %v3493_v57 = vld [vmem:[%s3580_s19 + $0xb8] sm:$0xff]  }
  0x50   : > { %5365 = vst [vmem:[#allocation33_spill] sm:$0xff] %v3916_v26  ;;  %5366 = vst [vmem:[#allocation34_spill] sm:$0xff] %v3920_v53  ;;  %v3924_v50 = vsel %vm751_vm2, %v958_v6, %v962_v10  ;;  %v977_v34 = vshrl.u32 %v3916_v26, 16  ;;  %v979_v33 = vshll.u32 %v3916_v26, 16  ;;  %v986_v36 = vrot.slane %v984_v8, 1  ;;  %3429 = vmatprep.subr.bf16.mxu1 %v5356_v5  ;;  %2413 = vmatprep.subr.bf16.mxu0 %v5356_v5 }
  0x51   : > { %5367 = vst [vmem:[#allocation35_spill] sm:$0xff] %v3924_v50  ;;  %1154 = vrot.lane.b32.xlu1 %v3924_v50, %s3530_s15  ;;  %v970_v27 = vor.u32 %v969_v41, %v965_v19  ;;  %v3935_v10 = vsel %vm3587_vm3, 0, %v542_v15  ;;  %v996_v44 = vshll.u32 %v3920_v53, 16  ;;  %v547_v61 = vshll.u32 %v3491_v39, 16  ;;  %v3494_v53 = vld [vmem:[%s3580_s19 + $0xc0] sm:$0xff]   ;;  %v3506_v39 = vld [vmem:[%s3820_s23 + $0x10] sm:$0xff]  }
  0x52   : > { %5368 = vst [vmem:[#allocation36_spill] sm:$0xff] %v3935_v10  ;;  %v981_v6 = vrot.slane %v979_v33, 1  ;;  %v989_v8 = vshrl.u32 %v3935_v10, 16  ;;  %v991_v31 = vshll.u32 %v3935_v10, 16  ;;  %v3943_v26 = vsel %vm3587_vm3, %v546_v63, 0 }
  0x53   : > { %5369 = vst [vmem:[#allocation37_spill] sm:$0xff] %v3943_v26  ;;  %v3946_v19 = vsel %vm751_vm2, %v970_v27, %v974_v0  ;;  %v998_v41 = vrot.slane %v996_v44, 1  ;;  %v549_v15 = vor.u32 %v547_v61, %v546_v63  ;;  %v1008_v42 = vshll.u32 %v3943_v26, 16  ;;  %3445 = vmatpush1.bf16.msra.mxu1 %v3505_v30  ;;  %2414 = vmatpush1.bf16.msra.mxu0 %v3505_v30 }
  0x54   : > { %5370 = vst [vmem:[#allocation38_spill] sm:$0xff] %v3946_v19  ;;  %1156 = vrot.lane.b32.xlu0 %v3946_v19, %s3530_s15  ;;  %v982_v33 = vor.u32 %v981_v6, %v977_v34  ;;  %v993_v10 = vrot.slane %v991_v31, 1  ;;  %v551_v50 = vshrl.u32 %v3492_v7, 16  ;;  %v554_v14 = vshll.u32 %v3492_v7, 16  ;;  %3430 = vmatprep.subr.bf16.mxu1 %v5356_v5 }
  0x55   : > { %v3957_v63 = vsel %vm3587_vm3, 0, %v549_v15  ;;  %v1010_v0 = vrot.slane %v1008_v42, 1  ;;  %v558_v27 = vshrl.u32 %v3493_v57, 16  ;;  %v561_v44 = vshll.u32 %v3493_v57, 16  ;;  %2415 = vmatprep.subr.bf16.mxu0 %v5356_v5  ;;  %v3968_v42 = vld [vmem:[%s3580_s19 + $0xd0] sm:$0xff]   ;;  %v3507_v57 = vld [vmem:[%s3820_s23 + $0x8] sm:$0xff]  }
  0x56   : > { %5371 = vst [vmem:[#allocation39_spill] sm:$0xff] %v3957_v63  ;;  %v3961_v30 = vsel %vm751_vm2, %v982_v33, %v986_v36  ;;  %v994_v31 = vor.u32 %v993_v10, %v989_v8  ;;  %v1001_v34 = vshrl.u32 %v3957_v63, 16  ;;  %v1003_v7 = vshll.u32 %v3957_v63, 16 }
  0x57   : > { %5372 = vst [vmem:[#allocation40_spill] sm:$0xff] %v3961_v30  ;;  %1158 = vrot.lane.b32.xlu1 %v3961_v30, %s3530_s15  ;;  %v553_v61 = vrot.slane %v551_v50, 7  ;;  %v560_v6 = vrot.slane %v558_v27, 7  ;;  %v565_v15 = vshrl.u32 %v3494_v53, 16  ;;  %v568_v26 = vshll.u32 %v3494_v53, 16  ;;  %3446 = vmatpush1.bf16.msra.mxu1 %v3506_v39 }
  0x58   : > { %v3972_v19 = vsel %vm751_vm2, %v994_v31, %v998_v41  ;;  %v1005_v36 = vrot.slane %v1003_v7, 1  ;;  %v572_v10 = vshrl.u32 %v3495_v20, 16  ;;  %v575_v8 = vshll.u32 %v3495_v20, 16  ;;  %3431 = vmatprep.subr.bf16.mxu1 %v5356_v5  ;;  %2416 = vmatpush1.bf16.msra.mxu0 %v3506_v39 }
  0x59   : > { %5373 = vst [vmem:[#allocation41_spill] sm:$0xff] %v3972_v19  ;;  %1160 = vrot.lane.b32.xlu0 %v3972_v19, %s3530_s15  ;;  %v556_v50 = vor.u32 %v554_v14, %v553_v61  ;;  %v3979_v53 = vsel %vm3587_vm3, %v553_v61, 0  ;;  %v563_v33 = vor.u32 %v561_v44, %v560_v6  ;;  %v3983_v41 = vsel %vm3587_vm3, %v560_v6, 0  ;;  %2417 = vmatprep.subr.bf16.mxu0 %v5356_v5  ;;  %v3508_v6 = vld [vmem:[%s3820_s23] sm:$0xff]   ;;  %v3497_v19 = vld [vmem:[%s3580_s19 + $0xd8] sm:$0xff]  }
  0x5a   : > { %5374 = vst [vmem:[#allocation42_spill] sm:$0xff] %v3979_v53  ;;  %v1006_v20 = vor.u32 %v1005_v36, %v1001_v34  ;;  %v1020_v27 = vshll.u32 %v3979_v53, 16  ;;  %v1032_v39 = vshll.u32 %v3983_v41, 16  ;;  %v567_v31 = vrot.slane %v565_v15, 7 }
  0x5b   : > { %v3990_v14 = vsel %vm3587_vm3, 0, %v556_v50  ;;  %v3994_v7 = vsel %vm3587_vm3, 0, %v563_v33  ;;  %v574_v44 = vrot.slane %v572_v10, 7  ;;  %v579_v61 = vshrl.u32 %v3968_v42, 16  ;;  %3447 = vmatpush1.bf16.msra.mxu1 %v3507_v57 }
  0x5c   : > { %5375 = vst [vmem:[#allocation43_spill] sm:$0xff] %v3990_v14  ;;  %v3999_v34 = vsel %vm751_vm2, %v1006_v20, %v1010_v0  ;;  %v1013_v36 = vshrl.u32 %v3990_v14, 16  ;;  %v1015_v15 = vshll.u32 %v3990_v14, 16  ;;  %v1022_v53 = vrot.slane %v1020_v27, 1  ;;  %3432 = vmatprep.subr.bf16.mxu1 %v5356_v5  ;;  %2418 = vmatpush1.bf16.msra.mxu0 %v3507_v57 }
  0x5d   : > { %5376 = vst [vmem:[#allocation44_spill] sm:$0xff] %v3999_v34  ;;  %1162 = vrot.lane.b32.xlu1 %v3999_v34, %s3530_s15  ;;  %v1025_v10 = vshrl.u32 %v3994_v7, 16  ;;  %v1027_v50 = vshll.u32 %v3994_v7, 16  ;;  %v1034_v33 = vrot.slane %v1032_v39, 1  ;;  %v570_v0 = vor.u32 %v568_v26, %v567_v31  ;;  %2419 = vmatprep.subr.bf16.mxu0 %v5356_v5 }
  0x5e   : > { %v1017_v20 = vrot.slane %v1015_v15, 1  ;;  %v4011_v27 = vsel %vm3587_vm3, %v567_v31, 0  ;;  %v577_v14 = vor.u32 %v575_v8, %v574_v44  ;;  %v4015_v57 = vsel %vm3587_vm3, %v574_v44, 0  ;;  %v3509_v15 = vld [vmem:[%s3820_s23 + $0x78] sm:$0xff]  }
  0x5f   : > { %v1029_v34 = vrot.slane %v1027_v50, 1  ;;  %v4019_v63 = vsel %vm3587_vm3, 0, %v570_v0  ;;  %v1044_v26 = vshll.u32 %v4011_v27, 16  ;;  %v1056_v39 = vshll.u32 %v4015_v57, 16  ;;  %3448 = vmatpush1.bf16.msra.mxu1 %v3508_v6  ;;  %v3498_v50 = vld [vmem:[%s3580_s19 + $0xe0] sm:$0xff]  }
  0x60   : > { %v1018_v30 = vor.u32 %v1017_v20, %v1013_v36  ;;  %v1037_v8 = vshrl.u32 %v4019_v63, 16  ;;  %v1039_v31 = vshll.u32 %v4019_v63, 16  ;;  %v4029_v44 = vsel %vm3587_vm3, 0, %v577_v14  ;;  %3433 = vmatprep.subr.bf16.mxu1 %v5356_v5  ;;  %2420 = vmatpush1.bf16.msra.mxu0 %v3508_v6 }
  0x61   : > { %v1030_v0 = vor.u32 %v1029_v34, %v1025_v10  ;;  %v1046_v52 = vrot.slane %v1044_v26, 1  ;;  %v1049_v22 = vshrl.u32 %v4029_v44, 16  ;;  %v1051_v36 = vshll.u32 %v4029_v44, 16  ;;  %2421 = vmatprep.subr.bf16.mxu0 %v5356_v5 }
  0x62   : > { %v4037_v20 = vsel %vm751_vm2, %v1018_v30, %v1022_v53  ;;  %v1041_v29 = vrot.slane %v1039_v31, 1  ;;  %v1058_v9 = vrot.slane %v1056_v39, 1  ;;  %v581_v14 = vrot.slane %v579_v61, 7 }
  0x63   : > { %5377 = vst [vmem:[#allocation45_spill] sm:$0xff] %v4037_v20  ;;  %1164 = vrot.lane.b32.xlu0 %v4037_v20, %s3530_s15  ;;  %v4045_v6 = vsel %vm751_vm2, %v1030_v0, %v1034_v33  ;;  %v1053_v34 = vrot.slane %v1051_v36, 1  ;;  %v582_v10 = vshll.u32 %v3968_v42, 16  ;;  %v586_v26 = vshrl.u32 %v3497_v19, 16  ;;  %3449 = vmatpush2.bf16.msra.mxu1 %v3509_v15 }
  0x64   : > { %5378 = vst [vmem:[#allocation46_spill] sm:$0xff] %v4045_v6  ;;  %1166 = vrot.lane.b32.xlu1 %v4045_v6, %s3530_s15  ;;  %v1042_v30 = vor.u32 %v1041_v29, %v1037_v8  ;;  %v4053_v53 = vsel %vm3587_vm3, %v581_v14, 0  ;;  %v589_v61 = vshll.u32 %v3497_v19, 16  ;;  %v593_v39 = vshrl.u32 %v3498_v50, 16  ;;  %3434 = vmatprep.subr.bf16.mxu1 %v5356_v5 }
  0x65   : > { %v1054_v33 = vor.u32 %v1053_v34, %v1049_v22  ;;  %v584_v31 = vor.u32 %v582_v10, %v581_v14  ;;  %v1068_v42 = vshll.u32 %v4053_v53, 16  ;;  %v588_v0 = vrot.slane %v586_v26, 7  ;;  %2422 = vmatpush2.bf16.msra.mxu0 %v3509_v15  ;;  %v3511_v14 = vld [vmem:[%s3820_s23 + $0x68] sm:$0xff]  }
  0x66   : > { %v4058_v36 = vsel %vm751_vm2, %v1042_v30, %v1046_v52  ;;  %v595_v6 = vrot.slane %v593_v39, 7  ;;  %v596_v29 = vshll.u32 %v3498_v50, 16  ;;  %v600_v8 = vshrl.u32 %v4040_v51, 16  ;;  %2423 = vmatprep.subr.bf16.mxu0 %v5356_v5 }
  0x67   : > { %5379 = vst [vmem:[#allocation47_spill] sm:$0xff] %v4058_v36  ;;  %1168 = vrot.lane.b32.xlu0 %v4058_v36, %s3530_s15  ;;  %v4065_v22 = vsel %vm751_vm2, %v1054_v33, %v1058_v9  ;;  %v4069_v19 = vsel %vm3587_vm3, 0, %v584_v31  ;;  %v1070_v15 = vrot.slane %v1068_v42, 1  ;;  %v591_v52 = vor.u32 %v589_v61, %v588_v0  ;;  %3450 = vmatpush2.bf16.msra.mxu1 %v3510_v59  ;;  %v3500_v33 = vld [vmem:[%s3580_s19 + $0xf0] sm:$0xff]  }
  0x68   : > { %1170 = vrot.lane.b32.xlu1 %v4065_v22, %s3530_s15  ;;  %v1061_v50 = vshrl.u32 %v4069_v19, 16  ;;  %v1063_v34 = vshll.u32 %v4069_v19, 16  ;;  %v4078_v9 = vsel %vm3587_vm3, %v588_v0, 0  ;;  %v598_v10 = vor.u32 %v596_v29, %v595_v6  ;;  %3435 = vmatprep.subr.bf16.mxu1 %v5356_v5 }
  0x69   : > { %v4083_v26 = vsel %vm3587_vm3, 0, %v591_v52  ;;  %v1080_v30 = vshll.u32 %v4078_v9, 16  ;;  %v4088_v61 = vsel %vm3587_vm3, %v595_v6, 0  ;;  %v602_v39 = vrot.slane %v600_v8, 7  ;;  %2424 = vmatpush2.bf16.msra.mxu0 %v3510_v59  ;;  %v3512_v59 = vld [vmem:[%s3820_s23 + $0x60] sm:$0xff]  }
  0x6a   : > { %v1065_v31 = vrot.slane %v1063_v34, 1  ;;  %v1073_v42 = vshrl.u32 %v4083_v26, 16  ;;  %v1075_v0 = vshll.u32 %v4083_v26, 16  ;;  %v4095_v29 = vsel %vm3587_vm3, 0, %v598_v10  ;;  %2425 = vmatprep.subr.bf16.mxu0 %v5356_v5 }
  0x6b   : > { %v1082_v52 = vrot.slane %v1080_v30, 1  ;;  %v1085_v20 = vshrl.u32 %v4095_v29, 16  ;;  %v1087_v6 = vshll.u32 %v4095_v29, 16  ;;  %v1092_v8 = vshll.u32 %v4088_v61, 16  ;;  %3451 = vmatpush2.bf16.msra.mxu1 %v3511_v14 }
  0x6c   : > { %v1066_v34 = vor.u32 %v1065_v31, %v1061_v50  ;;  %v1077_v54 = vrot.slane %v1075_v0, 1  ;;  %v4105_v58 = vsel %vm3587_vm3, %v602_v39, 0  ;;  %3436 = vmatprep.subr.bf16.mxu1 %v5356_v5  ;;  %v607_v2 = vshrl.u32 %v3500_v33, 16 }
  0x6d   : > { %v1089_v10 = vrot.slane %v1087_v6, 1  ;;  %v1094_v30 = vrot.slane %v1092_v8, 1  ;;  %2426 = vmatpush2.bf16.msra.mxu0 %v3511_v14  ;;  %v605_v46 = vor.u32 %v603_v47, %v602_v39  ;;  %v610_v50 = vshll.u32 %v3500_v33, 16  ;;  %v3513_v6 = vld [vmem:[%s3820_s23 + $0x58] sm:$0xff]  }
  0x6e   : > { %v4109_v3 = vsel %vm751_vm2, %v1066_v34, %v1070_v15  ;;  %v1078_v17 = vor.u32 %v1077_v54, %v1073_v42  ;;  %2427 = vmatprep.subr.bf16.mxu0 %v5356_v5  ;;  %v1104_v31 = vshll.u32 %v4105_v58, 16  ;;  %v609_v0 = vrot.slane %v607_v2, 7  ;;  %v3514_v42 = vld [vmem:[%s3820_s23 + $0x50] sm:$0xff]  }
  0x6f   : > { %1172 = vrot.lane.b32.xlu0 %v4109_v3, %s3530_s15  ;;  %v1090_v51 = vor.u32 %v1089_v10, %v1085_v20  ;;  %3452 = vmatpush2.bf16.msra.mxu1 %v3512_v59  ;;  %v4121_v15 = vsel %vm3587_vm3, 0, %v605_v46 }
  0x70   : > { %v4117_v8 = vsel %vm751_vm2, %v1078_v17, %v1082_v52  ;;  %5380 = vst [vmem:[#allocation48_spill] sm:$0xff] %v4121_v15  ;;  %3437 = vmatprep.subr.bf16.mxu1 %v5356_v5  ;;  %v1097_v2 = vshrl.u32 %v4121_v15, 16  ;;  %v1099_v54 = vshll.u32 %v4121_v15, 16  ;;  %v612_v20 = vor.u32 %v610_v50, %v609_v0 }
  0x71   : > { %1174 = vrot.lane.b32.xlu1 %v4117_v8, %s3530_s15  ;;  %v4127_v47 = vsel %vm751_vm2, %v1090_v51, %v1094_v30  ;;  %2428 = vmatpush2.bf16.msra.mxu0 %v3512_v59  ;;  %v4133_v17 = vsel %vm3587_vm3, %v609_v0, 0  ;;  %v1106_v14 = vrot.slane %v1104_v31, 1  ;;  %v3515_v51 = vld [vmem:[%s3820_s23 + $0x48] sm:$0xff]   ;;  %v1315_v0 = vrot.slane %v4019_v63, 1 }
  0x72   : > { %2429 = vmatprep.subr.bf16.mxu0 %v5356_v5  ;;  %v1101_v46 = vrot.slane %v1099_v54, 1  ;;  %v4140_v39 = vsel %vm3587_vm3, 0, %v612_v20  ;;  %v1116_v33 = vshll.u32 %v4133_v17, 16  ;;  %v1316_v54 = vrot.slane %v4011_v27, 1 }
  0x73   : > { %1176 = vrot.lane.b32.xlu0 %v4127_v47, %s3530_s15  ;;  %3453 = vmatpush2.bf16.msra.mxu1 %v3513_v6  ;;  %v1109_v52 = vshrl.u32 %v4140_v39, 16  ;;  %v1111_v59 = vshll.u32 %v4140_v39, 16  ;;  %v1312_v20 = vrot.slane %v3994_v7, 1 }
  0x74   : > { %3438 = vmatprep.subr.bf16.mxu1 %v5356_v5  ;;  %v1102_v34 = vor.u32 %v1101_v46, %v1097_v2  ;;  %v1118_v30 = vrot.slane %v1116_v33, 1  ;;  %v3517_v2 = vld [vmem:[%s3820_s23 + $0x40] sm:$0xff]   ;;  %v4167_v27 = vsel %vm1243_vm4, %v1315_v0, %v1316_v54  ;;  %v1313_v46 = vrot.slane %v3983_v41, 1 }
  0x75   : > { %2430 = vmatpush2.bf16.msra.mxu0 %v3513_v6  ;;  %v1113_v10 = vrot.slane %v1111_v59, 1  ;;  %5381 = vst [vmem:[#allocation49_spill] sm:$0xff] %v4167_v27  ;;  %v1246_v33 = vrot.slane %v3609_v32, 1  ;;  %v1319_v59 = vrot.slane %v4015_v57, 1  ;;  %v1322_v0 = vrot.slane %v4053_v53, 1 }
  0x76   : > { %2431 = vmatprep.subr.bf16.mxu0 %v5356_v5  ;;  %v4149_v50 = vsel %vm751_vm2, %v1102_v34, %v1106_v14  ;;  %v4178_v14 = vsel %vm1243_vm4, %v1312_v20, %v1313_v46  ;;  %v1249_v34 = vrot.slane %v3602_v25, 1 }
  0x77   : > { %3454 = vmatpush2.bf16.msra.mxu1 %v3514_v42  ;;  %1178 = vrot.lane.b32.xlu1 %v4149_v50, %s3530_s15  ;;  %v1114_v31 = vor.u32 %v1113_v10, %v1109_v52  ;;  %5382 = vst [vmem:[#allocation50_spill] sm:$0xff] %v4178_v14  ;;  %v1318_v52 = vrot.slane %v4029_v44, 1  ;;  %v1250_v10 = vrot.slane %v3593_v18, 1 }
  0x78   : > { %3439 = vmatprep.subr.bf16.mxu1 %v5356_v5 }
  0x79   : > { %2432 = vmatpush2.bf16.msra.mxu0 %v3514_v42  ;;  %v4158_v6 = vsel %vm751_vm2, %v1114_v31, %v1118_v30  ;;  %v1247_v42 = vrot.slane %v3598_v23, 1  ;;  %v4193_v23 = vsel %vm1243_vm4, %v1318_v52, %v1319_v59  ;;  %v1321_v31 = vrot.slane %v4069_v19, 1 }
  0x7a   : > { %2433 = vmatprep.subr.bf16.mxu0 %v5356_v5  ;;  %1180 = vrot.lane.b32.xlu0 %v4158_v6, %s3530_s15  ;;  %5383 = vst [vmem:[#allocation51_spill] sm:$0xff] %v4193_v23 }
  0x7b   : > { %3455 = vmatpush2.bf16.msra.mxu1 %v3515_v51  ;;  %1336 = vrot.lane.b32.xlu1 %v3565_v1, %s3531_s24  ;;  %v1248_v41 = vsel %vm1243_vm4, %v1246_v33, %v1247_v42  ;;  %v1252_v33 = vrot.slane %v3624_v43, 1  ;;  %v1253_v42 = vrot.slane %v3615_v38, 1 }
  0x7c   : > { %3440 = vmatprep.subr.bf16.mxu1 %v5356_v5 }
  0x7d   : > { %2434 = vmatpush2.bf16.msra.mxu0 %v3515_v51  ;;  %v4218_v51 = vsel %vm1243_vm4, %v1249_v34, %v1250_v10  ;;  %v4261_v59 = vsel %vm1243_vm4, %v1252_v33, %v1253_v42  ;;  %v1324_v34 = vrot.slane %v4083_v26, 1  ;;  %v1325_v10 = vrot.slane %v4078_v9, 1 }
  0x7e   : > { %2435 = vmatprep.subr.bf16.mxu0 %v5356_v5  ;;  %1544 = vrot.lane.b32.xlu0 %v4167_v27, %s3530_s15  ;;  %5384 = vst [vmem:[#allocation52_spill] sm:$0xff] %v4218_v51  ;;  %5389 = vst [vmem:[#allocation57_spill] sm:$0xff] %v4261_v59 }
  0x7f   : > { %3456 = vmatpush2.bf16.msra.mxu1 %v3517_v2  ;;  %1608 = vrot.lane.b32.xlu1 %v4029_v44, %s3531_s24  ;;  %v4272_v38 = vsel %vm1243_vm4, %v1324_v34, %v1325_v10  ;;  %v1255_v34 = vrot.slane %v3632_v49, 1  ;;  %v1256_v10 = vrot.slane %v3619_v40, 1 }
  0x80   : > { %v4205_v57 = vpop.permute.xlu0 %1120  ;;  %5391 = vst [vmem:[#allocation59_spill] sm:$0xff] %v4272_v38 }
  0x81   : > { %2436 = vmatpush2.bf16.msra.mxu0 %v3517_v2  ;;  %v4231_v2 = vsel %vm1243_vm4, %v1321_v31, %v1322_v0 }
  0x82   : > { %1382 = vrot.lane.b32.xlu0 %v4178_v14, %s3531_s24  ;;  %5385 = vst [vmem:[#allocation53_spill] sm:$0xff] %v4231_v2 }
  0x83   : > { %1670 = vrot.lane.b32.xlu1 %v4065_v22, %s3532_s25 }
  0x86   : > { %1448 = vrot.lane.b32.xlu0 %v4019_v63, %s3532_s25 }
  0x87   : > { %1496 = vrot.lane.b32.xlu1 %v1248_v41, %s3530_s15 }
  0x8a   : > { %1560 = vrot.lane.b32.xlu0 %v3602_v25, %s3531_s24 }
  0x8b   : > { %1546 = vrot.lane.b32.xlu1 %v4193_v23, %s3530_s15 }
  0x8e   : > { %1622 = vrot.lane.b32.xlu0 %v3638_v55, %s3532_s25 }
  0x8f   : > { %1400 = vrot.lane.b32.xlu1 %v3609_v32, %s3532_s25 }
  0x92   : > { %1610 = vrot.lane.b32.xlu0 %v4069_v19, %s3531_s24  ;;  %v4211_v30 = vpop.permute.xlu1 %1124 }
  0x93   : > { %1384 = vrot.lane.b32.xlu1 %v4167_v27, %s3531_s24  ;;  %v4222_v54 = vpop.permute.xlu0 %1122  ;;  %v4303_v27 = vsel %vm1243_vm4, %v1255_v34, %v1256_v10 }
  0x94   : > { %5397 = vst [vmem:[#allocation65_spill] sm:$0xff] %v4303_v27 }
  0x96   : > { %1672 = vrot.lane.b32.xlu0 %v4109_v3, %s3532_s25  ;;  %v4228_v18 = vpop.permute.xlu1 %1126 }
  0x97   : > { %1450 = vrot.lane.b32.xlu1 %v4029_v44, %s3532_s25  ;;  %v4234_v20 = vpop.permute.xlu0 %1128 }
  0x9a   : > { %1498 = vrot.lane.b32.xlu0 %v4218_v51, %s3530_s15 }
  0x9b   : > { %1562 = vrot.lane.b32.xlu1 %v3624_v43, %s3531_s24  ;;  %v4238_v53 = vpop.permute.xlu1 %1130 }
  0x9e   : > { %1338 = vrot.lane.b32.xlu0 %v1248_v41, %s3531_s24  ;;  %v4244_v46 = vpop.permute.xlu0 %1132 }
  0x9f   : > { %1548 = vrot.lane.b32.xlu1 %v4231_v2, %s3530_s15  ;;  %5386 = vst [vmem:[#allocation54_spill] sm:$0xff] %v4244_v46 }
  0xa1   : > { %v4252_v41 = vpop.permute.xlu1 %1134 }
  0xa2   : > { %1624 = vrot.lane.b32.xlu0 %v3655_v11, %s3532_s25  ;;  %5387 = vst [vmem:[#allocation55_spill] sm:$0xff] %v4252_v41 }
  0xa3   : > { %1402 = vrot.lane.b32.xlu1 %v3602_v25, %s3532_s25  ;;  %v4256_v52 = vpop.permute.xlu0 %1136 }
  0xa4   : > { %5388 = vst [vmem:[#allocation56_spill] sm:$0xff] %v4256_v52 }
  0xa6   : > { %1612 = vrot.lane.b32.xlu0 %v4083_v26, %s3531_s24 }
  0xa7   : > { %1386 = vrot.lane.b32.xlu1 %v4193_v23, %s3531_s24 }
  0xa8   : > { %v4265_v31 = vpop.permute.xlu1 %1138 }
  0xa9   : > { %5390 = vst [vmem:[#allocation58_spill] sm:$0xff] %v4265_v31  ;;  %v1262_v31 = vrot.slane %v3672_v21, 1 }
  0xaa   : > { %1674 = vrot.lane.b32.xlu0 %v4117_v8, %s3532_s25 }
  0xab   : > { %1452 = vrot.lane.b32.xlu1 %v4069_v19, %s3532_s25 }
  0xad   : > { %v4274_v0 = vpop.permute.xlu0 %1140 }
  0xae   : > { %1500 = vrot.lane.b32.xlu0 %v4261_v59, %s3530_s15  ;;  %5392 = vst [vmem:[#allocation60_spill] sm:$0xff] %v4274_v0  ;;  %v4280_v9 = vpop.permute.xlu1 %1142  ;;  %v1261_v0 = vrot.slane %v3676_v28, 1 }
  0xaf   : > { %1564 = vrot.lane.b32.xlu1 %v3632_v49, %s3531_s24  ;;  %5393 = vst [vmem:[#allocation61_spill] sm:$0xff] %v4280_v9  ;;  %v3516_v9 = vld [vmem:[%s3580_s19 + $0xf8] sm:$0xff]  }
  0xb2   : > { %1340 = vrot.lane.b32.xlu0 %v4218_v51, %s3531_s24  ;;  %v4284_v33 = vpop.permute.xlu0 %1144 }
  0xb3   : > { %1550 = vrot.lane.b32.xlu1 %v4272_v38, %s3530_s15  ;;  %5394 = vst [vmem:[#allocation62_spill] sm:$0xff] %v4284_v33  ;;  %v4288_v42 = vpop.permute.xlu1 %1146  ;;  %v1328_v33 = vrot.slane %v4088_v61, 1 }
  0xb4   : > { %5395 = vst [vmem:[#allocation63_spill] sm:$0xff] %v4288_v42 }
  0xb6   : > { %1626 = vrot.lane.b32.xlu0 %v3664_v16, %s3532_s25 }
  0xb7   : > { %1404 = vrot.lane.b32.xlu1 %v3624_v43, %s3532_s25 }
  0xba   : > { %1614 = vrot.lane.b32.xlu0 %v4095_v29, %s3531_s24  ;;  %v4296_v23 = vpop.permute.xlu0 %1148 }
  0xbb   : > { %1388 = vrot.lane.b32.xlu1 %v4231_v2, %s3531_s24  ;;  %5396 = vst [vmem:[#allocation64_spill] sm:$0xff] %v4296_v23  ;;  %v1327_v2 = vrot.slane %v4095_v29, 1 }
  0xbc   : > { %v4305_v42 = vpop.permute.xlu1 %1150 }
  0xbd   : > { %5398 = vst [vmem:[#allocation66_spill] sm:$0xff] %v4305_v42  ;;  %v4316_v23 = vsel %vm1243_vm4, %v1327_v2, %v1328_v33  ;;  %v4337_v33 = vld [vmem:[%s3820_s23 + $0x88] sm:$0xff]   ;;  %v1331_v42 = vrot.slane %v4105_v58, 1  ;;  %v614_v58 = vshrl.u32 %v3516_v9, 16 }
  0xbe   : > { %1676 = vrot.lane.b32.xlu0 %v4127_v47, %s3532_s25  ;;  %v4311_v40 = vpop.permute.xlu0 %1152  ;;  %5400 = vst [vmem:[#allocation68_spill] sm:$0xff] %v4316_v23  ;;  %3357 = vmatprep.subr.bf16.mxu1 %v4337_v33 }
  0xbf   : > { %1454 = vrot.lane.b32.xlu1 %v4083_v26, %s3532_s25  ;;  %5399 = vst [vmem:[#allocation67_spill] sm:$0xff] %v4311_v40 }
  0xc2   : > { %1502 = vrot.lane.b32.xlu0 %v4303_v27, %s3530_s15 }
  0xc3   : > { %1566 = vrot.lane.b32.xlu1 %v3659_v13, %s3531_s24  ;;  %v4318_v34 = vpop.permute.xlu1 %1154 }
  0xc4   : > { %5401 = vst [vmem:[#allocation69_spill] sm:$0xff] %v4318_v34  ;;  %v1259_v34 = vrot.slane %v3648_v62, 1 }
  0xc6   : > { %1342 = vrot.lane.b32.xlu0 %v4261_v59, %s3531_s24  ;;  %v4324_v61 = vpop.permute.xlu0 %1156 }
  0xc7   : > { %1552 = vrot.lane.b32.xlu1 %v4316_v23, %s3530_s15  ;;  %5402 = vst [vmem:[#allocation70_spill] sm:$0xff] %v4324_v61  ;;  %v1258_v61 = vrot.slane %v3659_v13, 1 }
  0xc9   : > { %v4330_v10 = vpop.permute.xlu1 %1158 }
  0xca   : > { %1628 = vrot.lane.b32.xlu0 %v3696_v48, %s3532_s25  ;;  %5403 = vst [vmem:[#allocation71_spill] sm:$0xff] %v4330_v10 }
  0xcb   : > { %1406 = vrot.lane.b32.xlu1 %v3632_v49, %s3532_s25  ;;  %v4334_v2 = vpop.permute.xlu0 %1160 }
  0xcc   : > { %5404 = vst [vmem:[#allocation72_spill] sm:$0xff] %v4334_v2  ;;  %v4351_v2 = vsel %vm1243_vm4, %v1258_v61, %v1259_v34 }
  0xcd   : > { %5406 = vst [vmem:[#allocation74_spill] sm:$0xff] %v4351_v2 }
  0xce   : > { %1616 = vrot.lane.b32.xlu0 %v4121_v15, %s3531_s24 }
  0xcf   : > { %1390 = vrot.lane.b32.xlu1 %v4272_v38, %s3531_s24  ;;  %v4344_v40 = vpop.permute.xlu1 %1162  ;;  %v1330_v38 = vrot.slane %v4121_v15, 1 }
  0xd0   : > { %5405 = vst [vmem:[#allocation73_spill] sm:$0xff] %v4344_v40 }
  0xd1   : > { %v4362_v40 = vsel %vm1243_vm4, %v1330_v38, %v1331_v42  ;;  %v616_v42 = vrot.slane %v614_v58, 7  ;;  %v1333_v58 = vrot.slane %v4140_v39, 1 }
  0xd2   : > { %1678 = vrot.lane.b32.xlu0 %v4149_v50, %s3532_s25 }
  0xd3   : > { %1456 = vrot.lane.b32.xlu1 %v4095_v29, %s3532_s25 }
  0xd5   : > { %v4353_v10 = vpop.permute.xlu0 %1164 }
  0xd6   : > { %5407 = vst [vmem:[#allocation75_spill] sm:$0xff] %v4353_v10  ;;  %1504 = vrot.lane.b32.xlu0 %v4351_v2, %s3530_s15  ;;  %v1167_v62 = vpop.permute.xlu1 %1166  ;;  %v617_v10 = vshll.u32 %v3516_v9, 16  ;;  %v4394_v9 = vsel %vm1243_vm4, %v1261_v0, %v1262_v31 }
  0xd7   : > { %1568 = vrot.lane.b32.xlu1 %v3676_v28, %s3531_s24 }
  0xd8   : > { %v619_v52 = vor.u32 %v617_v10, %v616_v42 }
  0xd9   : > { %v4367_v34 = vpop.permute.xlu0 %1168 }
  0xda   : > { %1344 = vrot.lane.b32.xlu0 %v4303_v27, %s3531_s24  ;;  %v4371_v61 = vpop.permute.xlu1 %1170  ;;  %v4400_v59 = vsel %vm3587_vm3, 0, %v619_v52 }
  0xdb   : > { %1554 = vrot.lane.b32.xlu1 %v4362_v40, %s3530_s15  ;;  %v1479_v10 = vshll.u32 %v4400_v59, 16  ;;  %v1477_v41 = vshrl.u32 %v4400_v59, 16 }
  0xdd   : > { %v1481_v51 = vrot.slane %v1479_v10, 1 }
  0xde   : > { %1630 = vrot.lane.b32.xlu0 %v3716_v4, %s3532_s25 }
  0xdf   : > { %1408 = vrot.lane.b32.xlu1 %v3659_v13, %s3532_s25 }
  0xe1   : > { %v4377_v38 = vpop.permute.xlu0 %1172 }
  0xe2   : > { %1618 = vrot.lane.b32.xlu0 %v4140_v39, %s3531_s24 }
  0xe3   : > { %1392 = vrot.lane.b32.xlu1 %v4316_v23, %s3531_s24  ;;  %v4383_v14 = vpop.permute.xlu1 %1174  ;;  %v1334_v23 = vrot.slane %v4133_v17, 1  ;;  %v750_v17 = vsel %vm3587_vm3, %v616_v42, 0  ;;  %v1482_v42 = vor.u32 %v1481_v51, %v1477_v41  ;;  %v1265_v41 = vrot.slane %v3683_v35, 1 }
  0xe4   : > { %v1484_v46 = vshll.u32 %v750_v17, 16 }
  0xe5   : > { %v4389_v27 = vpop.permute.xlu0 %1176  ;;  %v4412_v0 = vsel %vm1243_vm4, %v1333_v58, %v1334_v23 }
  0xe6   : > { %1680 = vrot.lane.b32.xlu0 %v4158_v6, %s3532_s25  ;;  %v1486_v58 = vrot.slane %v1484_v46, 1  ;;  %v1264_v46 = vrot.slane %v3689_v45, 1 }
  0xe7   : > { %1458 = vrot.lane.b32.xlu1 %v4121_v15, %s3532_s25 }
  0xe8   : > { %v4436_v51 = vsel %vm751_vm2, %v1482_v42, %v1486_v58 }
  0xe9   : > { %v4402_v21 = vpop.permute.xlu1 %1178 }
  0xea   : > { %5408 = vst [vmem:[#allocation76_spill] sm:$0xff] %v4402_v21  ;;  %1506 = vrot.lane.b32.xlu0 %v4394_v9, %s3530_s15 }
  0xeb   : > { %1570 = vrot.lane.b32.xlu1 %v3689_v45, %s3531_s24 }
  0xec   : > { %v4409_v31 = vpop.permute.xlu0 %1180 }
  0xed   : > { %5409 = vst [vmem:[#allocation77_spill] sm:$0xff] %v4409_v31  ;;  %v1337_v52 = vpop.permute.xlu1 %1336 }
  0xee   : > { %1346 = vrot.lane.b32.xlu0 %v4351_v2, %s3531_s24 }
  0xef   : > { %1556 = vrot.lane.b32.xlu1 %v4412_v0, %s3530_s15 }
  0xf0   : > { %v1545_v15 = vpop.permute.xlu0 %1544 }
  0xf1   : > { %v1609_v31 = vpop.permute.xlu1 %1608  ;;  %v1981_v23 = vsel %vm1684_vm5, %v4058_v36, %v1545_v15  ;;  %v1732_v36 = vsel %vm1684_vm5, %v3994_v7, %v1167_v62  ;;  %v4448_v62 = vsel %vm1243_vm4, %v1264_v46, %v1265_v41 }
  0xf2   : > { %1632 = vrot.lane.b32.xlu0 %v3727_v24, %s3532_s25  ;;  %v2052_v10 = vsel %vm1747_vm7, %v1981_v23, %v1609_v31 }
  0xf3   : > { %1410 = vrot.lane.b32.xlu1 %v3676_v28, %s3532_s25  ;;  %v3520_v28 = vld [vmem:[%s3820_s23 + $0x80] sm:$0xff]  }
  0xf4   : > { %v1383_v2 = vpop.permute.xlu0 %1382 }
  0xf5   : > { %v1671_v21 = vpop.permute.xlu1 %1670  ;;  %v1795_v31 = vsel %vm1747_vm7, %v1732_v36, %v1383_v2  ;;  %v1493_v36 = vrot.slane %v4400_v59, 1  ;;  %v1494_v2 = vrot.slane %v750_v17, 1 }
  0xf6   : > { %1620 = vrot.lane.b32.xlu0 %v4400_v59, %s3531_s24  ;;  %v2139_v15 = vsel %vm1810_vm6, %v2052_v10, %v1671_v21 }
  0xf7   : > { %1394 = vrot.lane.b32.xlu1 %v4362_v40, %s3531_s24  ;;  %2629 = vmatprep.mubr.bf16.mxu1 %v2139_v15  ;;  %v1686_v15 = vsel %vm1684_vm5, 0, %v4205_v57  ;;  %v4462_v17 = vsel %vm1243_vm4, %v1493_v36, %v1494_v2 }
  0xf8   : > { %v1449_v23 = vpop.permute.xlu0 %1448  ;;  %v4465_v41 = vsel %vm1747_vm7, %v1686_v15, %v1337_v52 }
  0xf9   : > { %v1884_v21 = vsel %vm1810_vm6, %v1795_v31, %v1449_v23  ;;  %v1497_v10 = vpop.permute.xlu1 %1496 }
  0xfa   : > { %1682 = vrot.lane.b32.xlu0 %v4436_v51, %s3532_s25  ;;  %2630 = vmatmul.mubr.bf16.vlgmr.msra.gmra.mxu1 %v1884_v21  ;;  %v1909_v42 = vsel %vm1684_vm5, %v3644_v60, %v1497_v10  ;;  %v1734_v21 = vsel %vm1684_vm5, %v4019_v63, %v4367_v34  ;;  %v1267_v34 = vrot.slane %v3705_v56, 1 }
  0xfb   : > { %1460 = vrot.lane.b32.xlu1 %v4140_v39, %s3532_s25  ;;  %3358 = vmatpush3.bf16.msra.mxu1 %v4337_v33 }
  0xfc   : > { %v1561_v35 = vpop.permute.xlu0 %1560  ;;  %3359 = vmatprep.subr.bf16.mxu1 %v3520_v28 }
  0xfd   : > { %v1547_v58 = vpop.permute.xlu1 %1546  ;;  %v2004_v33 = vsel %vm1747_vm7, %v1909_v42, %v1561_v35 }
  0xfe   : > { %1508 = vrot.lane.b32.xlu0 %v4448_v62, %s3530_s15  ;;  %v1984_v52 = vsel %vm1684_vm5, %v4065_v22, %v1547_v58  ;;  %v5410_v58 = vld [vmem:[#allocation3_spill] sm:$0xff] }
  0xff   : > { %1572 = vrot.lane.b32.xlu1 %v3705_v56, %s3531_s24  ;;  %3360 = vmatpush3.bf16.msra.mxu1 %v3520_v28  ;;  %v1268_v15 = vrot.slane %v5410_v58, 1 }
 0x100   : > { %v1623_v46 = vpop.permute.xlu0 %1622 }
 0x101   : > { %v2067_v60 = vsel %vm1810_vm6, %v2004_v33, %v1623_v46  ;;  %v1401_v31 = vpop.permute.xlu1 %1400 }
 0x102   : > { %1348 = vrot.lane.b32.xlu0 %v4394_v9, %s3531_s24  ;;  %2437 = vmatprep.mubr.bf16.mxu0 %v2067_v60  ;;  %v1812_v28 = vsel %vm1810_vm6, %v4465_v41, %v1401_v31 }
 0x103   : > { %1558 = vrot.lane.b32.xlu1 %v4462_v17, %s3530_s15  ;;  %2438 = vmatmul.mubr.bf16.vlgmr.msra.gmra.mxu0 %v1812_v28 }
 0x104   : > { %v1611_v57 = vpop.permute.xlu0 %1610 }
 0x105   : > { %v1385_v23 = vpop.permute.xlu1 %1384  ;;  %v2054_v10 = vsel %vm1747_vm7, %v1984_v52, %v1611_v57  ;;  %v5411_v57 = vld [vmem:[#allocation5_spill] sm:$0xff] }
 0x106   : > { %1634 = vrot.lane.b32.xlu0 %v3737_v37, %s3532_s25  ;;  %v1797_v36 = vsel %vm1747_vm7, %v1734_v21, %v1385_v23  ;;  %v1688_v23 = vsel %vm1684_vm5, %v3609_v32, %v4222_v54  ;;  %v1270_v21 = vrot.slane %v5411_v57, 1  ;;  %v5413_v32 = vld [vmem:[#allocation10_spill] sm:$0xff] }
 0x107   : > { %1412 = vrot.lane.b32.xlu1 %v3689_v45, %s3532_s25 }
 0x108   : > { %v1673_v35 = vpop.permute.xlu0 %1672 }
 0x109   : > { %v2142_v2 = vsel %vm1810_vm6, %v2054_v10, %v1673_v35  ;;  %v1451_v42 = vpop.permute.xlu1 %1450  ;;  %v5412_v10 = vld [vmem:[#allocation4_spill] sm:$0xff] }
 0x10a   : > { %1590 = vrot.lane.b32.xlu0 %v5356_v5, %s3531_s24  ;;  %2637 = vmatprep.mubr.bf16.mxu1 %v2142_v2  ;;  %v1887_v22 = vsel %vm1810_vm6, %v1797_v36, %v1451_v42  ;;  %v4498_v5 = vsel %vm1243_vm4, %v1267_v34, %v1268_v15  ;;  %v1271_v35 = vrot.slane %v5412_v10, 1  ;;  %v1736_v15 = vsel %vm1684_vm5, %v4029_v44, %v4371_v61  ;;  %v5415_v61 = vld [vmem:[#allocation6_spill] sm:$0xff]  ;;  %v5416_v10 = vld [vmem:[#allocation15_spill] sm:$0xff] }
 0x10b   : > { %1396 = vrot.lane.b32.xlu1 %v4412_v0, %s3531_s24  ;;  %2638 = vmatmul.mubr.bf16.gmra.mxu1 %v1887_v22 }
 0x10c   : > { %v1499_v33 = vpop.permute.xlu0 %1498  ;;  %v4520_v22 = vsel %vm1243_vm4, %v1270_v21, %v1271_v35 }
 0x10d   : > { %v1563_v46 = vpop.permute.xlu1 %1562  ;;  %v1912_v31 = vsel %vm1684_vm5, %v3638_v55, %v1499_v33 }
 0x10e   : > { %1652 = vrot.lane.b32.xlu0 %v3565_v1, %s3532_s25 }
 0x10f   : > { %1462 = vrot.lane.b32.xlu1 %v4400_v59, %s3532_s25  ;;  %v2006_v59 = vsel %vm1747_vm7, %v1912_v31, %v1563_v46 }
 0x110   : > { %v1339_v60 = vpop.permute.xlu0 %1338 }
 0x111   : > { %v1549_v28 = vpop.permute.xlu1 %1548  ;;  %v1751_v55 = vsel %vm1747_vm7, %v1688_v23, %v1339_v60 }
 0x112   : > { %1510 = vrot.lane.b32.xlu0 %v4498_v5, %s3530_s15  ;;  %v1987_v58 = vsel %vm1684_vm5, %v4109_v3, %v1549_v28  ;;  %v1274_v28 = vrot.slane %v5415_v61, 1 }
 0x113   : > { %1574 = vrot.lane.b32.xlu1 %v5411_v57, %s3531_s24 }
 0x114   : > { %v1625_v52 = vpop.permute.xlu0 %1624 }
 0x115   : > { %v2070_v36 = vsel %vm1810_vm6, %v2006_v59, %v1625_v52  ;;  %v1403_v2 = vpop.permute.xlu1 %1402  ;;  %v5414_v59 = vld [vmem:[#allocation8_spill] sm:$0xff] }
 0x116   : > { %1350 = vrot.lane.b32.xlu0 %v4448_v62, %s3531_s24  ;;  %2445 = vmatprep.mubr.bf16.mxu0 %v2070_v36  ;;  %v1815_v42 = vsel %vm1810_vm6, %v1751_v55, %v1403_v2  ;;  %v1273_v44 = vrot.slane %v5414_v59, 1 }
 0x117   : > { %1636 = vrot.lane.b32.xlu1 %v5413_v32, %s3532_s25  ;;  %2446 = vmatmul.mubr.bf16.gmra.mxu0 %v1815_v42  ;;  %v5417_v42 = vld [vmem:[#allocation9_spill] sm:$0xff] }
 0x118   : > { %v1613_v54 = vpop.permute.xlu0 %1612  ;;  %v4546_v35 = vsel %vm1243_vm4, %v1273_v44, %v1274_v28  ;;  %v1738_v28 = vsel %vm1684_vm5, %v4069_v19, %v4377_v38  ;;  %v5421_v38 = vld [vmem:[#allocation11_spill] sm:$0xff] }
 0x119   : > { %v1387_v34 = vpop.permute.xlu1 %1386  ;;  %v2056_v33 = vsel %vm1747_vm7, %v1987_v58, %v1613_v54  ;;  %v1690_v54 = vsel %vm1684_vm5, %v3602_v25, %v4211_v30  ;;  %v5419_v25 = vld [vmem:[#allocation16_spill] sm:$0xff] }
 0x11a   : > { %1414 = vrot.lane.b32.xlu0 %v3705_v56, %s3532_s25  ;;  %v1799_v60 = vsel %vm1747_vm7, %v1736_v15, %v1387_v34  ;;  %v1276_v15 = vrot.slane %v5417_v42, 1 }
 0x11b   : > { %1512 = vrot.lane.b32.xlu1 %v4520_v22, %s3530_s15 }
 0x11c   : > { %v1675_v46 = vpop.permute.xlu0 %1674 }
 0x11d   : > { %v2145_v31 = vsel %vm1810_vm6, %v2056_v33, %v1675_v46  ;;  %v1453_v23 = vpop.permute.xlu1 %1452  ;;  %v5418_v33 = vld [vmem:[#allocation7_spill] sm:$0xff] }
 0x11e   : > { %1576 = vrot.lane.b32.xlu0 %v5414_v59, %s3531_s24  ;;  %2645 = vmatprep.mubr.bf16.mxu1 %v2145_v31  ;;  %v1890_v3 = vsel %vm1810_vm6, %v1799_v60, %v1453_v23  ;;  %v1277_v46 = vrot.slane %v5418_v33, 1  ;;  %v5422_v33 = vld [vmem:[#allocation18_spill] sm:$0xff] }
 0x11f   : > { %1352 = vrot.lane.b32.xlu1 %v4498_v5, %s3531_s24  ;;  %2646 = vmatmul.mubr.bf16.gmra.mxu1 %v1890_v3 }
 0x120   : > { %v1501_v52 = vpop.permute.xlu0 %1500  ;;  %v4568_v3 = vsel %vm1243_vm4, %v1276_v15, %v1277_v46 }
 0x121   : > { %v1565_v21 = vpop.permute.xlu1 %1564  ;;  %v1915_v36 = vsel %vm1684_vm5, %v3655_v11, %v1501_v52 }
 0x122   : > { %1638 = vrot.lane.b32.xlu0 %v5416_v10, %s3532_s25  ;;  %v2008_v34 = vsel %vm1747_vm7, %v1915_v36, %v1565_v21 }
 0x123   : > { %1416 = vrot.lane.b32.xlu1 %v5411_v57, %s3532_s25 }
 0x124   : > { %v1341_v55 = vpop.permute.xlu0 %1340 }
 0x125   : > { %v1551_v2 = vpop.permute.xlu1 %1550  ;;  %v1753_v11 = vsel %vm1747_vm7, %v1690_v54, %v1341_v55 }
 0x126   : > { %1514 = vrot.lane.b32.xlu0 %v4546_v35, %s3530_s15  ;;  %v1990_v61 = vsel %vm1684_vm5, %v4117_v8, %v1551_v2  ;;  %v1280_v2 = vrot.slane %v5421_v38, 1 }
 0x127   : > { %1578 = vrot.lane.b32.xlu1 %v5417_v42, %s3531_s24 }
 0x128   : > { %v1627_v58 = vpop.permute.xlu0 %1626 }
 0x129   : > { %v2073_v60 = vsel %vm1810_vm6, %v2008_v34, %v1627_v58  ;;  %v1405_v31 = vpop.permute.xlu1 %1404  ;;  %v5420_v34 = vld [vmem:[#allocation13_spill] sm:$0xff] }
 0x12a   : > { %1354 = vrot.lane.b32.xlu0 %v4520_v22, %s3531_s24  ;;  %2453 = vmatprep.mubr.bf16.mxu0 %v2073_v60  ;;  %v1818_v23 = vsel %vm1810_vm6, %v1753_v11, %v1405_v31  ;;  %v1279_v19 = vrot.slane %v5420_v34, 1 }
 0x12b   : > { %1640 = vrot.lane.b32.xlu1 %v5419_v25, %s3532_s25  ;;  %2454 = vmatmul.mubr.bf16.gmra.mxu0 %v1818_v23  ;;  %v5423_v23 = vld [vmem:[#allocation14_spill] sm:$0xff] }
 0x12c   : > { %v1615_v30 = vpop.permute.xlu0 %1614  ;;  %v4594_v46 = vsel %vm1243_vm4, %v1279_v19, %v1280_v2 }
 0x12d   : > { %v1389_v44 = vpop.permute.xlu1 %1388  ;;  %v2058_v52 = vsel %vm1747_vm7, %v1990_v61, %v1615_v30  ;;  %v1692_v30 = vsel %vm1684_vm5, %v3624_v43, %v4228_v18  ;;  %v5425_v43 = vld [vmem:[#allocation19_spill] sm:$0xff] }
 0x12e   : > { %1418 = vrot.lane.b32.xlu0 %v5414_v59, %s3532_s25  ;;  %v1801_v55 = vsel %vm1747_vm7, %v1738_v28, %v1389_v44  ;;  %v1282_v28 = vrot.slane %v5423_v23, 1 }
 0x12f   : > { %1516 = vrot.lane.b32.xlu1 %v4568_v3, %s3530_s15 }
 0x130   : > { %v1677_v21 = vpop.permute.xlu0 %1676 }
 0x131   : > { %v2148_v36 = vsel %vm1810_vm6, %v2058_v52, %v1677_v21  ;;  %v1455_v54 = vpop.permute.xlu1 %1454  ;;  %v5424_v52 = vld [vmem:[#allocation12_spill] sm:$0xff] }
 0x132   : > { %1580 = vrot.lane.b32.xlu0 %v5420_v34, %s3531_s24  ;;  %2653 = vmatprep.mubr.bf16.mxu1 %v2148_v36  ;;  %v1893_v8 = vsel %vm1810_vm6, %v1801_v55, %v1455_v54  ;;  %v1283_v21 = vrot.slane %v5424_v52, 1  ;;  %v3519_v55 = vld [vmem:[%s3580_s19 + $0x78] sm:$0xff]  }
 0x133   : > { %1356 = vrot.lane.b32.xlu1 %v4546_v35, %s3531_s24  ;;  %2654 = vmatmul.mubr.bf16.gmra.mxu1 %v1893_v8  ;;  %v502_v38 = vshrl.u32 %v3519_v55, 16 }
 0x134   : > { %v1503_v58 = vpop.permute.xlu0 %1502  ;;  %v4617_v19 = vsel %vm1243_vm4, %v1282_v28, %v1283_v21  ;;  %v5426_v21 = vld [vmem:[#allocation20_spill] sm:$0xff] }
 0x135   : > { %v1567_v15 = vpop.permute.xlu1 %1566  ;;  %v1918_v60 = vsel %vm1684_vm5, %v3664_v16, %v1503_v58 }
 0x136   : > { %1642 = vrot.lane.b32.xlu0 %v5422_v33, %s3532_s25  ;;  %v2010_v44 = vsel %vm1747_vm7, %v1918_v60, %v1567_v15  ;;  %v1740_v15 = vsel %vm1684_vm5, %v4083_v26, %v4383_v14  ;;  %v1285_v26 = vrot.slane %v5426_v21, 1  ;;  %v5427_v14 = vld [vmem:[#allocation17_spill] sm:$0xff] }
 0x137   : > { %1420 = vrot.lane.b32.xlu1 %v5417_v42, %s3532_s25 }
 0x138   : > { %v1343_v11 = vpop.permute.xlu0 %1342 }
 0x139   : > { %v1553_v31 = vpop.permute.xlu1 %1552  ;;  %v1755_v16 = vsel %vm1747_vm7, %v1692_v30, %v1343_v11  ;;  %v504_v30 = vrot.slane %v502_v38, 7 }
 0x13a   : > { %1518 = vrot.lane.b32.xlu0 %v4594_v46, %s3530_s15  ;;  %v1993_v58 = vsel %vm1684_vm5, %v4127_v47, %v1553_v31  ;;  %v1286_v31 = vrot.slane %v5427_v14, 1 }
 0x13b   : > { %1582 = vrot.lane.b32.xlu1 %v5423_v23, %s3531_s24 }
 0x13c   : > { %v1629_v61 = vpop.permute.xlu0 %1628 }
 0x13d   : > { %v2076_v36 = vsel %vm1810_vm6, %v2010_v44, %v1629_v61  ;;  %v1407_v54 = vpop.permute.xlu1 %1406  ;;  %v505_v44 = vshll.u32 %v3519_v55, 16 }
 0x13e   : > { %1358 = vrot.lane.b32.xlu0 %v4568_v3, %s3531_s24  ;;  %2461 = vmatprep.mubr.bf16.mxu0 %v2076_v36  ;;  %v1821_v8 = vsel %vm1810_vm6, %v1755_v16, %v1407_v54  ;;  %v5428_v54 = vld [vmem:[#allocation26_spill] sm:$0xff] }
 0x13f   : > { %1644 = vrot.lane.b32.xlu1 %v5425_v43, %s3532_s25  ;;  %2462 = vmatmul.mubr.bf16.gmra.mxu0 %v1821_v8  ;;  %v507_v16 = vor.u32 %v505_v44, %v504_v30  ;;  %v4643_v8 = vsel %vm1243_vm4, %v1285_v26, %v1286_v31  ;;  %v5431_v31 = vld [vmem:[#allocation27_spill] sm:$0xff] }
 0x140   : > { %v1617_v18 = vpop.permute.xlu0 %1616 }
 0x141   : > { %v1391_v2 = vpop.permute.xlu1 %1390  ;;  %v2060_v11 = vsel %vm1747_vm7, %v1993_v58, %v1617_v18  ;;  %v4647_v38 = vsel %vm3587_vm3, 0, %v507_v16 }
 0x142   : > { %1422 = vrot.lane.b32.xlu0 %v5420_v34, %s3532_s25  ;;  %v1803_v61 = vsel %vm1747_vm7, %v1740_v15, %v1391_v2  ;;  %v1694_v15 = vsel %vm1684_vm5, %v3632_v49, %v4234_v20 }
 0x143   : > { %1520 = vrot.lane.b32.xlu1 %v4617_v19, %s3530_s15 }
 0x144   : > { %v1679_v60 = vpop.permute.xlu0 %1678 }
 0x145   : > { %v2151_v28 = vsel %vm1810_vm6, %v2060_v11, %v1679_v60  ;;  %v1457_v52 = vpop.permute.xlu1 %1456  ;;  %v5429_v11 = vld [vmem:[#allocation22_spill] sm:$0xff]  ;;  %v1467_v60 = vshll.u32 %v4647_v38, 16 }
 0x146   : > { %1584 = vrot.lane.b32.xlu0 %v5426_v21, %s3531_s24  ;;  %2661 = vmatprep.mubr.bf16.mxu1 %v2151_v28  ;;  %v1896_v47 = vsel %vm1810_vm6, %v1803_v61, %v1457_v52  ;;  %v1288_v28 = vrot.slane %v5429_v11, 1  ;;  %v5430_v52 = vld [vmem:[#allocation21_spill] sm:$0xff] }
 0x147   : > { %1360 = vrot.lane.b32.xlu1 %v4594_v46, %s3531_s24  ;;  %2662 = vmatmul.mubr.bf16.gmra.mxu1 %v1896_v47  ;;  %v734_v47 = vsel %vm3587_vm3, %v504_v30, 0  ;;  %v1469_v16 = vrot.slane %v1467_v60, 1  ;;  %v1742_v60 = vsel %vm1684_vm5, %v4095_v29, %v4389_v27  ;;  %v1490_v29 = vrot.slane %v4647_v38, 1 }
 0x148   : > { %v1505_v55 = vpop.permute.xlu0 %1504  ;;  %v1472_v12 = vshll.u32 %v734_v47, 16  ;;  %v1491_v27 = vrot.slane %v734_v47, 1 }
 0x149   : > { %v1569_v36 = vpop.permute.xlu1 %1568  ;;  %v1921_v2 = vsel %vm1684_vm5, %v3696_v48, %v1505_v55  ;;  %v1289_v48 = vrot.slane %v5430_v52, 1  ;;  %v1465_v55 = vshrl.u32 %v4647_v38, 16 }
 0x14a   : > { %1646 = vrot.lane.b32.xlu0 %v5428_v54, %s3532_s25  ;;  %v2012_v44 = vsel %vm1747_vm7, %v1921_v2, %v1569_v36 }
 0x14b   : > { %1424 = vrot.lane.b32.xlu1 %v5423_v23, %s3532_s25  ;;  %v4673_v36 = vsel %vm1243_vm4, %v1288_v28, %v1289_v48 }
 0x14c   : > { %v1345_v18 = vpop.permute.xlu0 %1344 }
 0x14d   : > { %v1555_v58 = vpop.permute.xlu1 %1554  ;;  %v1757_v26 = vsel %vm1747_vm7, %v1694_v15, %v1345_v18  ;;  %v1470_v15 = vor.u32 %v1469_v16, %v1465_v55  ;;  %v5432_v16 = vld [vmem:[#allocation24_spill] sm:$0xff] }
 0x14e   : > { %1522 = vrot.lane.b32.xlu0 %v4643_v8, %s3530_s15  ;;  %v1996_v2 = vsel %vm1684_vm5, %v4149_v50, %v1555_v58 }
 0x14f   : > { %1586 = vrot.lane.b32.xlu1 %v5429_v11, %s3531_s24 }
 0x150   : > { %v1631_v61 = vpop.permute.xlu0 %1630 }
 0x151   : > { %v2079_v14 = vsel %vm1810_vm6, %v2012_v44, %v1631_v61  ;;  %v1409_v49 = vpop.permute.xlu1 %1408  ;;  %v1474_v44 = vrot.slane %v1472_v12, 1  ;;  %v1291_v12 = vrot.slane %v5432_v16, 1 }
 0x152   : > { %1362 = vrot.lane.b32.xlu0 %v4617_v19, %s3531_s24  ;;  %2469 = vmatprep.mubr.bf16.mxu0 %v2079_v14  ;;  %v1824_v20 = vsel %vm1810_vm6, %v1757_v26, %v1409_v49 }
 0x153   : > { %1648 = vrot.lane.b32.xlu1 %v5431_v31, %s3532_s25  ;;  %2470 = vmatmul.mubr.bf16.gmra.mxu0 %v1824_v20  ;;  %v4693_v58 = vsel %vm751_vm2, %v1470_v15, %v1474_v44  ;;  %v4701_v20 = vsel %vm1243_vm4, %v1490_v29, %v1491_v27  ;;  %v1696_v15 = vsel %vm1684_vm5, %v3659_v13, %v4238_v53  ;;  %v5434_v53 = vld [vmem:[#allocation28_spill] sm:$0xff] }
 0x154   : > { %v1619_v30 = vpop.permute.xlu0 %1618 }
 0x155   : > { %v1393_v18 = vpop.permute.xlu1 %1392  ;;  %v2062_v61 = vsel %vm1747_vm7, %v1996_v2, %v1619_v30  ;;  %v5433_v30 = vld [vmem:[#allocation23_spill] sm:$0xff] }
 0x156   : > { %1426 = vrot.lane.b32.xlu0 %v5426_v21, %s3532_s25  ;;  %v1805_v52 = vsel %vm1747_vm7, %v1742_v60, %v1393_v18  ;;  %v1292_v18 = vrot.slane %v5433_v30, 1 }
 0x157   : > { %1524 = vrot.lane.b32.xlu1 %v4673_v36, %s3530_s15 }
 0x158   : > { %v1681_v28 = vpop.permute.xlu0 %1680 }
 0x159   : > { %v2154_v48 = vsel %vm1810_vm6, %v2062_v61, %v1681_v28  ;;  %v1459_v26 = vpop.permute.xlu1 %1458  ;;  %v1293_v61 = vsel %vm1243_vm4, %v1291_v12, %v1292_v18 }
 0x15a   : > { %1588 = vrot.lane.b32.xlu0 %v4647_v38, %s3531_s24  ;;  %2669 = vmatprep.mubr.bf16.mxu1 %v2154_v48  ;;  %v1899_v50 = vsel %vm1810_vm6, %v1805_v52, %v1459_v26  ;;  %v1294_v26 = vrot.slane %v5434_v53, 1 }
 0x15b   : > { %1364 = vrot.lane.b32.xlu1 %v4643_v8, %s3531_s24  ;;  %2670 = vmatmul.mubr.bf16.gmra.mxu1 %v1899_v50  ;;  %v5435_v50 = vld [vmem:[#allocation25_spill] sm:$0xff] }
 0x15c   : > { %v1507_v14 = vpop.permute.xlu0 %1506  ;;  %v1295_v29 = vrot.slane %v5435_v50, 1 }
 0x15d   : > { %v1571_v49 = vpop.permute.xlu1 %1570  ;;  %v1924_v2 = vsel %vm1684_vm5, %v3716_v4, %v1507_v14 }
 0x15e   : > { %1650 = vrot.lane.b32.xlu0 %v4693_v58, %s3532_s25  ;;  %v2014_v44 = vsel %vm1747_vm7, %v1924_v2, %v1571_v49  ;;  %v5437_v49 = vld [vmem:[#allocation76_spill] sm:$0xff]  ;;  %v4735_v2 = vsel %vm1243_vm4, %v1294_v26, %v1295_v29 }
 0x15f   : > { %1428 = vrot.lane.b32.xlu1 %v5429_v11, %s3532_s25 }
 0x160   : > { %v1347_v55 = vpop.permute.xlu0 %1346 }
 0x161   : > { %v1557_v47 = vpop.permute.xlu1 %1556  ;;  %v1759_v28 = vsel %vm1747_vm7, %v1696_v15, %v1347_v55  ;;  %v5438_v55 = vld [vmem:[#allocation48_spill] sm:$0xff] }
 0x162   : > { %1526 = vrot.lane.b32.xlu0 %v4701_v20, %s3530_s15  ;;  %v1999_v14 = vsel %vm1684_vm5, %v4158_v6, %v1557_v47  ;;  %v1744_v12 = vsel %vm1684_vm5, %v5438_v55, %v5437_v49  ;;  %v5442_v49 = vld [vmem:[#allocation54_spill] sm:$0xff] }
 0x163   : > { %1366 = vrot.lane.b32.xlu1 %v4673_v36, %s3531_s24 }
 0x164   : > { %v1633_v60 = vpop.permute.xlu0 %1632 }
 0x165   : > { %v2082_v4 = vsel %vm1810_vm6, %v2014_v44, %v1633_v60  ;;  %v1411_v52 = vpop.permute.xlu1 %1410 }
 0x166   : > { %1430 = vrot.lane.b32.xlu0 %v4647_v38, %s3532_s25  ;;  %2477 = vmatprep.mubr.bf16.mxu0 %v2082_v4  ;;  %v1827_v48 = vsel %vm1810_vm6, %v1759_v28, %v1411_v52  ;;  %v5436_v38 = vld [vmem:[#allocation35_spill] sm:$0xff] }
 0x167   : > { %1528 = vrot.lane.b32.xlu1 %v1293_v61, %s3530_s15  ;;  %2478 = vmatmul.mubr.bf16.gmra.mxu0 %v1827_v48  ;;  %v5439_v4 = vld [vmem:[#allocation31_spill] sm:$0xff]  ;;  %v5440_v48 = vld [vmem:[#allocation30_spill] sm:$0xff] }
 0x168   : > { %v1621_v13 = vpop.permute.xlu0 %1620  ;;  %v1297_v52 = vrot.slane %v5439_v4, 1 }
 0x169   : > { %v1395_v27 = vpop.permute.xlu1 %1394  ;;  %v2064_v30 = vsel %vm1747_vm7, %v1999_v14, %v1621_v13  ;;  %v1298_v13 = vrot.slane %v5440_v48, 1 }
 0x16a   : > { %1592 = vrot.lane.b32.xlu0 %v5434_v53, %s3531_s24  ;;  %v1807_v15 = vsel %vm1747_vm7, %v1744_v12, %v1395_v27  ;;  %v5441_v27 = vld [vmem:[#allocation38_spill] sm:$0xff] }
 0x16b   : > { %1654 = vrot.lane.b32.xlu1 %v5436_v38, %s3532_s25  ;;  %v4756_v14 = vsel %vm1243_vm4, %v1297_v52, %v1298_v13 }
 0x16c   : > { %v1683_v18 = vpop.permute.xlu0 %1682 }
 0x16d   : > { %v2157_v44 = vsel %vm1810_vm6, %v2064_v30, %v1683_v18  ;;  %v1461_v60 = vpop.permute.xlu1 %1460 }
 0x16e   : > { %1432 = vrot.lane.b32.xlu0 %v5432_v16, %s3532_s25  ;;  %2677 = vmatprep.mubr.bf16.mxu1 %v2157_v44  ;;  %v1902_v6 = vsel %vm1810_vm6, %v1807_v15, %v1461_v60  ;;  %v5444_v60 = vld [vmem:[#allocation33_spill] sm:$0xff] }
 0x16f   : > { %1530 = vrot.lane.b32.xlu1 %v4735_v2, %s3530_s15  ;;  %2678 = vmatmul.mubr.bf16.gmra.mxu1 %v1902_v6 }
 0x170   : > { %v1509_v47 = vpop.permute.xlu0 %1508 }
 0x171   : > { %v1573_v28 = vpop.permute.xlu1 %1572  ;;  %v1927_v50 = vsel %vm1684_vm5, %v3727_v24, %v1509_v47  ;;  %v1300_v47 = vrot.slane %v5444_v60, 1 }
 0x172   : > { %1594 = vrot.lane.b32.xlu0 %v5439_v4, %s3531_s24  ;;  %v2016_v12 = vsel %vm1747_vm7, %v1927_v50, %v1573_v28  ;;  %v5445_v28 = vld [vmem:[#allocation32_spill] sm:$0xff]  ;;  %v5447_v50 = vld [vmem:[#allocation77_spill] sm:$0xff] }
 0x173   : > { %1368 = vrot.lane.b32.xlu1 %v1293_v61, %s3531_s24  ;;  %v5443_v61 = vld [vmem:[#allocation2_spill] sm:$0xff]  ;;  %v1301_v52 = vrot.slane %v5445_v28, 1 }
 0x174   : > { %v1349_v26 = vpop.permute.xlu0 %1348  ;;  %v1698_v55 = vsel %vm1684_vm5, %v5443_v61, %v5442_v49  ;;  %v1746_v49 = vsel %vm1684_vm5, %v4140_v39, %v5447_v50 }
 0x175   : > { %v1559_v29 = vpop.permute.xlu1 %1558  ;;  %v1761_v18 = vsel %vm1747_vm7, %v1698_v55, %v1349_v26  ;;  %v5446_v26 = vld [vmem:[#allocation40_spill] sm:$0xff] }
 0x176   : > { %1656 = vrot.lane.b32.xlu0 %v5441_v27, %s3532_s25  ;;  %v2002_v13 = vsel %vm1684_vm5, %v4436_v51, %v1559_v29 }
 0x177   : > { %1434 = vrot.lane.b32.xlu1 %v5434_v53, %s3532_s25 }
 0x178   : > { %v1635_v30 = vpop.permute.xlu0 %1634 }
 0x179   : > { %v2085_v24 = vsel %vm1810_vm6, %v2016_v12, %v1635_v30  ;;  %v1413_v15 = vpop.permute.xlu1 %1412  ;;  %v4787_v12 = vsel %vm1243_vm4, %v1300_v47, %v1301_v52  ;;  %v5449_v47 = vld [vmem:[#allocation36_spill] sm:$0xff]  ;;  %v5450_v52 = vld [vmem:[#allocation34_spill] sm:$0xff] }
 0x17a   : > { %1532 = vrot.lane.b32.xlu0 %v4756_v14, %s3530_s15  ;;  %2485 = vmatprep.mubr.bf16.mxu0 %v2085_v24  ;;  %v1830_v44 = vsel %vm1810_vm6, %v1761_v18, %v1413_v15  ;;  %v5448_v24 = vld [vmem:[#allocation52_spill] sm:$0xff]  ;;  %v1303_v28 = vrot.slane %v5449_v47, 1 }
 0x17b   : > { %1596 = vrot.lane.b32.xlu1 %v5444_v60, %s3531_s24  ;;  %2486 = vmatmul.mubr.bf16.gmra.mxu0 %v1830_v44 }
 0x17c   : > { %v4769_v6 = vpop.permute.xlu0 %1590 }
 0x17d   : > { %v1397_v48 = vpop.permute.xlu1 %1396  ;;  %v2065_v61 = vsel %vm1747_vm7, %v2002_v13, %v4769_v6 }
 0x17e   : > { %1370 = vrot.lane.b32.xlu0 %v4735_v2, %s3531_s24  ;;  %v1809_v30 = vsel %vm1747_vm7, %v1746_v49, %v1397_v48  ;;  %v1304_v48 = vrot.slane %v5450_v52, 1  ;;  %v5454_v52 = vld [vmem:[#allocation65_spill] sm:$0xff] }
 0x17f   : > { %1658 = vrot.lane.b32.xlu1 %v5446_v26, %s3532_s25 }
 0x180   : > { %v4784_v55 = vpop.permute.xlu0 %1652 }
 0x181   : > { %v2159_v51 = vsel %vm1810_vm6, %v2065_v61, %v4784_v55  ;;  %v1463_v29 = vpop.permute.xlu1 %1462  ;;  %v5451_v61 = vld [vmem:[#allocation41_spill] sm:$0xff] }
 0x182   : > { %1436 = vrot.lane.b32.xlu0 %v5439_v4, %s3532_s25  ;;  %2685 = vmatprep.mubr.bf16.mxu1 %v2159_v51  ;;  %v1905_v39 = vsel %vm1810_vm6, %v1809_v30, %v1463_v29  ;;  %v4817_v29 = vsel %vm1243_vm4, %v1303_v28, %v1304_v48 }
 0x183   : > { %1534 = vrot.lane.b32.xlu1 %v4787_v12, %s3530_s15  ;;  %2686 = vmatmul.mubr.bf16.gmra.mxu1 %v1905_v39 }
 0x184   : > { %v1511_v18 = vpop.permute.xlu0 %1510  ;;  %3361 = vmatprep.mubr.msk.bf16.mxu1 %vm1684_vm5, %v5448_v24  ;;  %v5453_v24 = vld [vmem:[#allocation57_spill] sm:$0xff] }
 0x185   : > { %v1575_v15 = vpop.permute.xlu1 %1574  ;;  %v1930_v44 = vsel %vm1684_vm5, %v3737_v37, %v1511_v18  ;;  %v5452_v37 = vld [vmem:[#allocation55_spill] sm:$0xff] }
 0x186   : > { %1598 = vrot.lane.b32.xlu0 %v5449_v47, %s3531_s24  ;;  %v2018_v50 = vsel %vm1747_vm7, %v1930_v44, %v1575_v15  ;;  %v1700_v51 = vsel %vm1684_vm5, %v3689_v45, %v5452_v37  ;;  %v5455_v45 = vld [vmem:[#allocation39_spill] sm:$0xff]  ;;  %v5457_v37 = vld [vmem:[#allocation44_spill] sm:$0xff] }
 0x187   : > { %1372 = vrot.lane.b32.xlu1 %v4756_v14, %s3531_s24  ;;  %v1306_v48 = vrot.slane %v5455_v45, 1 }
 0x188   : > { %v1351_v13 = vpop.permute.xlu0 %1350 }
 0x189   : > { %v1637_v49 = vpop.permute.xlu1 %1636  ;;  %v1763_v39 = vsel %vm1747_vm7, %v1700_v51, %v1351_v13  ;;  %v5456_v13 = vld [vmem:[#allocation37_spill] sm:$0xff]  ;;  %v5458_v51 = vld [vmem:[#allocation56_spill] sm:$0xff] }
 0x18a   : > { %1660 = vrot.lane.b32.xlu0 %v5451_v61, %s3532_s25  ;;  %v2088_v30 = vsel %vm1810_vm6, %v2018_v50, %v1637_v49  ;;  %v1307_v50 = vrot.slane %v5456_v13, 1 }
 0x18b   : > { %1438 = vrot.lane.b32.xlu1 %v5444_v60, %s3532_s25  ;;  %2493 = vmatprep.mubr.bf16.mxu0 %v2088_v30 }
 0x18c   : > { %v1415_v18 = vpop.permute.xlu0 %1414  ;;  %3362 = vmatmul.mubr.msk.bf16.vlgmr.msra.gmra.mxu1 %vm1684_vm5, %v5453_v24 }
 0x18d   : > { %v1833_v15 = vsel %vm1810_vm6, %v1763_v39, %v1415_v18  ;;  %v1513_v44 = vpop.permute.xlu1 %1512  ;;  %3365 = vmatprep.mubr.msk.bf16.mxu1 %vm1684_vm5, %v5454_v52  ;;  %v1702_v39 = vsel %vm1684_vm5, %v3705_v56, %v5458_v51  ;;  %v4844_v52 = vsel %vm1243_vm4, %v1306_v48, %v1307_v50 }
 0x18e   : > { %1536 = vrot.lane.b32.xlu0 %v4817_v29, %s3530_s15  ;;  %2494 = vmatmul.mubr.bf16.gmra.mxu0 %v1833_v15  ;;  %v1933_v49 = vsel %vm1684_vm5, %v5413_v32, %v1513_v44  ;;  %v5459_v15 = vld [vmem:[#allocation74_spill] sm:$0xff] }
 0x18f   : > { %1600 = vrot.lane.b32.xlu1 %v5455_v45, %s3531_s24 }
 0x190   : > { %v1577_v28 = vpop.permute.xlu0 %1576 }
 0x191   : > { %v1353_v30 = vpop.permute.xlu1 %1352  ;;  %v2020_v18 = vsel %vm1747_vm7, %v1933_v49, %v1577_v28  ;;  %v5460_v49 = vld [vmem:[#allocation43_spill] sm:$0xff] }
 0x192   : > { %1374 = vrot.lane.b32.xlu0 %v4787_v12, %s3531_s24  ;;  %v1765_v32 = vsel %vm1747_vm7, %v1702_v39, %v1353_v30  ;;  %v5461_v30 = vld [vmem:[#allocation42_spill] sm:$0xff] }
 0x193   : > { %1662 = vrot.lane.b32.xlu1 %v5457_v37, %s3532_s25  ;;  %v1310_v51 = vrot.slane %v5461_v30, 1  ;;  %v5465_v30 = vld [vmem:[#allocation60_spill] sm:$0xff] }
 0x194   : > { %v1639_v24 = vpop.permute.xlu0 %1638  ;;  %3366 = vmatmul.mubr.msk.bf16.gmra.mxu1 %vm1684_vm5, %v5459_v15 }
 0x195   : > { %v2091_v44 = vsel %vm1810_vm6, %v2020_v18, %v1639_v24  ;;  %v1417_v13 = vpop.permute.xlu1 %1416  ;;  %3369 = vmatprep.mubr.msk.bf16.mxu1 %vm1684_vm5, %v4394_v9  ;;  %v1309_v9 = vrot.slane %v5460_v49, 1 }
 0x196   : > { %1440 = vrot.lane.b32.xlu0 %v5449_v47, %s3532_s25  ;;  %2501 = vmatprep.mubr.bf16.mxu0 %v2091_v44  ;;  %v1836_v56 = vsel %vm1810_vm6, %v1765_v32, %v1417_v13  ;;  %v5463_v32 = vld [vmem:[#allocation58_spill] sm:$0xff] }
 0x197   : > { %1538 = vrot.lane.b32.xlu1 %v4844_v52, %s3530_s15  ;;  %2502 = vmatmul.mubr.bf16.gmra.mxu0 %v1836_v56  ;;  %v1704_v44 = vsel %vm1684_vm5, %v5411_v57, %v5463_v32 }
 0x198   : > { %v1515_v28 = vpop.permute.xlu0 %1514 }
 0x199   : > { %v1579_v48 = vpop.permute.xlu1 %1578  ;;  %v1936_v50 = vsel %vm1684_vm5, %v5416_v10, %v1515_v28  ;;  %v5462_v10 = vld [vmem:[#allocation45_spill] sm:$0xff] }
 0x19a   : > { %1602 = vrot.lane.b32.xlu0 %v5460_v49, %s3531_s24  ;;  %v2022_v18 = vsel %vm1747_vm7, %v1936_v50, %v1579_v48 }
 0x19b   : > { %1376 = vrot.lane.b32.xlu1 %v4817_v29, %s3531_s24 }
 0x19c   : > { %v1355_v39 = vpop.permute.xlu0 %1354  ;;  %3370 = vmatmul.mubr.msk.bf16.gmra.mxu1 %vm1684_vm5, %v4448_v62  ;;  %v4877_v62 = vsel %vm1243_vm4, %v1309_v9, %v1310_v51  ;;  %v5464_v9 = vld [vmem:[#allocation46_spill] sm:$0xff]  ;;  %v1706_v51 = vsel %vm1684_vm5, %v5414_v59, %v5465_v30 }
 0x19d   : > { %v1641_v24 = vpop.permute.xlu1 %1640  ;;  %3373 = vmatprep.mubr.msk.bf16.mxu1 %vm1684_vm5, %v4498_v5  ;;  %v1767_v13 = vsel %vm1747_vm7, %v1704_v44, %v1355_v39 }
 0x19e   : > { %1664 = vrot.lane.b32.xlu0 %v5462_v10, %s3532_s25  ;;  %v2094_v15 = vsel %vm1810_vm6, %v2022_v18, %v1641_v24 }
 0x19f   : > { %1442 = vrot.lane.b32.xlu1 %v5455_v45, %s3532_s25  ;;  %2509 = vmatprep.mubr.bf16.mxu0 %v2094_v15  ;;  %v5466_v15 = vld [vmem:[#allocation50_spill] sm:$0xff] }
 0x1a0   : > { %v1419_v56 = vpop.permute.xlu0 %1418 }
 0x1a1   : > { %v1839_v5 = vsel %vm1810_vm6, %v1767_v13, %v1419_v56  ;;  %v1517_v28 = vpop.permute.xlu1 %1516 }
 0x1a2   : > { %1540 = vrot.lane.b32.xlu0 %v4877_v62, %s3530_s15  ;;  %2510 = vmatmul.mubr.bf16.gmra.mxu0 %v1839_v5  ;;  %v1939_v48 = vsel %vm1684_vm5, %v5419_v25, %v1517_v28 }
 0x1a3   : > { %1604 = vrot.lane.b32.xlu1 %v3994_v7, %s3531_s24 }
 0x1a4   : > { %v1581_v57 = vpop.permute.xlu0 %1580  ;;  %3374 = vmatmul.mubr.msk.bf16.gmra.mxu1 %vm1684_vm5, %v4520_v22 }
 0x1a5   : > { %v1357_v50 = vpop.permute.xlu1 %1356  ;;  %3377 = vmatprep.mubr.msk.bf16.mxu1 %vm1684_vm5, %v4546_v35  ;;  %v2024_v39 = vsel %vm1747_vm7, %v1939_v48, %v1581_v57 }
 0x1a6   : > { %1378 = vrot.lane.b32.xlu0 %v4844_v52, %s3531_s24  ;;  %v1769_v18 = vsel %vm1747_vm7, %v1706_v51, %v1357_v50 }
 0x1a7   : > { %1666 = vrot.lane.b32.xlu1 %v5464_v9, %s3532_s25 }
 0x1a8   : > { %v1643_v22 = vpop.permute.xlu0 %1642 }
 0x1a9   : > { %v2097_v25 = vsel %vm1810_vm6, %v2024_v39, %v1643_v22  ;;  %v1421_v24 = vpop.permute.xlu1 %1420  ;;  %v5469_v22 = vld [vmem:[#allocation62_spill] sm:$0xff] }
 0x1aa   : > { %1444 = vrot.lane.b32.xlu0 %v5460_v49, %s3532_s25  ;;  %2517 = vmatprep.mubr.bf16.mxu0 %v2097_v25  ;;  %v1842_v35 = vsel %vm1810_vm6, %v1769_v18, %v1421_v24  ;;  %v1710_v18 = vsel %vm1684_vm5, %v5420_v34, %v5469_v22 }
 0x1ab   : > { %1542 = vrot.lane.b32.xlu1 %v5466_v15, %s3530_s15  ;;  %2518 = vmatmul.mubr.bf16.gmra.mxu0 %v1842_v35 }
 0x1ac   : > { %v1519_v59 = vpop.permute.xlu0 %1518  ;;  %3378 = vmatmul.mubr.msk.bf16.gmra.mxu1 %vm1684_vm5, %v4568_v3  ;;  %v5467_v3 = vld [vmem:[#allocation47_spill] sm:$0xff] }
 0x1ad   : > { %v1583_v32 = vpop.permute.xlu1 %1582  ;;  %3381 = vmatprep.mubr.msk.bf16.mxu1 %vm1684_vm5, %v4594_v46  ;;  %v1942_v44 = vsel %vm1684_vm5, %v5422_v33, %v1519_v59  ;;  %v5468_v33 = vld [vmem:[#allocation61_spill] sm:$0xff]  ;;  %v2202_v46 = vld [vmem:[%s4924_s29] sm:$0xff] }
 0x1ae   : > { %1606 = vrot.lane.b32.xlu0 %v4019_v63, %s3531_s24  ;;  %v2026_v56 = vsel %vm1747_vm7, %v1942_v44, %v1583_v32  ;;  %v1708_v63 = vsel %vm1684_vm5, %v5417_v42, %v5468_v33  ;;  %v2203_v33 = vld [vmem:[%s4924_s29 + $0x8] sm:$0xff] }
 0x1af   : > { %1380 = vrot.lane.b32.xlu1 %v4877_v62, %s3531_s24 }
 0x1b0   : > { %v1359_v13 = vpop.permute.xlu0 %1358 }
 0x1b1   : > { %v1645_v5 = vpop.permute.xlu1 %1644  ;;  %v1771_v57 = vsel %vm1747_vm7, %v1708_v63, %v1359_v13 }
 0x1b2   : > { %1668 = vrot.lane.b32.xlu0 %v5467_v3, %s3532_s25  ;;  %v2100_v28 = vsel %vm1810_vm6, %v2026_v56, %v1645_v5 }
 0x1b3   : > { %1446 = vrot.lane.b32.xlu1 %v3994_v7, %s3532_s25  ;;  %2525 = vmatprep.mubr.bf16.mxu0 %v2100_v28 }
 0x1b4   : > { %v1423_v48 = vpop.permute.xlu0 %1422  ;;  %3382 = vmatmul.mubr.msk.bf16.gmra.mxu1 %vm1684_vm5, %v4617_v19 }
 0x1b5   : > { %v1845_v50 = vsel %vm1810_vm6, %v1771_v57, %v1423_v48  ;;  %v1521_v30 = vpop.permute.xlu1 %1520  ;;  %3385 = vmatprep.mubr.msk.bf16.mxu1 %vm1684_vm5, %v4643_v8 }
 0x1b6   : > { %2526 = vmatmul.mubr.bf16.gmra.mxu0 %v1845_v50  ;;  %3049 = vperm.xlu0 %3469, %v2202_v46   ;;  %v1945_v7 = vsel %vm1684_vm5, %v5425_v43, %v1521_v30  ;;  %v5470_v46 = vld [vmem:[#allocation63_spill] sm:$0xff] }
 0x1b7   : > { %3054 = vperm.xlu1 %3470, %v2203_v33  }
 0x1b8   : > { %v1585_v42 = vpop.permute.xlu0 %1584 }
 0x1b9   : > { %v1361_v51 = vpop.permute.xlu1 %1360  ;;  %v2028_v19 = vsel %vm1747_vm7, %v1945_v7, %v1585_v42 }
 0x1ba   : > { %v4940_v39 = vpop.f32.mrf.mxu1  ;;  %v1773_v8 = vsel %vm1747_vm7, %v1710_v18, %v1361_v51 }
 0x1bc   : > { %v1647_v25 = vpop.permute.xlu0 %1646  ;;  %v2633_v24 = vpop.f32.mrf.mxu1  ;;  %3386 = vmatmul.mubr.msk.bf16.gmra.mxu1 %vm1684_vm5, %v4673_v36 }
 0x1bd   : > { %v2103_v35 = vsel %vm1810_vm6, %v2028_v19, %v1647_v25  ;;  %v1425_v59 = vpop.permute.xlu1 %1424  ;;  %3389 = vmatprep.mubr.msk.bf16.mxu1 %vm1684_vm5, %v4701_v20  ;;  %v5471_v25 = vld [vmem:[#allocation64_spill] sm:$0xff] }
 0x1be   : > { %2533 = vmatprep.mubr.bf16.mxu0 %v2103_v35  ;;  %v4952_v43 = vpop.f32.mrf.mxu1  ;;  %v1848_v34 = vsel %vm1810_vm6, %v1773_v8, %v1425_v59  ;;  %v1714_v24 = vsel %vm1684_vm5, %v5426_v21, %v5471_v25 }
 0x1bf   : > { %2534 = vmatmul.mubr.bf16.gmra.mxu0 %v1848_v34 }
 0x1c0   : > { %v1523_v32 = vpop.permute.xlu0 %1522  ;;  %v2636_v44 = vpop.f32.mrf.mxu1 }
 0x1c1   : > { %v1587_v13 = vpop.permute.xlu1 %1586  ;;  %v1948_v36 = vsel %vm1684_vm5, %v5428_v54, %v1523_v32  ;;  %v1712_v54 = vsel %vm1684_vm5, %v5423_v23, %v5470_v46 }
 0x1c2   : > { %v2030_v20 = vsel %vm1747_vm7, %v1948_v36, %v1587_v13  ;;  %v5472_v13 = vld [vmem:[#allocation66_spill] sm:$0xff] }
 0x1c3   : > { %v4957_v56 = vpop.f32.mrf.mxu0  ;;  %v1716_v36 = vsel %vm1684_vm5, %v5429_v11, %v5472_v13 }
 0x1c4   : > { %v1363_v5 = vpop.permute.xlu0 %1362  ;;  %3390 = vmatmul.mubr.msk.bf16.gmra.mxu1 %vm1684_vm5, %v3565_v1 }
 0x1c5   : > { %v1649_v3 = vpop.permute.xlu1 %1648  ;;  %v2441_v28 = vpop.f32.mrf.mxu0  ;;  %3393 = vmatprep.mubr.msk.bf16.mxu1 %vm1684_vm5, %v4735_v2  ;;  %v1775_v48 = vsel %vm1747_vm7, %v1712_v54, %v1363_v5 }
 0x1c6   : > { %v2106_v63 = vsel %vm1810_vm6, %v2030_v20, %v1649_v3 }
 0x1c7   : > { %v4969_v57 = vpop.f32.mrf.mxu0  ;;  %2541 = vmatprep.mubr.bf16.mxu0 %v2106_v63  ;;  %v5473_v63 = vld [vmem:[#allocation29_spill] sm:$0xff] }
 0x1c8   : > { %v1427_v50 = vpop.permute.xlu0 %1426 }
 0x1c9   : > { %v1851_v30 = vsel %vm1810_vm6, %v1775_v48, %v1427_v50  ;;  %v1525_v42 = vpop.permute.xlu1 %1524  ;;  %v2444_v7 = vpop.f32.mrf.mxu0 }
 0x1ca   : > { %2542 = vmatmul.mubr.bf16.gmra.mxu0 %v1851_v30  ;;  %v1951_v23 = vsel %vm1684_vm5, %v5431_v31, %v1525_v42 }
 0x1cb   : > { %v4973_v2 = vpop.f32.mrf.mxu1 }
 0x1cc   : > { %v1589_v51 = vpop.permute.xlu0 %1588  ;;  %3394 = vmatmul.mubr.msk.bf16.gmra.mxu1 %vm1684_vm5, %v4756_v14 }
 0x1cd   : > { %v1365_v22 = vpop.permute.xlu1 %1364  ;;  %v2641_v18 = vpop.f32.mrf.mxu1  ;;  %3397 = vmatprep.mubr.msk.bf16.mxu1 %vm1684_vm5, %v4787_v12  ;;  %v2032_v8 = vsel %vm1747_vm7, %v1951_v23, %v1589_v51 }
 0x1ce   : > { %v1777_v59 = vsel %vm1747_vm7, %v1714_v24, %v1365_v22  ;;  %v5474_v18 = vld [vmem:[#allocation49_spill] sm:$0xff] }
 0x1cf   : > { %v4981_v19 = vpop.f32.mrf.mxu1 }
 0x1d0   : > { %v1651_v35 = vpop.permute.xlu0 %1650 }
 0x1d1   : > { %v2109_v14 = vsel %vm1810_vm6, %v2032_v8, %v1651_v35  ;;  %v1429_v34 = vpop.permute.xlu1 %1428  ;;  %v2644_v31 = vpop.f32.mrf.mxu1  ;;  %v5475_v8 = vld [vmem:[#allocation51_spill] sm:$0xff] }
 0x1d2   : > { %2549 = vmatprep.mubr.bf16.mxu0 %v2109_v14  ;;  %v1854_v32 = vsel %vm1810_vm6, %v1777_v59, %v1429_v34  ;;  %v5476_v35 = vld [vmem:[#allocation67_spill] sm:$0xff] }
 0x1d3   : > { %2550 = vmatmul.mubr.bf16.gmra.mxu0 %v1854_v32  ;;  %v1718_v59 = vsel %vm1684_vm5, %v5432_v16, %v5476_v35 }
 0x1d4   : > { %v1527_v12 = vpop.permute.xlu0 %1526  ;;  %3398 = vmatmul.mubr.msk.bf16.gmra.mxu1 %vm1684_vm5, %v4817_v29 }
 0x1d5   : > { %v1954_v21 = vsel %vm1684_vm5, %v4693_v58, %v1527_v12  ;;  %v1367_v44 = vpop.permute.xlu1 %1366  ;;  %3401 = vmatprep.mubr.msk.bf16.mxu1 %vm1684_vm5, %v4844_v52 }
 0x1d6   : > { %v2034_v5 = vsel %vm1747_vm7, %v1954_v21, %v4769_v6  ;;  %v1779_v20 = vsel %vm1747_vm7, %v1716_v36, %v1367_v44  ;;  %v5477_v44 = vld [vmem:[#allocation53_spill] sm:$0xff]  ;;  %v5478_v36 = vld [vmem:[#allocation59_spill] sm:$0xff] }
 0x1d7   : > { %v2112_v3 = vsel %vm1810_vm6, %v2034_v5, %v4784_v55  ;;  %v5004_v29 = vpop.f32.mrf.mxu0 }
 0x1d8   : > { %v1431_v28 = vpop.permute.xlu0 %1430  ;;  %2557 = vmatprep.mubr.bf16.mxu0 %v2112_v3 }
 0x1d9   : > { %v1529_v58 = vpop.permute.xlu1 %1528  ;;  %v2449_v33 = vpop.f32.mrf.mxu0  ;;  %v1857_v46 = vsel %vm1810_vm6, %v1779_v20, %v1431_v28 }
 0x1da   : > { %v1957_v52 = vsel %vm1684_vm5, %v5473_v63, %v1529_v58 }
 0x1db   : > { %v5009_v11 = vpop.f32.mrf.mxu0  ;;  %2558 = vmatmul.mubr.bf16.gmra.mxu0 %v1857_v46 }
 0x1dc   : > { %v1593_v6 = vpop.permute.xlu0 %1592  ;;  %3402 = vmatmul.mubr.msk.bf16.gmra.mxu1 %vm1684_vm5, %v4877_v62 }
 0x1dd   : > { %v2036_v55 = vsel %vm1747_vm7, %v1957_v52, %v1593_v6  ;;  %v1655_v54 = vpop.permute.xlu1 %1654  ;;  %v2452_v48 = vpop.f32.mrf.mxu0  ;;  %3405 = vmatprep.mubr.msk.bf16.mxu1 %vm1684_vm5, %v5466_v15  ;;  %v5479_v52 = vld [vmem:[#allocation69_spill] sm:$0xff] }
 0x1de   : > { %v2115_v50 = vsel %vm1810_vm6, %v2036_v55, %v1655_v54  ;;  %v1720_v46 = vsel %vm1684_vm5, %v5434_v53, %v5479_v52 }
 0x1df   : > { %2565 = vmatprep.mubr.bf16.mxu0 %v2115_v50  ;;  %v5017_v30 = vpop.f32.mrf.mxu1 }
 0x1e0   : > { %v1433_v42 = vpop.permute.xlu0 %1432 }
 0x1e1   : > { %v1531_v7 = vpop.permute.xlu1 %1530  ;;  %v2649_v51 = vpop.f32.mrf.mxu1  ;;  %v1860_v23 = vsel %vm1810_vm6, %v4465_v41, %v1433_v42 }
 0x1e2   : > { %v1960_v15 = vsel %vm1684_vm5, %v5436_v38, %v1531_v7 }
 0x1e3   : > { %2566 = vmatmul.mubr.bf16.gmra.mxu0 %v1860_v23  ;;  %v5021_v62 = vpop.f32.mrf.mxu1 }
 0x1e4   : > { %v1595_v22 = vpop.permute.xlu0 %1594  ;;  %3406 = vmatmul.mubr.msk.bf16.gmra.mxu1 %vm1684_vm5, %v5474_v18  ;;  %v5481_v18 = vld [vmem:[#allocation70_spill] sm:$0xff] }
 0x1e5   : > { %v1369_v25 = vpop.permute.xlu1 %1368  ;;  %v2652_v24 = vpop.f32.mrf.mxu1  ;;  %3409 = vmatprep.mubr.msk.bf16.mxu1 %vm1684_vm5, %v5475_v8  ;;  %v2038_v41 = vsel %vm1747_vm7, %v1960_v15, %v1595_v22  ;;  %v1722_v15 = vsel %vm1684_vm5, %v5439_v4, %v5481_v18 }
 0x1e6   : > { %v1781_v34 = vsel %vm1747_vm7, %v1718_v59, %v1369_v25 }
 0x1e8   : > { %v1657_v14 = vpop.permute.xlu0 %1656 }
 0x1e9   : > { %v2118_v31 = vsel %vm1810_vm6, %v2038_v41, %v1657_v14  ;;  %v1435_v32 = vpop.permute.xlu1 %1434 }
 0x1ea   : > { %2573 = vmatprep.mubr.bf16.mxu0 %v2118_v31  ;;  %v1863_v38 = vsel %vm1810_vm6, %v1781_v34, %v1435_v32 }
 0x1eb   : > { %v5036_v12 = vpop.f32.mrf.mxu0  ;;  %2574 = vmatmul.mubr.bf16.gmra.mxu0 %v1863_v38 }
 0x1ec   : > { %v1533_v21 = vpop.permute.xlu0 %1532  ;;  %3410 = vmatmul.mubr.msk.bf16.gmra.mxu1 %vm1684_vm5, %v5477_v44  ;;  %v5482_v44 = vld [vmem:[#allocation71_spill] sm:$0xff] }
 0x1ed   : > { %v1597_v13 = vpop.permute.xlu1 %1596  ;;  %v2457_v16 = vpop.f32.mrf.mxu0  ;;  %3413 = vmatprep.mubr.msk.bf16.mxu1 %vm1684_vm5, %v5478_v36  ;;  %v1963_v5 = vsel %vm1684_vm5, %v5441_v27, %v1533_v21  ;;  %v5480_v27 = vld [vmem:[#allocation68_spill] sm:$0xff] }
 0x1ee   : > { %v2040_v28 = vsel %vm1747_vm7, %v1963_v5, %v1597_v13  ;;  %v1724_v13 = vsel %vm1684_vm5, %v5444_v60, %v5482_v44  ;;  %v5483_v60 = vld [vmem:[#allocation72_spill] sm:$0xff] }
 0x1ef   : > { %v5044_v20 = vpop.f32.mrf.mxu0 }
 0x1f0   : > { %v1371_v3 = vpop.permute.xlu0 %1370 }
 0x1f1   : > { %v1659_v58 = vpop.permute.xlu1 %1658  ;;  %v2460_v33 = vpop.f32.mrf.mxu0  ;;  %v1783_v55 = vsel %vm1747_vm7, %v1720_v46, %v1371_v3  ;;  %v1726_v46 = vsel %vm1684_vm5, %v5449_v47, %v5483_v60 }
 0x1f2   : > { %v2121_v63 = vsel %vm1810_vm6, %v2040_v28, %v1659_v58 }
 0x1f3   : > { %2581 = vmatprep.mubr.bf16.mxu0 %v2121_v63  ;;  %v5051_v6 = vpop.f32.mrf.mxu1 }
 0x1f4   : > { %v1437_v54 = vpop.permute.xlu0 %1436  ;;  %3414 = vmatmul.mubr.msk.bf16.gmra.mxu1 %vm1684_vm5, %v5480_v27 }
 0x1f5   : > { %v1866_v48 = vsel %vm1810_vm6, %v1783_v55, %v1437_v54  ;;  %v1535_v50 = vpop.permute.xlu1 %1534  ;;  %v2657_v42 = vpop.f32.mrf.mxu1  ;;  %3417 = vmatprep.mubr.msk.bf16.mxu1 %vm1684_vm5, %v4362_v40 }
 0x1f6   : > { %2582 = vmatmul.mubr.bf16.gmra.mxu0 %v1866_v48  ;;  %v1966_v51 = vsel %vm1684_vm5, %v5446_v26, %v1535_v50 }
 0x1f7   : > { %v5059_v7 = vpop.f32.mrf.mxu1 }
 0x1f8   : > { %v1599_v53 = vpop.permute.xlu0 %1598 }
 0x1f9   : > { %v1373_v23 = vpop.permute.xlu1 %1372  ;;  %v2660_v22 = vpop.f32.mrf.mxu1  ;;  %v2042_v25 = vsel %vm1747_vm7, %v1966_v51, %v1599_v53 }
 0x1fa   : > { %v1785_v40 = vsel %vm1747_vm7, %v1722_v15, %v1373_v23 }
 0x1fc   : > { %v1661_v24 = vpop.permute.xlu0 %1660  ;;  %3418 = vmatmul.mubr.msk.bf16.gmra.mxu1 %vm1684_vm5, %v4412_v0 }
 0x1fd   : > { %v2124_v8 = vsel %vm1810_vm6, %v2042_v25, %v1661_v24  ;;  %v1439_v35 = vpop.permute.xlu1 %1438  ;;  %3421 = vmatprep.mubr.msk.bf16.mxu1 %vm1684_vm5, %v4462_v17 }
 0x1fe   : > { %2589 = vmatprep.mubr.bf16.mxu0 %v2124_v8  ;;  %v1869_v26 = vsel %vm1810_vm6, %v1785_v40, %v1439_v35  ;;  %v5484_v8 = vld [vmem:[#allocation73_spill] sm:$0xff] }
 0x1ff   : > { %v5074_v59 = vpop.f32.mrf.mxu0  ;;  %2590 = vmatmul.mubr.bf16.gmra.mxu0 %v1869_v26  ;;  %v1728_v35 = vsel %vm1684_vm5, %v5455_v45, %v5484_v8  ;;  %v5485_v45 = vld [vmem:[#allocation75_spill] sm:$0xff] }
 0x200   : > { %v1537_v4 = vpop.permute.xlu0 %1536  ;;  %v1730_v44 = vsel %vm1684_vm5, %v5460_v49, %v5485_v45 }
 0x201   : > { %v1601_v41 = vpop.permute.xlu1 %1600  ;;  %v2465_v14 = vpop.f32.mrf.mxu0  ;;  %v1969_v0 = vsel %vm1684_vm5, %v5451_v61, %v1537_v4 }
 0x202   : > { %v2044_v17 = vsel %vm1747_vm7, %v1969_v0, %v1601_v41 }
 0x203   : > { %v5078_v34 = vpop.f32.mrf.mxu0 }
 0x204   : > { %v1375_v31 = vpop.permute.xlu0 %1374  ;;  %3422 = vmatmul.mubr.msk.bf16.gmra.mxu1 %vm1684_vm5, %v3565_v1 }
 0x205   : > { %v1663_v32 = vpop.permute.xlu1 %1662  ;;  %v2468_v38 = vpop.f32.mrf.mxu0  ;;  %v1787_v61 = vsel %vm1747_vm7, %v1724_v13, %v1375_v31 }
 0x206   : > { %v2127_v21 = vsel %vm1810_vm6, %v2044_v17, %v1663_v32 }
 0x207   : > { %2597 = vmatprep.mubr.bf16.mxu0 %v2127_v21  ;;  %v5087_v16 = vpop.f32.mrf.mxu1 }
 0x208   : > { %v1441_v36 = vpop.permute.xlu0 %1440 }
 0x209   : > { %v1872_v5 = vsel %vm1810_vm6, %v1787_v61, %v1441_v36  ;;  %v1539_v3 = vpop.permute.xlu1 %1538  ;;  %v2665_v1 = vpop.f32.mrf.mxu1 }
 0x20a   : > { %2598 = vmatmul.mubr.bf16.gmra.mxu0 %v1872_v5  ;;  %v1972_v33 = vsel %vm1684_vm5, %v5457_v37, %v1539_v3 }
 0x20b   : > { %v5091_v28 = vpop.f32.mrf.mxu1 }
 0x20c   : > { %v1603_v58 = vpop.permute.xlu0 %1602 }
 0x20d   : > { %v1377_v63 = vpop.permute.xlu1 %1376  ;;  %v2668_v52 = vpop.f32.mrf.mxu1  ;;  %v2046_v55 = vsel %vm1747_vm7, %v1972_v33, %v1603_v58 }
 0x20e   : > { %v1789_v27 = vsel %vm1747_vm7, %v1726_v46, %v1377_v63 }
 0x210   : > { %v1665_v54 = vpop.permute.xlu0 %1664 }
 0x211   : > { %v2130_v48 = vsel %vm1810_vm6, %v2046_v55, %v1665_v54  ;;  %v1443_v50 = vpop.permute.xlu1 %1442 }
 0x212   : > { %2605 = vmatprep.mubr.bf16.mxu0 %v2130_v48  ;;  %v1875_v42 = vsel %vm1810_vm6, %v1789_v27, %v1443_v50 }
 0x213   : > { %v5102_v53 = vpop.f32.mrf.mxu0  ;;  %2606 = vmatmul.mubr.bf16.gmra.mxu0 %v1875_v42 }
 0x214   : > { %v1541_v37 = vpop.permute.xlu0 %1540 }
 0x215   : > { %v1605_v51 = vpop.permute.xlu1 %1604  ;;  %v2473_v23 = vpop.f32.mrf.mxu0  ;;  %v1975_v47 = vsel %vm1684_vm5, %v5462_v10, %v1541_v37 }
 0x216   : > { %v2048_v15 = vsel %vm1747_vm7, %v1975_v47, %v1605_v51 }
 0x217   : > { %v5106_v22 = vpop.f32.mrf.mxu0 }
 0x218   : > { %v1379_v18 = vpop.permute.xlu0 %1378 }
 0x219   : > { %v1667_v25 = vpop.permute.xlu1 %1666  ;;  %v2476_v24 = vpop.f32.mrf.mxu0  ;;  %v1791_v4 = vsel %vm1747_vm7, %v1728_v35, %v1379_v18 }
 0x21a   : > { %v2133_v40 = vsel %vm1810_vm6, %v2048_v15, %v1667_v25 }
 0x21b   : > { %2613 = vmatprep.mubr.bf16.mxu0 %v2133_v40  ;;  %v5113_v26 = vpop.f32.mrf.mxu1 }
 0x21c   : > { %v1445_v41 = vpop.permute.xlu0 %1444 }
 0x21d   : > { %v1878_v10 = vsel %vm1810_vm6, %v1791_v4, %v1445_v41  ;;  %v1543_v14 = vpop.permute.xlu1 %1542  ;;  %v2673_v0 = vpop.f32.mrf.mxu1 }
 0x21e   : > { %2614 = vmatmul.mubr.bf16.gmra.mxu0 %v1878_v10  ;;  %v1978_v32 = vsel %vm1684_vm5, %v5464_v9, %v1543_v14 }
 0x21f   : > { %v5117_v31 = vpop.f32.mrf.mxu1 }
 0x220   : > { %v1607_v17 = vpop.permute.xlu0 %1606 }
 0x221   : > { %v1381_v38 = vpop.permute.xlu1 %1380  ;;  %v2676_v21 = vpop.f32.mrf.mxu1  ;;  %v2050_v13 = vsel %vm1747_vm7, %v1978_v32, %v1607_v17 }
 0x222   : > { %v1793_v36 = vsel %vm1747_vm7, %v1730_v44, %v1381_v38 }
 0x224   : > { %v1669_v61 = vpop.permute.xlu0 %1668 }
 0x225   : > { %v2136_v5 = vsel %vm1810_vm6, %v2050_v13, %v1669_v61  ;;  %v1447_v3 = vpop.permute.xlu1 %1446 }
 0x226   : > { %2621 = vmatprep.mubr.bf16.mxu0 %v2136_v5  ;;  %v1881_v1 = vsel %vm1810_vm6, %v1793_v36, %v1447_v3 }
 0x227   : > { %v5128_v58 = vpop.f32.mrf.mxu0  ;;  %2622 = vmatmul.mubr.bf16.gmra.mxu0 %v1881_v1 }
 0x229   : > { %v2481_v9 = vpop.f32.mrf.mxu0 }
 0x22b   : > { %v5130_v33 = vpop.f32.mrf.mxu0 }
 0x22d   : > { %v2484_v63 = vpop.f32.mrf.mxu0 }
 0x22f   : > { %v5132_v52 = vpop.f32.mrf.mxu1 }
 0x231   : > { %v2681_v49 = vpop.f32.mrf.mxu1 }
 0x233   : > { %v5134_v60 = vpop.f32.mrf.mxu1 }
 0x235   : > { %v2684_v46 = vpop.f32.mrf.mxu1 }
 0x23b   : > { %v5136_v55 = vpop.f32.mrf.mxu0 }
 0x23d   : > { %v2489_v54 = vpop.f32.mrf.mxu0 }
 0x23f   : > { %v5138_v27 = vpop.f32.mrf.mxu0 }
 0x241   : > { %v2492_v48 = vpop.f32.mrf.mxu0 }
 0x243   : > { %v5140_v50 = vpop.f32.mrf.mxu1 }
 0x245   : > { %v2689_v42 = vpop.f32.mrf.mxu1 }
 0x247   : > { %v5142_v37 = vpop.f32.mrf.mxu1 }
 0x249   : > { %v2692_v51 = vpop.f32.mrf.mxu1 }
 0x24c   : > { %v3363_v23 = vpop.f32.mrf.mxu1 }
 0x24d   : > { %v2737_v14 = vadd.f32 %v3363_v23, %v5004_v29 }
 0x24e   : > { %v5144_v47 = vpop.f32.mrf.mxu0  ;;  %v2728_v18 = vpop.f32.mrf.mxu1 }
 0x24f   : > { %v2729_v15 = vadd.f32 %v2728_v18, %v4957_v56 }
 0x250   : > { %v2497_v25 = vpop.f32.mrf.mxu0  ;;  %v3364_v24 = vpop.f32.mrf.mxu1 }
 0x251   : > { %2983 = vxpose.xlu0.b32.start [1/16] (narrow) %v2729_v15, 16  ;;  %v2740_v56 = vadd.f32 %v3364_v24, %v5009_v11 }
 0x252   : > { %v5147_v40 = vpop.f32.mrf.mxu0  ;;  %v2731_v8 = vpop.f32.mrf.mxu1 }
 0x253   : > { %v2732_v35 = vadd.f32 %v2731_v8, %v4969_v57 }
 0x254   : > { %v2500_v4 = vpop.f32.mrf.mxu0  ;;  %v3367_v41 = vpop.f32.mrf.mxu1 }
 0x255   : > { %2984 = vxpose.xlu0.b32.cont [2/16] (narrow) %v2732_v35, 16  ;;  %v2753_v11 = vadd.f32 %v3367_v41, %v5074_v59 }
 0x256   : > { %v2744_v10 = vpop.f32.mrf.mxu1 }
 0x257   : > { %v2503_v0 = vpop.f32.mrf.mxu0  ;;  %v2745_v57 = vadd.f32 %v2744_v10, %v5036_v12 }
 0x258   : > { %v3368_v17 = vpop.f32.mrf.mxu1 }
 0x259   : > { %2985 = vxpose.xlu0.b32.cont [3/16] (narrow) %v2737_v14, 16  ;;  %v2505_v32 = vpop.f32.mrf.mxu0  ;;  %v2756_v48 = vadd.f32 %v3368_v17, %v5078_v34 }
 0x25a   : > { %v2747_v38 = vpop.f32.mrf.mxu1 }
 0x25b   : > { %v2506_v21 = vpop.f32.mrf.mxu0  ;;  %v2748_v29 = vadd.f32 %v2747_v38, %v5044_v20 }
 0x25c   : > { %v3371_v45 = vpop.f32.mrf.mxu1 }
 0x25d   : > { %2986 = vxpose.xlu0.b32.cont [4/16] (narrow) %v2740_v56, 16  ;;  %v2508_v44 = vpop.f32.mrf.mxu0  ;;  %v2769_v10 = vadd.f32 %v3371_v45, %v5128_v58 }
 0x25e   : > { %v2760_v13 = vpop.f32.mrf.mxu1 }
 0x25f   : > { %v2761_v20 = vadd.f32 %v2760_v13, %v5102_v53 }
 0x260   : > { %v3372_v61 = vpop.f32.mrf.mxu1 }
 0x261   : > { %2987 = vxpose.xlu0.b32.cont [5/16] (narrow) %v2745_v57, 16  ;;  %v2772_v38 = vadd.f32 %v3372_v61, %v5130_v33 }
 0x262   : > { %v2511_v36 = vpop.f32.mrf.mxu0  ;;  %v2763_v5 = vpop.f32.mrf.mxu1 }
 0x263   : > { %v2764_v8 = vadd.f32 %v2763_v5, %v5106_v22 }
 0x264   : > { %v2513_v3 = vpop.f32.mrf.mxu0  ;;  %v3375_v1 = vpop.f32.mrf.mxu1 }
 0x265   : > { %2988 = vxpose.xlu0.b32.cont [6/16] (narrow) %v2748_v29, 16 }
 0x266   : > { %v2514_v9 = vpop.f32.mrf.mxu0  ;;  %v2776_v63 = vpop.f32.mrf.mxu1 }
 0x267   : > { %v2777_v13 = vadd.f32 %v2776_v63, %v5136_v55 }
 0x268   : > { %v2516_v49 = vpop.f32.mrf.mxu0  ;;  %v3376_v46 = vpop.f32.mrf.mxu1 }
 0x269   : > { %2989 = vxpose.xlu0.b32.cont [7/16] (narrow) %v2753_v11, 16  ;;  %v2785_v49 = vadd.f32 %v3375_v1, %v5144_v47 }
 0x26a   : > { %v2779_v54 = vpop.f32.mrf.mxu1 }
 0x26b   : > { %v2519_v12 = vpop.f32.mrf.mxu0  ;;  %v2780_v29 = vadd.f32 %v2779_v54, %v5138_v27 }
 0x26c   : > { %v3379_v42 = vpop.f32.mrf.mxu1 }
 0x26d   : > { %2990 = vxpose.xlu0.b32.cont [8/16] (narrow) %v2756_v48, 16  ;;  %v2521_v51 = vpop.f32.mrf.mxu0  ;;  %v2801_v14 = vadd.f32 %v3379_v42, %v2511_v36  ;;  %v2788_v42 = vadd.f32 %v3376_v46, %v5147_v40 }
 0x26e   : > { %v2792_v23 = vpop.f32.mrf.mxu1 }
 0x26f   : > { %v2793_v18 = vadd.f32 %v2792_v23, %v2503_v0  ;;  %v2522_v15 = vpop.f32.mrf.mxu0 }
 0x270   : > { %v3380_v25 = vpop.f32.mrf.mxu1 }
 0x271   : > { %2991 = vxpose.xlu0.b32.cont [9/16] (narrow) %v2761_v20, 16  ;;  %3015 = vxpose.xlu1.b32.start [1/16] (narrow) %v2793_v18, 16  ;;  %v2524_v24 = vpop.f32.mrf.mxu0  ;;  %v2804_v56 = vadd.f32 %v3380_v25, %v2514_v9 }
 0x272   : > { %v2795_v59 = vpop.f32.mrf.mxu1 }
 0x273   : > { %v2796_v35 = vadd.f32 %v2795_v59, %v2506_v21 }
 0x274   : > { %v3383_v4 = vpop.f32.mrf.mxu1 }
 0x275   : > { %2992 = vxpose.xlu0.b32.cont [10/16] (narrow) %v2764_v8, 16  ;;  %3016 = vxpose.xlu1.b32.cont [2/16] (narrow) %v2796_v35, 16 }
 0x276   : > { %v2527_v34 = vpop.f32.mrf.mxu0  ;;  %v2808_v41 = vpop.f32.mrf.mxu1 }
 0x277   : > { %v2809_v57 = vadd.f32 %v2808_v41, %v2519_v12  ;;  %v2817_v48 = vadd.f32 %v3383_v4, %v2527_v34 }
 0x278   : > { %v2529_v17 = vpop.f32.mrf.mxu0  ;;  %v3384_v53 = vpop.f32.mrf.mxu1 }
 0x279   : > { %2993 = vxpose.xlu0.b32.cont [11/16] (narrow) %v2769_v10, 16  ;;  %3017 = vxpose.xlu1.b32.cont [3/16] (narrow) %v2801_v14, 16 }
 0x27a   : > { %v2530_v0 = vpop.f32.mrf.mxu0  ;;  %v2811_v32 = vpop.f32.mrf.mxu1 }
 0x27b   : > { %v2812_v3 = vadd.f32 %v2811_v32, %v2522_v15  ;;  %v2820_v51 = vadd.f32 %v3384_v53, %v2530_v0 }
 0x27c   : > { %v2532_v44 = vpop.f32.mrf.mxu0  ;;  %v3387_v22 = vpop.f32.mrf.mxu1 }
 0x27d   : > { %2994 = vxpose.xlu0.b32.cont [12/16] (narrow) %v2772_v38, 16  ;;  %3018 = vxpose.xlu1.b32.cont [4/16] (narrow) %v2804_v56, 16 }
 0x27e   : > { %v2824_v21 = vpop.f32.mrf.mxu1 }
 0x27f   : > { %v2535_v5 = vpop.f32.mrf.mxu0 }
 0x280   : > { %v3388_v58 = vpop.f32.mrf.mxu1  ;;  %v2825_v18 = vadd.f32 %v2824_v21, %v2535_v5 }
 0x281   : > { %2995 = vxpose.xlu0.b32.cont [13/16] (narrow) %v2777_v13, 16  ;;  %3019 = vxpose.xlu1.b32.cont [5/16] (narrow) %v2809_v57, 16  ;;  %v2537_v45 = vpop.f32.mrf.mxu0 }
 0x282   : > { %v2827_v36 = vpop.f32.mrf.mxu1 }
 0x283   : > { %v2538_v11 = vpop.f32.mrf.mxu0 }
 0x284   : > { %v3391_v33 = vpop.f32.mrf.mxu1  ;;  %v2828_v1 = vadd.f32 %v2827_v36, %v2538_v11 }
 0x285   : > { %2996 = vxpose.xlu0.b32.cont [14/16] (narrow) %v2780_v29, 16  ;;  %3020 = vxpose.xlu1.b32.cont [6/16] (narrow) %v2812_v3, 16  ;;  %v2540_v61 = vpop.f32.mrf.mxu0 }
 0x286   : > { %v2840_v9 = vpop.f32.mrf.mxu1 }
 0x288   : > { %v3392_v55 = vpop.f32.mrf.mxu1 }
 0x289   : > { %2997 = vxpose.xlu0.b32.cont [15/16] (narrow) %v2785_v49, 16  ;;  %3021 = vxpose.xlu1.b32.cont [7/16] (narrow) %v2817_v48, 16 }
 0x28a   : > { %v2543_v63 = vpop.f32.mrf.mxu0  ;;  %v2843_v12 = vpop.f32.mrf.mxu1 }
 0x28b   : > { %v2833_v40 = vadd.f32 %v3387_v22, %v2543_v63 }
 0x28c   : > { %v2545_v23 = vpop.f32.mrf.mxu0  ;;  %v3395_v27 = vpop.f32.mrf.mxu1 }
 0x28d   : > { %2998 = vxpose.xlu0.b32.end [16/16] (narrow) %v2788_v42, 16  ;;  %3022 = vxpose.xlu1.b32.cont [8/16] (narrow) %v2820_v51, 16 }
 0x28e   : > { %v2546_v54 = vpop.f32.mrf.mxu0  ;;  %v2856_v20 = vpop.f32.mrf.mxu1 }
 0x28f   : > { %v2836_v10 = vadd.f32 %v3388_v58, %v2546_v54 }
 0x290   : > { %v2548_v15 = vpop.f32.mrf.mxu0  ;;  %v3396_v25 = vpop.f32.mrf.mxu1 }
 0x291   : > { %3023 = vxpose.xlu1.b32.cont [9/16] (narrow) %v2825_v18, 16 }
 0x292   : > { %v2859_v47 = vpop.f32.mrf.mxu1 }
 0x293   : > { %v2551_v24 = vpop.f32.mrf.mxu0 }
 0x294   : > { %v5164_v59 = vpop.f32.mrf.mxu1  ;;  %v2841_v32 = vadd.f32 %v2840_v9, %v2551_v24 }
 0x295   : > { %3024 = vxpose.xlu1.b32.cont [10/16] (narrow) %v2828_v1, 16  ;;  %v2553_v8 = vpop.f32.mrf.mxu0 }
 0x296   : > { %v2872_v35 = vpop.f32.mrf.mxu1 }
 0x297   : > { %v2554_v46 = vpop.f32.mrf.mxu0 }
 0x298   : > { %v5166_v4 = vpop.f32.mrf.mxu1  ;;  %v2844_v21 = vadd.f32 %v2843_v12, %v2554_v46 }
 0x299   : > { %3025 = vxpose.xlu1.b32.cont [11/16] (narrow) %v2833_v40, 16  ;;  %v2556_v34 = vpop.f32.mrf.mxu0 }
 0x29a   : > { %v2875_v41 = vpop.f32.mrf.mxu1 }
 0x29b   : > { %v2559_v14 = vpop.f32.mrf.mxu0 }
 0x29c   : > { %v5168_v17 = vpop.f32.mrf.mxu1  ;;  %v2849_v36 = vadd.f32 %v3391_v33, %v2559_v14 }
 0x29d   : > { %3026 = vxpose.xlu1.b32.cont [12/16] (narrow) %v2836_v10, 16  ;;  %v2561_v53 = vpop.f32.mrf.mxu0 }
 0x29e   : > { %v5170_v0 = vpop.f32.mrf.mxu1 }
 0x29f   : > { %v2562_v38 = vpop.f32.mrf.mxu0 }
 0x2a0   : > { %v5172_v56 = vpop.f32.mrf.mxu1  ;;  %v2852_v49 = vadd.f32 %v3392_v55, %v2562_v38 }
 0x2a1   : > { %3027 = vxpose.xlu1.b32.cont [13/16] (narrow) %v2841_v32, 16  ;;  %v2564_v44 = vpop.f32.mrf.mxu0 }
 0x2a2   : > { %v5174_v22 = vpop.f32.mrf.mxu1 }
 0x2a3   : > { %v2567_v13 = vpop.f32.mrf.mxu0 }
 0x2a4   : > { %v2857_v57 = vadd.f32 %v2856_v20, %v2567_v13  ;;  %v5176_v5 = vpop.f32.mrf.mxu1 }
 0x2a5   : > { %3028 = vxpose.xlu1.b32.cont [14/16] (narrow) %v2844_v21, 16  ;;  %v2569_v58 = vpop.f32.mrf.mxu0 }
 0x2a6   : > { %v5178_v45 = vpop.f32.mrf.mxu1  ;;  %3077 = vxpose.xlu0.b32.start [1/16] (narrow) %v2857_v57, 16 }
 0x2a7   : > { %v2570_v29 = vpop.f32.mrf.mxu0 }
 0x2a8   : > { %v2860_v3 = vadd.f32 %v2859_v47, %v2570_v29  ;;  %v5180_v11 = vpop.f32.mrf.mxu1 }
 0x2a9   : > { %3029 = vxpose.xlu1.b32.cont [15/16] (narrow) %v2849_v36, 16  ;;  %v2572_v61 = vpop.f32.mrf.mxu0 }
 0x2aa   : > { %v5182_v9 = vpop.f32.mrf.mxu1  ;;  %3078 = vxpose.xlu0.b32.cont [2/16] (narrow) %v2860_v3, 16 }
 0x2ab   : > { %v2575_v48 = vpop.f32.mrf.mxu0 }
 0x2ac   : > { %v2865_v63 = vadd.f32 %v3395_v27, %v2575_v48  ;;  %v3411_v12 = vpop.f32.mrf.mxu1  ;;  %v5206_v48 = vpop.permute.xlu1 %3054 }
 0x2ad   : > { %3030 = vxpose.xlu1.b32.end [16/16] (narrow) %v2852_v49, 16  ;;  %v2577_v42 = vpop.f32.mrf.mxu0  ;;  %v2929_v27 = vadd.f32 %v3411_v12, %v4973_v2 }
 0x2ae   : > { %v2920_v51 = vpop.f32.mrf.mxu1  ;;  %3079 = vxpose.xlu0.b32.cont [3/16] (narrow) %v2865_v63, 16 }
 0x2af   : > { %v2921_v23 = vadd.f32 %v2920_v51, %v4940_v39  ;;  %v2578_v33 = vpop.f32.mrf.mxu0 }
 0x2b0   : > { %v2868_v54 = vadd.f32 %v3396_v25, %v2578_v33  ;;  %v3412_v20 = vpop.f32.mrf.mxu1 }
 0x2b1   : > { %3109 = vxpose.xlu1.b32.start [1/16] (narrow) %v2921_v23, 16  ;;  %v2580_v18 = vpop.f32.mrf.mxu0  ;;  %v2932_v25 = vadd.f32 %v3412_v20, %v4981_v19 }
 0x2b2   : > { %v2923_v15 = vpop.f32.mrf.mxu1  ;;  %3080 = vxpose.xlu0.b32.cont [4/16] (narrow) %v2868_v54, 16 }
 0x2b3   : > { %v2924_v47 = vadd.f32 %v2923_v15, %v4952_v43 }
 0x2b4   : > { %v3415_v1 = vpop.f32.mrf.mxu1 }
 0x2b5   : > { %3110 = vxpose.xlu1.b32.cont [2/16] (narrow) %v2924_v47, 16  ;;  %v2945_v21 = vadd.f32 %v3415_v1, %v5051_v6 }
 0x2b6   : > { %v2583_v55 = vpop.f32.mrf.mxu0  ;;  %v2936_v8 = vpop.f32.mrf.mxu1 }
 0x2b7   : > { %v2873_v24 = vadd.f32 %v2872_v35, %v2583_v55  ;;  %v2937_v43 = vadd.f32 %v2936_v8, %v5017_v30  ;;  %v5193_v30 = vpop.permute.xlu0 %3049 }
 0x2b8   : > { %v2585_v40 = vpop.f32.mrf.mxu0  ;;  %v3416_v34 = vpop.f32.mrf.mxu1 }
 0x2b9   : > { %3081 = vxpose.xlu0.b32.cont [5/16] (narrow) %v2873_v24, 16  ;;  %3111 = vxpose.xlu1.b32.cont [3/16] (narrow) %v2929_v27, 16  ;;  %v2948_v57 = vadd.f32 %v3416_v34, %v5059_v7 }
 0x2ba   : > { %v2586_v39 = vpop.f32.mrf.mxu0  ;;  %v2939_v53 = vpop.f32.mrf.mxu1 }
 0x2bb   : > { %v2876_v46 = vadd.f32 %v2875_v41, %v2586_v39  ;;  %v2940_v35 = vadd.f32 %v2939_v53, %v5021_v62 }
 0x2bc   : > { %v2588_v10 = vpop.f32.mrf.mxu0  ;;  %v3419_v44 = vpop.f32.mrf.mxu1 }
 0x2bd   : > { %3082 = vxpose.xlu0.b32.cont [6/16] (narrow) %v2876_v46, 16  ;;  %3112 = vxpose.xlu1.b32.cont [4/16] (narrow) %v2932_v25, 16  ;;  %v2961_v18 = vadd.f32 %v3419_v44, %v5113_v26 }
 0x2be   : > { %v2952_v13 = vpop.f32.mrf.mxu1 }
 0x2bf   : > { %v2591_v14 = vpop.f32.mrf.mxu0  ;;  %v2953_v6 = vadd.f32 %v2952_v13, %v5087_v16 }
 0x2c0   : > { %v2881_v32 = vadd.f32 %v5164_v59, %v2591_v14  ;;  %v3420_v62 = vpop.f32.mrf.mxu1 }
 0x2c1   : > { %3113 = vxpose.xlu1.b32.cont [5/16] (narrow) %v2937_v43, 16  ;;  %v2593_v2 = vpop.f32.mrf.mxu0  ;;  %v2964_v55 = vadd.f32 %v3420_v62, %v5117_v31 }
 0x2c2   : > { %3083 = vxpose.xlu0.b32.cont [7/16] (narrow) %v2881_v32, 16  ;;  %v2955_v49 = vpop.f32.mrf.mxu1 }
 0x2c3   : > { %v2594_v38 = vpop.f32.mrf.mxu0 }
 0x2c4   : > { %v2884_v19 = vadd.f32 %v5166_v4, %v2594_v38  ;;  %v3423_v51 = vpop.f32.mrf.mxu1 }
 0x2c5   : > { %3114 = vxpose.xlu1.b32.cont [6/16] (narrow) %v2940_v35, 16  ;;  %v2596_v41 = vpop.f32.mrf.mxu0  ;;  %v2977_v31 = vadd.f32 %v3423_v51, %v5140_v50 }
 0x2c6   : > { %3084 = vxpose.xlu0.b32.cont [8/16] (narrow) %v2884_v19, 16  ;;  %v2968_v47 = vpop.f32.mrf.mxu1 }
 0x2c8   : > { %v3424_v27 = vpop.f32.mrf.mxu1 }
 0x2c9   : > { %3115 = vxpose.xlu1.b32.cont [7/16] (narrow) %v2945_v21, 16 }
 0x2ca   : > { %v2599_v59 = vpop.f32.mrf.mxu0  ;;  %v2971_v40 = vpop.f32.mrf.mxu1 }
 0x2cb   : > { %v2889_v58 = vadd.f32 %v5170_v0, %v2599_v59  ;;  %v2972_v25 = vadd.f32 %v2971_v40, %v5134_v60 }
 0x2cc   : > { %v2601_v36 = vpop.f32.mrf.mxu0 }
 0x2cd   : > { %3085 = vxpose.xlu0.b32.cont [9/16] (narrow) %v2889_v58, 16  ;;  %v2999_v29 = vpop.trf.xlu0  ;;  %3116 = vxpose.xlu1.b32.cont [8/16] (narrow) %v2948_v57, 16 }
 0x2ce   : > { %v3057_v4 = vadd.f32 %v5193_v30, %v2999_v29  ;;  %v2602_v3 = vpop.f32.mrf.mxu0 }
 0x2cf   : > { %v2892_v61 = vadd.f32 %v5174_v22, %v2602_v3  ;;  %v2956_v22 = vadd.f32 %v2955_v49, %v5091_v28 }
 0x2d0   : > { %vm3061_vm8 = vcmp.ge.f32.partialorder %v3057_v4, 0.0  ;;  %v3065_v7 = vmul.f32 0.01, %v3057_v4  ;;  %v2604_v0 = vpop.f32.mrf.mxu0 }
 0x2d1   : > { %3086 = vxpose.xlu0.b32.cont [10/16] (narrow) %v2892_v61, 16  ;;  %v3000_v63 = vpop.trf.xlu0  ;;  %3117 = vxpose.xlu1.b32.cont [9/16] (narrow) %v2953_v6, 16 }
 0x2d2   : > { %v3069_v12 = vsel %vm3061_vm8, %v3057_v4, %v3065_v7  ;;  %v3059_v16 = vadd.f32 %v5206_v48, %v3000_v63 }
 0x2d3   : > { %3073 = vst [vmem:[%s5204_s6] sm:$0xff] %v3069_v12  ;;  %v2607_v42 = vpop.f32.mrf.mxu0 }
 0x2d4   : > { %vm3063_vm9 = vcmp.ge.f32.partialorder %v3059_v16, 0.0  ;;  %v3067_v23 = vmul.f32 0.01, %v3059_v16  ;;  %v2897_v33 = vadd.f32 %v5168_v17, %v2607_v42  ;;  %v2969_v17 = vadd.f32 %v2968_v47, %v5132_v52 }
 0x2d5   : > { %3118 = vxpose.xlu1.b32.cont [10/16] (narrow) %v2956_v22, 16  ;;  %v2609_v54 = vpop.f32.mrf.mxu0 }
 0x2d6   : > { %v3071_v20 = vsel %vm3063_vm9, %v3059_v16, %v3067_v23  ;;  %3087 = vxpose.xlu0.b32.cont [11/16] (narrow) %v2897_v33, 16 }
 0x2d7   : > { %3075 = vst [vmem:[%s5204_s6 + $0x10] sm:$0xff] %v3071_v20  ;;  %v2610_v15 = vpop.f32.mrf.mxu0 }
 0x2d8   : > { %v2900_v1 = vadd.f32 %v5172_v56, %v2610_v15 }
 0x2d9   : > { %3119 = vxpose.xlu1.b32.cont [11/16] (narrow) %v2961_v18, 16  ;;  %v2612_v28 = vpop.f32.mrf.mxu0 }
 0x2da   : > { %3088 = vxpose.xlu0.b32.cont [12/16] (narrow) %v2900_v1, 16 }
 0x2dd   : > { %3120 = vxpose.xlu1.b32.cont [12/16] (narrow) %v2964_v55, 16 }
 0x2de   : > { %v2615_v24 = vpop.f32.mrf.mxu0 }
 0x2df   : > { %v2905_v8 = vadd.f32 %v5178_v45, %v2615_v24  ;;  %v2980_v45 = vadd.f32 %v3424_v27, %v5142_v37 }
 0x2e0   : > { %v2617_v39 = vpop.f32.mrf.mxu0 }
 0x2e1   : > { %3089 = vxpose.xlu0.b32.cont [13/16] (narrow) %v2905_v8, 16  ;;  %3121 = vxpose.xlu1.b32.cont [13/16] (narrow) %v2969_v17, 16 }
 0x2e2   : > { %v2618_v26 = vpop.f32.mrf.mxu0 }
 0x2e3   : > { %v2908_v56 = vadd.f32 %v5182_v9, %v2618_v26 }
 0x2e4   : > { %v2620_v46 = vpop.f32.mrf.mxu0 }
 0x2e5   : > { %3090 = vxpose.xlu0.b32.cont [14/16] (narrow) %v2908_v56, 16  ;;  %3122 = vxpose.xlu1.b32.cont [14/16] (narrow) %v2972_v25, 16 }
 0x2e7   : > { %v2623_v34 = vpop.f32.mrf.mxu0 }
 0x2e8   : > { %v2913_v10 = vadd.f32 %v5176_v5, %v2623_v34 }
 0x2e9   : > { %3123 = vxpose.xlu1.b32.cont [15/16] (narrow) %v2977_v31, 16  ;;  %v2625_v52 = vpop.f32.mrf.mxu0 }
 0x2ea   : > { %3091 = vxpose.xlu0.b32.cont [15/16] (narrow) %v2913_v10, 16 }
 0x2eb   : > { %v2626_v43 = vpop.f32.mrf.mxu0 }
 0x2ec   : > { %v2916_v60 = vadd.f32 %v5180_v11, %v2626_v43 }
 0x2ed   : > { %3124 = vxpose.xlu1.b32.end [16/16] (narrow) %v2980_v45, 16  ;;  %v3031_v9 = vpop.trf.xlu1  ;;  %v2628_v14 = vpop.f32.mrf.mxu0 }
 0x2ee   : > { %v3058_v53 = vadd.f32 %v5193_v30, %v3031_v9  ;;  %3092 = vxpose.xlu0.b32.end [16/16] (narrow) %v2916_v60, 16 }
 0x2f0   : > { %vm3062_vm10 = vcmp.ge.f32.partialorder %v3058_v53, 0.0  ;;  %v3066_v50 = vmul.f32 0.01, %v3058_v53 }
 0x2f1   : > { %v3032_v32 = vpop.trf.xlu1 }
 0x2f2   : > { %v3070_v5 = vsel %vm3062_vm10, %v3058_v53, %v3066_v50  ;;  %v3060_v2 = vadd.f32 %v5206_v48, %v3032_v32 }
 0x2f3   : > { %3074 = vst [vmem:[%s5204_s6 + $0x8] sm:$0xff] %v3070_v5 }
 0x2f4   : > { %vm3064_vm11 = vcmp.ge.f32.partialorder %v3060_v2, 0.0  ;;  %v3068_v37 = vmul.f32 0.01, %v3060_v2 }
 0x2f6   : > { %v3072_v35 = vsel %vm3064_vm11, %v3060_v2, %v3068_v37 }
 0x2f7   : > { %3076 = vst [vmem:[%s5204_s6 + $0x18] sm:$0xff] %v3072_v35 }
 0x32d   : > { %v3125_v11 = vpop.trf.xlu1 }
 0x32e   : > { %v3142_v38 = vadd.f32 %v3125_v11, %v5193_v30  ;;  %v3093_v44 = vpop.trf.xlu0 }
 0x32f   : > { %v3141_v19 = vadd.f32 %v3093_v44, %v5193_v30 }
 0x330   : > { %vm3146_vm12 = vcmp.ge.f32.partialorder %v3142_v38, 0.0  ;;  %v3150_v41 = vmul.f32 0.01, %v3142_v38 }
 0x331   : > { %vm3145_vm13 = vcmp.ge.f32.partialorder %v3141_v19, 0.0  ;;  %v3149_v21 = vmul.f32 0.01, %v3141_v19  ;;  %v3126_v13 = vpop.trf.xlu1 }
 0x332   : > { %v3154_v59 = vsel %vm3146_vm12, %v3142_v38, %v3150_v41  ;;  %v3144_v57 = vadd.f32 %v3126_v13, %v5206_v48  ;;  %v3094_v58 = vpop.trf.xlu0 }
 0x333   : > { %3315 = vst [vmem:[%s5204_s6 + $0x28] sm:$0xff] %v3154_v59  ;;  %v3153_v62 = vsel %vm3145_vm13, %v3141_v19, %v3149_v21  ;;  %v3143_v36 = vadd.f32 %v3094_v58, %v5206_v48 }
 0x334   : > { %3314 = vst [vmem:[%s5204_s6 + $0x20] sm:$0xff] %v3153_v62  ;;  %vm3148_vm14 = vcmp.ge.f32.partialorder %v3144_v57, 0.0  ;;  %v3152_v29 = vmul.f32 0.01, %v3144_v57 }
 0x335   : > { %vm3147_vm15 = vcmp.ge.f32.partialorder %v3143_v36, 0.0  ;;  %v3151_v30 = vmul.f32 0.01, %v3143_v36 }
 0x336   : > { %v3156_v4 = vsel %vm3148_vm14, %v3144_v57, %v3152_v29 }
 0x337   : > { %3317 = vst [vmem:[%s5204_s6 + $0x38] sm:$0xff] %v3156_v4  ;;  %v3155_v3 = vsel %vm3147_vm15, %v3143_v36, %v3151_v30 }
 0x338   : > { %3316 = vst [vmem:[%s5204_s6 + $0x30] sm:$0xff] %v3155_v3 }
 0x339 PF: > { %s13_s12 = sadd.s32 1, %s3527_s12  }
 0x33a   : > { %p10_p4 = scmp.ge.s32.totalorder %s13_s12, 6  }
 0x33c   :  { %12 = sbr.rel (!%p10_p4) target bundleno = 1 (0x1), region = 65 }

</bundles_post_ra>
